<compile_context>
chip_gen: v7x
topology: tpu7x:2x2x1
jax: 0.10.0
libtpu: 0.0.40
codegen_flags: <defaults>
</compile_context>

<pallas_src>
import math

import numpy as np
import jax
import jax.numpy as jnp
from jax.experimental import pallas as pl

# ----------------------------- config -------------------------------------
B, CIN, IMG, NF, LAT, NCALLS = 2, 4, 16, 8, 32, 2
NLAYERS = int(math.ceil(math.log2(IMG) - math.log2(16))) + 1   # == 1 for IMG=16
NSTEPS = NLAYERS * NCALLS
CF = 3                         # SinSobel c_factor: [identity, sobel_x, sobel_y]
C3 = NF * CF
HW = IMG * IMG
BNF = B * NF
CSTATE = NF + NF * IMG + NF * IMG + IMG * IMG                  # multi_cut state
KDYN = C3 * NF + NF + NF * NF + NF + C3 * NF + NF              # dyna hyper-net out
PCOL = 128                     # per-step column block of the generated-weight slab

# flat kv-vector offsets (same convention as the previous kernel)
OFF_WI = 0
OFF_BI = C3 * NF
OFF_WO = OFF_BI + NF
OFF_BO = OFF_WO + NF * NF
OFF_WS = OFF_BO + NF
OFF_BS = OFF_WS + C3 * NF

# 3x3 taps: tap[di+1][dj+1] multiplies the neighbour at spatial offset (di, dj)
# TODO(synk): SinSobel reconstructed as identity + depthwise Sobel_x/Sobel_y
# (c_factor=3); exact sin-phase kernel constants of the original repo unknown.
_KX = ((-1.0, 0.0, 1.0), (-2.0, 0.0, 2.0), (-1.0, 0.0, 1.0))
_KY = ((-1.0, -2.0, -1.0), (0.0, 0.0, 0.0), (1.0, 2.0, 1.0))


def _shift_operator(kern, scale, h, w):
    """(HW, HW) matrix A with (x_flat @ A) == zero-padded 3x3 depthwise conv."""
    n = h * w
    a = np.zeros((n, n), np.float32)
    for di in (-1, 0, 1):
        for dj in (-1, 0, 1):
            k = kern[di + 1][dj + 1]
            if k == 0.0:
                continue
            for r in range(h):
                rr = r + di
                if rr < 0 or rr >= h:
                    continue
                for c in range(w):
                    cc = c + dj
                    if cc < 0 or cc >= w:
                        continue
                    a[rr * w + cc, r * w + c] = k * scale
    return a


# --------------------------- the fused kernel ------------------------------
def _encoder_kernel(x_ref, inj_ref, rsel_ref, ttile_ref, kmask_ref,
                    gmat_ref, gvec_ref, bdmask_ref,
                    w_in_ref, b_in_ref, sob_ref,
                    wss_ref, wsx_ref, wsy_ref,
                    w0s_ref, w0x_ref, w0y_ref, w1_ref, b0_ref, b1_ref,
                    dstack_ref, rsum_ref, csum_ref, latb_ref,
                    embs_ref, lat_ref):
    f32 = jnp.float32

    def mm(a, b):
        return jnp.dot(a, b, preferred_element_type=f32)

    def lrelu(v):
        # TODO(synk): ResidualBlock/DynaResidualBlock internals reconstructed
        # (pre-activation 1x1 convs, 0.1 residual scale, slope 0.2 leaky-ReLU).
        return jnp.where(v >= 0.0, v, 0.2 * v)

    km = kmask_ref[...]                                  # (BNF, NF*LAT) 0/1 mask

    # ---- hyper-network: ALL (step, sample) dyna weights from ONE matmul ------
    # masked-Kronecker latent expansion: row (b,i) holds inj_lat[b] in column
    # block i and zeros elsewhere, so the single matmul against gmat emits the
    # per-(step, sample) channel-mix matrices already block-diagonal over b.
    rep = mm(rsel_ref[...], inj_ref[...])                # (BNF, LAT)
    mlat = mm(rep, ttile_ref[...]) * km                  # (BNF, NF*LAT)
    wall = (mm(mlat, gmat_ref[...]) + gvec_ref[...]) * bdmask_ref[...]
    # wall: (BNF, NSTEPS*PCOL); per step: 7 block-diag (BNF,BNF) weight slabs
    # + 3 bias columns at fixed lane offsets (see prepare_operands).

    # ---- in_conv (1x1) on the batch-folded state (B*NF rows, HW lanes) -------
    sb = mm(w_in_ref[...], x_ref[...]) + b_in_ref[...]   # (BNF, HW)
    embs_ref[0, :, :] = sb

    # TODO(synk): for much larger NCALLS turn this static unroll into a
    # lax.fori_loop / grid axis; at NSTEPS=2 full unroll is optimal.
    for c in range(NSTEPS):
        # SinSobel via ONE fused (HW, 2*HW) shift-operator matmul on the MXU;
        # bf16 operands (coefficients are exact in bf16), f32 accumulation.
        gxy = jnp.dot(sb.astype(jnp.bfloat16), sob_ref[...],
                      preferred_element_type=f32)        # (BNF, 2*HW)
        gx = gxy[:, :HW]
        gy = gxy[:, HW:]

        # frac_norm: InstanceNorm2d(affine=False, eps=1e-5), single-pass stats
        def inorm(v):
            m = jnp.mean(v, axis=1, keepdims=True)
            ex2 = jnp.mean(v * v, axis=1, keepdims=True)
            return (v - m) * jax.lax.rsqrt(ex2 - m * m + 1e-5)

        sn, xn, yn = inorm(sb), inorm(gx), inorm(gy)
        ls, lx, ly = lrelu(sn), lrelu(xn), lrelu(yn)

        # generated block-diagonal dyna weights for this step (pure lane slices)
        wc = wall[:, c * PCOL:(c + 1) * PCOL]
        dwi_s, dwi_x, dwi_y = wc[:, 0:BNF], wc[:, BNF:2 * BNF], wc[:, 2 * BNF:3 * BNF]
        dwo = wc[:, 3 * BNF:4 * BNF]
        dws_s, dws_x, dws_y = wc[:, 4 * BNF:5 * BNF], wc[:, 5 * BNF:6 * BNF], wc[:, 6 * BNF:7 * BNF]
        dbi = wc[:, 7 * BNF:7 * BNF + 1]
        dbo = wc[:, 7 * BNF + 1:7 * BNF + 2]
        dbs = wc[:, 7 * BNF + 2:7 * BNF + 3]

        # merged shortcut (shared + dyna); leak_factor already folded in
        short = (mm(wss_ref[...] + dws_s, sn) + mm(wsx_ref[...] + dws_x, xn)
                 + mm(wsy_ref[...] + dws_y, yn) + dbs)
        # shared residual branch (frac_conv)
        h = (mm(w0s_ref[...], ls) + mm(w0x_ref[...], lx)
             + mm(w0y_ref[...], ly) + b0_ref[...])
        h = mm(w1_ref[...], lrelu(h)) + b1_ref[...]
        # dyna residual branch (frac_dyna_conv)
        dh = mm(dwi_s, ls) + mm(dwi_x, lx) + mm(dwi_y, ly) + dbi
        dh = mm(dwo, lrelu(dh)) + dbo

        # out = out + leak * out_new (fire_rate == 1.0; leak baked into weights)
        sb = sb + short + 0.1 * (h + dh)
        embs_ref[c + 1, :, :] = sb
        # TODO(synk): frac_ds (GaussianSmoothing + 0.5x bilinear) never runs
        # for image_size=16 (n_layers == 1), so it is omitted.

    # ---- fused out_conv + multi_cut reductions + out_to_lat ------------------
    z = mm(sb, dstack_ref[...]) * km                     # (BNF, NF*LAT)
    lat_ref[...] = mm(mm(rsum_ref[...], z), csum_ref[...]) + latb_ref[...]


# -------------------- host-side operator preparation (runs once) -----------
def prepare_operands(p):
    f32 = np.float32
    leak = float(np.clip(np.asarray(p['leak'], f32), 0.001, 1000.0))
    eyeB = np.eye(B, dtype=f32)

    # masked-Kronecker helpers (hyper-net expansion + multi_cut contraction)
    rsel = np.kron(eyeB, np.ones((NF, 1), f32))                        # (BNF, B)
    ttile = np.tile(np.eye(LAT, dtype=f32), (1, NF))                   # (LAT, NF*LAT)
    kmask = np.tile(np.kron(np.eye(NF, dtype=f32), np.ones((1, LAT), f32)),
                    (B, 1))                                            # (BNF, NF*LAT)
    rsum = np.kron(eyeB, np.ones((1, NF), f32))                        # (B, BNF)
    csum = np.tile(np.eye(LAT, dtype=f32), (NF, 1))                    # (NF*LAT, LAT)

    # hyper-net: frac_lat_exp composed with the dyna hyper linear (exact: both
    # linear), re-indexed so one matmul emits block-diagonal weight matrices.
    Hw = np.asarray(p['Hw'], f32)
    Hb = np.asarray(p['Hb'], f32)
    Wle = np.asarray(p['Wle'], f32)
    ble = np.asarray(p['ble'], f32)

    col_idx = np.zeros((NF, PCOL), np.int64)
    col_scl = np.zeros((NF, PCOL), f32)          # 0 => unused padding column
    groups = [(OFF_WI, 0, 1.0), (OFF_WI, NF, 1.0), (OFF_WI, 2 * NF, 1.0),
              (OFF_WO, 0, leak),
              (OFF_WS, 0, leak), (OFF_WS, NF, leak), (OFF_WS, 2 * NF, leak)]
    for i in range(NF):
        for g, (off, joff, sc) in enumerate(groups):
            for bp in range(B):
                for j in range(NF):
                    m = g * BNF + bp * NF + j
                    col_idx[i, m] = off + (joff + j) * NF + i
                    col_scl[i, m] = sc
        for m, (off, sc) in zip((7 * BNF, 7 * BNF + 1, 7 * BNF + 2),
                                ((OFF_BI, 1.0), (OFF_BO, leak), (OFF_BS, leak))):
            col_idx[i, m] = off + i
            col_scl[i, m] = sc

    gmat = np.zeros((NF * LAT, NSTEPS * PCOL), f32)
    gvec = np.zeros((BNF, NSTEPS * PCOL), f32)
    for c in range(NSTEPS):
        G = Wle[c] @ Hw                                   # (LAT, KDYN)
        gv = ble[c] @ Hw + Hb                             # (KDYN,)
        gm = G[:, col_idx] * col_scl[None, :, :]          # (LAT, NF, PCOL)
        gmat[:, c * PCOL:(c + 1) * PCOL] = (
            np.transpose(gm, (1, 0, 2)).reshape(NF * LAT, PCOL))
        gvec[:, c * PCOL:(c + 1) * PCOL] = np.tile(gv[col_idx] * col_scl, (B, 1))

    bd1 = np.zeros((BNF, PCOL), f32)                      # block-diagonal mask
    for b in range(B):
        for i in range(NF):
            r = b * NF + i
            for g in range(7):
                bd1[r, g * BNF + b * NF: g * BNF + (b + 1) * NF] = 1.0
            bd1[r, 7 * BNF:7 * BNF + 3] = 1.0
    bdmask = np.tile(bd1, (1, NSTEPS))

    # in_conv / shared ResidualBlock weights, batch block-diagonalized; the
    # clamped leak_factor is folded into every output-side weight (exact).
    w_in_bd = np.kron(eyeB, np.asarray(p['w_in'], f32).T)              # (BNF, B*CIN)
    b_in_bd = np.tile(np.asarray(p['b_in'], f32), B).reshape(BNF, 1)
    wsT = np.asarray(p['ws'], f32).T
    w0T = np.asarray(p['w0'], f32).T
    w1T = np.asarray(p['w1'], f32).T
    wss = leak * np.kron(eyeB, wsT[:, :NF])
    wsx = leak * np.kron(eyeB, wsT[:, NF:2 * NF])
    wsy = leak * np.kron(eyeB, wsT[:, 2 * NF:])
    w0s = np.kron(eyeB, w0T[:, :NF])
    w0x = np.kron(eyeB, w0T[:, NF:2 * NF])
    w0y = np.kron(eyeB, w0T[:, 2 * NF:])
    w1b = leak * np.kron(eyeB, w1T)
    b0b = np.tile(np.asarray(p['b0'], f32), B).reshape(BNF, 1)
    b1b = leak * np.tile(np.asarray(p['b1'], f32), B).reshape(BNF, 1)

    # fused SinSobel shift operators (bf16 operands: +/-0.25, +/-0.5 are exact)
    sob = np.concatenate([_shift_operator(_KX, 0.25, IMG, IMG),
                          _shift_operator(_KY, 0.25, IMG, IMG)], axis=1)

    # out_conv + multi_cut pooling + out_to_lat collapsed into one operator
    w_oc = np.asarray(p['w_out_conv'], f32)               # (NF, C3+1)
    b_oc = np.asarray(p['b_out_conv'], f32)
    w_lat = np.asarray(p['w_lat'], f32)                   # (CSTATE, LAT)
    b_lat = np.asarray(p['b_lat'], f32)
    pidx = np.arange(HW)
    cop = np.zeros((C3 + 1, HW, LAT), f32)                # y[k,p] -> lat coeff
    for f in range(NF):
        cop[f] = w_lat[f] / HW
        cop[NF + f] = w_lat[NF + f * IMG + pidx // IMG] / IMG
        cop[2 * NF + f] = w_lat[NF + NF * IMG + f * IMG + pidx % IMG] / IMG
    cop[3 * NF] = w_lat[NF + 2 * NF * IMG + pidx]
    D = np.einsum('kf,kpl->fpl', w_oc.T, cop)              # (NF, HW, LAT)
    dstack = np.transpose(D, (1, 0, 2)).reshape(HW, NF * LAT)
    lat_bias = np.tile((b_lat + np.einsum('k,kpl->l', b_oc, cop)).reshape(1, LAT),
                       (B, 1))

    ops = [jnp.asarray(a, jnp.float32) for a in
           (rsel, ttile, kmask, gmat, gvec, bdmask, w_in_bd, b_in_bd)]
    ops.append(jnp.asarray(sob, jnp.bfloat16))
    ops += [jnp.asarray(a, jnp.float32) for a in
            (wss, wsx, wsy, w0s, w0x, w0y, w1b, b0b, b1b,
             dstack, rsum, csum, lat_bias)]
    return tuple(ops)


# ------------------------------ forward ------------------------------------
def injected_encoder_forward(x_nchw, inj_lat, ops):
    b = x_nchw.shape[0]
    # batch-folded layout (B*CIN rows, HW lanes): pure metadata reshape of NCHW
    x_r = x_nchw.reshape(b * CIN, HW)

    embs, lat = pl.pallas_call(
        _encoder_kernel,
        out_shape=(
            jax.ShapeDtypeStruct((NSTEPS + 1, b * NF, HW), jnp.float32),  # embs
            jax.ShapeDtypeStruct((b, LAT), jnp.float32),                  # latent
        ),
    )(x_r, inj_lat, *ops)

    # (B*NF, HW) rows are (b, channel)-major -> NCHW is a metadata-only reshape
    out_embs = [embs[i].reshape(b, NF, IMG, IMG) for i in range(NSTEPS + 1)]
    return lat, out_embs, None


# ------------------------- deterministic params -----------------------------
def make_params(key):
    keys = jax.random.split(key, 9)

    def w(k, shape, fan_in, scale=1.0):
        return (scale / math.sqrt(fan_in)) * jax.random.normal(k, shape,
                                                               dtype=jnp.float32)

    return dict(
        w_in=w(keys[0], (CIN, NF), CIN), b_in=jnp.zeros((NF,), jnp.float32),
        ws=w(keys[1], (C3, NF), C3),
        w0=w(keys[2], (C3, NF), C3), b0=jnp.zeros((NF,), jnp.float32),
        w1=w(keys[3], (NF, NF), NF), b1=jnp.zeros((NF,), jnp.float32),
        Hw=w(keys[4], (LAT, KDYN), LAT, scale=0.5),
        Hb=w(keys[5], (KDYN,), 1.0, scale=0.05),
        Wle=w(keys[6], (NSTEPS, LAT, LAT), LAT),
        ble=jnp.zeros((NSTEPS, LAT), jnp.float32),
        w_out_conv=w(keys[7], (NF, C3 + 1), NF),
        b_out_conv=jnp.zeros((C3 + 1,), jnp.float32),
        w_lat=w(keys[8], (CSTATE, LAT), CSTATE),
        b_lat=jnp.zeros((LAT,), jnp.float32),
        leak=jnp.array(0.1, jnp.float32),   # nn.Parameter(torch.ones([]) * 0.1)
    )


if __name__ == "__main__":
    key = jax.random.PRNGKey(0)
    kx, kl, kp = jax.random.split(key, 3)
    x = jax.random.normal(kx, (B, CIN, IMG, IMG), dtype=jnp.float32)   # NCHW input
    inj_lat = jax.random.normal(kl, (B, LAT), dtype=jnp.float32)
    params = make_params(kp)
    ops = prepare_operands(params)        # once, outside the jitted forward

    fwd = jax.jit(lambda xx, ll: injected_encoder_forward(xx, ll, ops))
    lat, out_embs, _ = fwd(x, inj_lat)
    jax.block_until_ready(lat)
    assert lat.shape == (B, LAT)
    assert len(out_embs) == NSTEPS + 1
    assert out_embs[0].shape == (B, NF, IMG, IMG)
    print("KERNEL_OK")
</pallas_src>

<mosaic_0001>
module attributes {stable_mosaic.version = 11 : i64} {
  func.func @_encoder_kernel(%arg0: memref<8x256xf32, #tpu.memory_space<vmem>>, %arg1: memref<2x32xf32, #tpu.memory_space<vmem>>, %arg2: memref<16x2xf32, #tpu.memory_space<vmem>>, %arg3: memref<32x256xf32, #tpu.memory_space<vmem>>, %arg4: memref<16x256xf32, #tpu.memory_space<vmem>>, %arg5: memref<256x256xf32, #tpu.memory_space<vmem>>, %arg6: memref<16x256xf32, #tpu.memory_space<vmem>>, %arg7: memref<16x256xf32, #tpu.memory_space<vmem>>, %arg8: memref<16x8xf32, #tpu.memory_space<vmem>>, %arg9: memref<16x1xf32, #tpu.memory_space<vmem>>, %arg10: memref<256x512xbf16, #tpu.memory_space<vmem>>, %arg11: memref<16x16xf32, #tpu.memory_space<vmem>>, %arg12: memref<16x16xf32, #tpu.memory_space<vmem>>, %arg13: memref<16x16xf32, #tpu.memory_space<vmem>>, %arg14: memref<16x16xf32, #tpu.memory_space<vmem>>, %arg15: memref<16x16xf32, #tpu.memory_space<vmem>>, %arg16: memref<16x16xf32, #tpu.memory_space<vmem>>, %arg17: memref<16x16xf32, #tpu.memory_space<vmem>>, %arg18: memref<16x1xf32, #tpu.memory_space<vmem>>, %arg19: memref<16x1xf32, #tpu.memory_space<vmem>>, %arg20: memref<256x256xf32, #tpu.memory_space<vmem>>, %arg21: memref<2x16xf32, #tpu.memory_space<vmem>>, %arg22: memref<256x32xf32, #tpu.memory_space<vmem>>, %arg23: memref<2x32xf32, #tpu.memory_space<vmem>>, %arg24: memref<3x16x256xf32, #tpu.memory_space<vmem>>, %arg25: memref<2x32xf32, #tpu.memory_space<vmem>>) attributes {dimension_semantics = [], scalar_prefetch = 0 : i64, scratch_operands = 0 : i64, tpu.core_type = #tpu.core_type<tc>} {
    %c0 = arith.constant 0 : index
    %c0_0 = arith.constant 0 : index
    %0 = vector.load %arg4[%c0, %c0_0] : memref<16x256xf32, #tpu.memory_space<vmem>>, vector<16x256xf32>
    %c0_1 = arith.constant 0 : index
    %c0_2 = arith.constant 0 : index
    %1 = vector.load %arg2[%c0_1, %c0_2] : memref<16x2xf32, #tpu.memory_space<vmem>>, vector<16x2xf32>
    %c0_3 = arith.constant 0 : index
    %c0_4 = arith.constant 0 : index
    %2 = vector.load %arg1[%c0_3, %c0_4] : memref<2x32xf32, #tpu.memory_space<vmem>>, vector<2x32xf32>
    %cst = arith.constant dense<0.000000e+00> : vector<16x32xf32>
    %3 = tpu.matmul %1, %2, %cst {dimension_numbers = #tpu.dot_dimension_numbers<[1], [0], [0], [1], [0, 0, 1, 1], [], []>} : vector<16x2xf32>, vector<2x32xf32>, vector<16x32xf32> -> vector<16x32xf32>
    %c0_5 = arith.constant 0 : index
    %c0_6 = arith.constant 0 : index
    %4 = vector.load %arg3[%c0_5, %c0_6] : memref<32x256xf32, #tpu.memory_space<vmem>>, vector<32x256xf32>
    %cst_7 = arith.constant dense<0.000000e+00> : vector<16x256xf32>
    %5 = tpu.matmul %3, %4, %cst_7 {dimension_numbers = #tpu.dot_dimension_numbers<[1], [0], [0], [1], [0, 0, 1, 1], [], []>} : vector<16x32xf32>, vector<32x256xf32>, vector<16x256xf32> -> vector<16x256xf32>
    %6 = arith.mulf %5, %0 : vector<16x256xf32>
    %c0_8 = arith.constant 0 : index
    %c0_9 = arith.constant 0 : index
    %7 = vector.load %arg5[%c0_8, %c0_9] : memref<256x256xf32, #tpu.memory_space<vmem>>, vector<256x256xf32>
    %cst_10 = arith.constant dense<0.000000e+00> : vector<16x256xf32>
    %8 = tpu.matmul %6, %7, %cst_10 {dimension_numbers = #tpu.dot_dimension_numbers<[1], [0], [0], [1], [0, 0, 1, 1], [], []>} : vector<16x256xf32>, vector<256x256xf32>, vector<16x256xf32> -> vector<16x256xf32>
    %c0_11 = arith.constant 0 : index
    %c0_12 = arith.constant 0 : index
    %9 = vector.load %arg6[%c0_11, %c0_12] : memref<16x256xf32, #tpu.memory_space<vmem>>, vector<16x256xf32>
    %10 = arith.addf %8, %9 : vector<16x256xf32>
    %c0_13 = arith.constant 0 : index
    %c0_14 = arith.constant 0 : index
    %11 = vector.load %arg7[%c0_13, %c0_14] : memref<16x256xf32, #tpu.memory_space<vmem>>, vector<16x256xf32>
    %12 = arith.mulf %10, %11 : vector<16x256xf32>
    %c0_15 = arith.constant 0 : index
    %c0_16 = arith.constant 0 : index
    %13 = vector.load %arg8[%c0_15, %c0_16] : memref<16x8xf32, #tpu.memory_space<vmem>>, vector<16x8xf32>
    %c0_17 = arith.constant 0 : index
    %c0_18 = arith.constant 0 : index
    %14 = vector.load %arg0[%c0_17, %c0_18] : memref<8x256xf32, #tpu.memory_space<vmem>>, vector<8x256xf32>
    %cst_19 = arith.constant dense<0.000000e+00> : vector<16x256xf32>
    %15 = tpu.matmul %13, %14, %cst_19 {dimension_numbers = #tpu.dot_dimension_numbers<[1], [0], [0], [1], [0, 0, 1, 1], [], []>} : vector<16x8xf32>, vector<8x256xf32>, vector<16x256xf32> -> vector<16x256xf32>
    %c0_20 = arith.constant 0 : index
    %c0_21 = arith.constant 0 : index
    %16 = vector.load %arg9[%c0_20, %c0_21] : memref<16x1xf32, #tpu.memory_space<vmem>>, vector<16x1xf32>
    %17 = vector.broadcast %16 : vector<16x1xf32> to vector<16x256xf32>
    %18 = arith.addf %15, %17 : vector<16x256xf32>
    %c0_22 = arith.constant 0 : index
    %c0_23 = arith.constant 0 : index
    %c0_24 = arith.constant 0 : index
    %19 = vector.load %arg24[%c0_22, %c0_23, %c0_24] : memref<3x16x256xf32, #tpu.memory_space<vmem>>, vector<1x16x256xf32>
    %20 = vector.shape_cast %19 : vector<1x16x256xf32> to vector<16x256xf32>
    %21 = vector.shape_cast %18 : vector<16x256xf32> to vector<1x16x256xf32>
    tpu.vector_store %arg24[%c0_22, %c0_23, %c0_24], %21 {strides = array<i32>} : memref<3x16x256xf32, #tpu.memory_space<vmem>>, vector<1x16x256xf32>,
    %22 = arith.truncf %18 : vector<16x256xf32> to vector<16x256xbf16>
    %c0_25 = arith.constant 0 : index
    %c0_26 = arith.constant 0 : index
    %23 = vector.load %arg10[%c0_25, %c0_26] : memref<256x512xbf16, #tpu.memory_space<vmem>>, vector<256x512xbf16>
    %cst_27 = arith.constant dense<0.000000e+00> : vector<16x512xf32>
    %24 = tpu.matmul %22, %23, %cst_27 {dimension_numbers = #tpu.dot_dimension_numbers<[1], [0], [0], [1], [0, 0, 1, 1], [], []>} : vector<16x256xbf16>, vector<256x512xbf16>, vector<16x512xf32> -> vector<16x512xf32>
    %25 = vector.extract_strided_slice %24 {offsets = [0, 0], sizes = [16, 256], strides = [1, 1]} : vector<16x512xf32> to vector<16x256xf32>
    %26 = vector.extract_strided_slice %24 {offsets = [0, 256], sizes = [16, 256], strides = [1, 1]} : vector<16x512xf32> to vector<16x256xf32>
    %cst_28 = arith.constant dense<0.000000e+00> : vector<16xf32>
    %27 = vector.multi_reduction <add>, %18, %cst_28 [1] : vector<16x256xf32> to vector<16xf32>
    %28 = vector.shape_cast %27 : vector<16xf32> to vector<16x1xf32>
    %cst_29 = arith.constant 2.560000e+02 : f32
    %29 = vector.broadcast %cst_29 : f32 to vector<16x1xf32>
    %30 = arith.divf %28, %29 : vector<16x1xf32>
    %31 = arith.mulf %18, %18 : vector<16x256xf32>
    %cst_30 = arith.constant dense<0.000000e+00> : vector<16xf32>
    %32 = vector.multi_reduction <add>, %31, %cst_30 [1] : vector<16x256xf32> to vector<16xf32>
    %33 = vector.shape_cast %32 : vector<16xf32> to vector<16x1xf32>
    %cst_31 = arith.constant 2.560000e+02 : f32
    %34 = vector.broadcast %cst_31 : f32 to vector<16x1xf32>
    %35 = arith.divf %33, %34 : vector<16x1xf32>
    %36 = vector.broadcast %30 : vector<16x1xf32> to vector<16x256xf32>
    %37 = arith.subf %18, %36 : vector<16x256xf32>
    %38 = arith.mulf %30, %30 : vector<16x1xf32>
    %39 = arith.subf %35, %38 : vector<16x1xf32>
    %cst_32 = arith.constant 9.99999974E-6 : f32
    %40 = vector.broadcast %cst_32 : f32 to vector<16x1xf32>
    %41 = arith.addf %39, %40 : vector<16x1xf32>
    %42 = math.rsqrt %41 : vector<16x1xf32>
    %43 = vector.broadcast %42 : vector<16x1xf32> to vector<16x256xf32>
    %44 = arith.mulf %37, %43 : vector<16x256xf32>
    %cst_33 = arith.constant dense<0.000000e+00> : vector<16xf32>
    %45 = vector.multi_reduction <add>, %25, %cst_33 [1] : vector<16x256xf32> to vector<16xf32>
    %46 = vector.shape_cast %45 : vector<16xf32> to vector<16x1xf32>
    %cst_34 = arith.constant 2.560000e+02 : f32
    %47 = vector.broadcast %cst_34 : f32 to vector<16x1xf32>
    %48 = arith.divf %46, %47 : vector<16x1xf32>
    %49 = arith.mulf %25, %25 : vector<16x256xf32>
    %cst_35 = arith.constant dense<0.000000e+00> : vector<16xf32>
    %50 = vector.multi_reduction <add>, %49, %cst_35 [1] : vector<16x256xf32> to vector<16xf32>
    %51 = vector.shape_cast %50 : vector<16xf32> to vector<16x1xf32>
    %cst_36 = arith.constant 2.560000e+02 : f32
    %52 = vector.broadcast %cst_36 : f32 to vector<16x1xf32>
    %53 = arith.divf %51, %52 : vector<16x1xf32>
    %54 = vector.broadcast %48 : vector<16x1xf32> to vector<16x256xf32>
    %55 = arith.subf %25, %54 : vector<16x256xf32>
    %56 = arith.mulf %48, %48 : vector<16x1xf32>
    %57 = arith.subf %53, %56 : vector<16x1xf32>
    %cst_37 = arith.constant 9.99999974E-6 : f32
    %58 = vector.broadcast %cst_37 : f32 to vector<16x1xf32>
    %59 = arith.addf %57, %58 : vector<16x1xf32>
    %60 = math.rsqrt %59 : vector<16x1xf32>
    %61 = vector.broadcast %60 : vector<16x1xf32> to vector<16x256xf32>
    %62 = arith.mulf %55, %61 : vector<16x256xf32>
    %cst_38 = arith.constant dense<0.000000e+00> : vector<16xf32>
    %63 = vector.multi_reduction <add>, %26, %cst_38 [1] : vector<16x256xf32> to vector<16xf32>
    %64 = vector.shape_cast %63 : vector<16xf32> to vector<16x1xf32>
    %cst_39 = arith.constant 2.560000e+02 : f32
    %65 = vector.broadcast %cst_39 : f32 to vector<16x1xf32>
    %66 = arith.divf %64, %65 : vector<16x1xf32>
    %67 = arith.mulf %26, %26 : vector<16x256xf32>
    %cst_40 = arith.constant dense<0.000000e+00> : vector<16xf32>
    %68 = vector.multi_reduction <add>, %67, %cst_40 [1] : vector<16x256xf32> to vector<16xf32>
    %69 = vector.shape_cast %68 : vector<16xf32> to vector<16x1xf32>
    %cst_41 = arith.constant 2.560000e+02 : f32
    %70 = vector.broadcast %cst_41 : f32 to vector<16x1xf32>
    %71 = arith.divf %69, %70 : vector<16x1xf32>
    %72 = vector.broadcast %66 : vector<16x1xf32> to vector<16x256xf32>
    %73 = arith.subf %26, %72 : vector<16x256xf32>
    %74 = arith.mulf %66, %66 : vector<16x1xf32>
    %75 = arith.subf %71, %74 : vector<16x1xf32>
    %cst_42 = arith.constant 9.99999974E-6 : f32
    %76 = vector.broadcast %cst_42 : f32 to vector<16x1xf32>
    %77 = arith.addf %75, %76 : vector<16x1xf32>
    %78 = math.rsqrt %77 : vector<16x1xf32>
    %79 = vector.broadcast %78 : vector<16x1xf32> to vector<16x256xf32>
    %80 = arith.mulf %73, %79 : vector<16x256xf32>
    %cst_43 = arith.constant 0.000000e+00 : f32
    %81 = vector.broadcast %cst_43 : f32 to vector<16x256xf32>
    %82 = arith.cmpf oge, %44, %81 : vector<16x256xf32>
    %cst_44 = arith.constant 2.000000e-01 : f32
    %83 = vector.broadcast %cst_44 : f32 to vector<16x256xf32>
    %84 = arith.mulf %83, %44 : vector<16x256xf32>
    %85 = arith.select %82, %44, %84 : vector<16x256xi1>, vector<16x256xf32>
    %cst_45 = arith.constant 0.000000e+00 : f32
    %86 = vector.broadcast %cst_45 : f32 to vector<16x256xf32>
    %87 = arith.cmpf oge, %62, %86 : vector<16x256xf32>
    %cst_46 = arith.constant 2.000000e-01 : f32
    %88 = vector.broadcast %cst_46 : f32 to vector<16x256xf32>
    %89 = arith.mulf %88, %62 : vector<16x256xf32>
    %90 = arith.select %87, %62, %89 : vector<16x256xi1>, vector<16x256xf32>
    %cst_47 = arith.constant 0.000000e+00 : f32
    %91 = vector.broadcast %cst_47 : f32 to vector<16x256xf32>
    %92 = arith.cmpf oge, %80, %91 : vector<16x256xf32>
    %cst_48 = arith.constant 2.000000e-01 : f32
    %93 = vector.broadcast %cst_48 : f32 to vector<16x256xf32>
    %94 = arith.mulf %93, %80 : vector<16x256xf32>
    %95 = arith.select %92, %80, %94 : vector<16x256xi1>, vector<16x256xf32>
    %96 = vector.extract_strided_slice %12 {offsets = [0, 0], sizes = [16, 128], strides = [1, 1]} : vector<16x256xf32> to vector<16x128xf32>
    %97 = vector.extract_strided_slice %96 {offsets = [0, 0], sizes = [16, 16], strides = [1, 1]} : vector<16x128xf32> to vector<16x16xf32>
    %98 = vector.extract_strided_slice %96 {offsets = [0, 16], sizes = [16, 16], strides = [1, 1]} : vector<16x128xf32> to vector<16x16xf32>
    %99 = vector.extract_strided_slice %96 {offsets = [0, 32], sizes = [16, 16], strides = [1, 1]} : vector<16x128xf32> to vector<16x16xf32>
    %100 = vector.extract_strided_slice %96 {offsets = [0, 48], sizes = [16, 16], strides = [1, 1]} : vector<16x128xf32> to vector<16x16xf32>
    %101 = vector.extract_strided_slice %96 {offsets = [0, 64], sizes = [16, 16], strides = [1, 1]} : vector<16x128xf32> to vector<16x16xf32>
    %102 = vector.extract_strided_slice %96 {offsets = [0, 80], sizes = [16, 16], strides = [1, 1]} : vector<16x128xf32> to vector<16x16xf32>
    %103 = vector.extract_strided_slice %96 {offsets = [0, 96], sizes = [16, 16], strides = [1, 1]} : vector<16x128xf32> to vector<16x16xf32>
    %104 = vector.extract_strided_slice %96 {offsets = [0, 112], sizes = [16, 1], strides = [1, 1]} : vector<16x128xf32> to vector<16x1xf32>
    %105 = vector.extract_strided_slice %96 {offsets = [0, 113], sizes = [16, 1], strides = [1, 1]} : vector<16x128xf32> to vector<16x1xf32>
    %106 = vector.extract_strided_slice %96 {offsets = [0, 114], sizes = [16, 1], strides = [1, 1]} : vector<16x128xf32> to vector<16x1xf32>
    %c0_49 = arith.constant 0 : index
    %c0_50 = arith.constant 0 : index
    %107 = vector.load %arg11[%c0_49, %c0_50] : memref<16x16xf32, #tpu.memory_space<vmem>>, vector<16x16xf32>
    %108 = arith.addf %107, %101 : vector<16x16xf32>
    %cst_51 = arith.constant dense<0.000000e+00> : vector<16x256xf32>
    %109 = tpu.matmul %108, %44, %cst_51 {dimension_numbers = #tpu.dot_dimension_numbers<[1], [0], [0], [1], [0, 0, 1, 1], [], []>} : vector<16x16xf32>, vector<16x256xf32>, vector<16x256xf32> -> vector<16x256xf32>
    %c0_52 = arith.constant 0 : index
    %c0_53 = arith.constant 0 : index
    %110 = vector.load %arg12[%c0_52, %c0_53] : memref<16x16xf32, #tpu.memory_space<vmem>>, vector<16x16xf32>
    %111 = arith.addf %110, %102 : vector<16x16xf32>
    %cst_54 = arith.constant dense<0.000000e+00> : vector<16x256xf32>
    %112 = tpu.matmul %111, %62, %cst_54 {dimension_numbers = #tpu.dot_dimension_numbers<[1], [0], [0], [1], [0, 0, 1, 1], [], []>} : vector<16x16xf32>, vector<16x256xf32>, vector<16x256xf32> -> vector<16x256xf32>
    %113 = arith.addf %109, %112 : vector<16x256xf32>
    %c0_55 = arith.constant 0 : index
    %c0_56 = arith.constant 0 : index
    %114 = vector.load %arg13[%c0_55, %c0_56] : memref<16x16xf32, #tpu.memory_space<vmem>>, vector<16x16xf32>
    %115 = arith.addf %114, %103 : vector<16x16xf32>
    %cst_57 = arith.constant dense<0.000000e+00> : vector<16x256xf32>
    %116 = tpu.matmul %115, %80, %cst_57 {dimension_numbers = #tpu.dot_dimension_numbers<[1], [0], [0], [1], [0, 0, 1, 1], [], []>} : vector<16x16xf32>, vector<16x256xf32>, vector<16x256xf32> -> vector<16x256xf32>
    %117 = arith.addf %113, %116 : vector<16x256xf32>
    %118 = vector.broadcast %106 : vector<16x1xf32> to vector<16x256xf32>
    %119 = arith.addf %117, %118 : vector<16x256xf32>
    %c0_58 = arith.constant 0 : index
    %c0_59 = arith.constant 0 : index
    %120 = vector.load %arg14[%c0_58, %c0_59] : memref<16x16xf32, #tpu.memory_space<vmem>>, vector<16x16xf32>
    %cst_60 = arith.constant dense<0.000000e+00> : vector<16x256xf32>
    %121 = tpu.matmul %120, %85, %cst_60 {dimension_numbers = #tpu.dot_dimension_numbers<[1], [0], [0], [1], [0, 0, 1, 1], [], []>} : vector<16x16xf32>, vector<16x256xf32>, vector<16x256xf32> -> vector<16x256xf32>
    %c0_61 = arith.constant 0 : index
    %c0_62 = arith.constant 0 : index
    %122 = vector.load %arg15[%c0_61, %c0_62] : memref<16x16xf32, #tpu.memory_space<vmem>>, vector<16x16xf32>
    %cst_63 = arith.constant dense<0.000000e+00> : vector<16x256xf32>
    %123 = tpu.matmul %122, %90, %cst_63 {dimension_numbers = #tpu.dot_dimension_numbers<[1], [0], [0], [1], [0, 0, 1, 1], [], []>} : vector<16x16xf32>, vector<16x256xf32>, vector<16x256xf32> -> vector<16x256xf32>
    %124 = arith.addf %121, %123 : vector<16x256xf32>
    %c0_64 = arith.constant 0 : index
    %c0_65 = arith.constant 0 : index
    %125 = vector.load %arg16[%c0_64, %c0_65] : memref<16x16xf32, #tpu.memory_space<vmem>>, vector<16x16xf32>
    %cst_66 = arith.constant dense<0.000000e+00> : vector<16x256xf32>
    %126 = tpu.matmul %125, %95, %cst_66 {dimension_numbers = #tpu.dot_dimension_numbers<[1], [0], [0], [1], [0, 0, 1, 1], [], []>} : vector<16x16xf32>, vector<16x256xf32>, vector<16x256xf32> -> vector<16x256xf32>
    %127 = arith.addf %124, %126 : vector<16x256xf32>
    %c0_67 = arith.constant 0 : index
    %c0_68 = arith.constant 0 : index
    %128 = vector.load %arg18[%c0_67, %c0_68] : memref<16x1xf32, #tpu.memory_space<vmem>>, vector<16x1xf32>
    %129 = vector.broadcast %128 : vector<16x1xf32> to vector<16x256xf32>
    %130 = arith.addf %127, %129 : vector<16x256xf32>
    %c0_69 = arith.constant 0 : index
    %c0_70 = arith.constant 0 : index
    %131 = vector.load %arg17[%c0_69, %c0_70] : memref<16x16xf32, #tpu.memory_space<vmem>>, vector<16x16xf32>
    %cst_71 = arith.constant 0.000000e+00 : f32
    %132 = vector.broadcast %cst_71 : f32 to vector<16x256xf32>
    %133 = arith.cmpf oge, %130, %132 : vector<16x256xf32>
    %cst_72 = arith.constant 2.000000e-01 : f32
    %134 = vector.broadcast %cst_72 : f32 to vector<16x256xf32>
    %135 = arith.mulf %134, %130 : vector<16x256xf32>
    %136 = arith.select %133, %130, %135 : vector<16x256xi1>, vector<16x256xf32>
    %cst_73 = arith.constant dense<0.000000e+00> : vector<16x256xf32>
    %137 = tpu.matmul %131, %136, %cst_73 {dimension_numbers = #tpu.dot_dimension_numbers<[1], [0], [0], [1], [0, 0, 1, 1], [], []>} : vector<16x16xf32>, vector<16x256xf32>, vector<16x256xf32> -> vector<16x256xf32>
    %c0_74 = arith.constant 0 : index
    %c0_75 = arith.constant 0 : index
    %138 = vector.load %arg19[%c0_74, %c0_75] : memref<16x1xf32, #tpu.memory_space<vmem>>, vector<16x1xf32>
    %139 = vector.broadcast %138 : vector<16x1xf32> to vector<16x256xf32>
    %140 = arith.addf %137, %139 : vector<16x256xf32>
    %cst_76 = arith.constant dense<0.000000e+00> : vector<16x256xf32>
    %141 = tpu.matmul %97, %85, %cst_76 {dimension_numbers = #tpu.dot_dimension_numbers<[1], [0], [0], [1], [0, 0, 1, 1], [], []>} : vector<16x16xf32>, vector<16x256xf32>, vector<16x256xf32> -> vector<16x256xf32>
    %cst_77 = arith.constant dense<0.000000e+00> : vector<16x256xf32>
    %142 = tpu.matmul %98, %90, %cst_77 {dimension_numbers = #tpu.dot_dimension_numbers<[1], [0], [0], [1], [0, 0, 1, 1], [], []>} : vector<16x16xf32>, vector<16x256xf32>, vector<16x256xf32> -> vector<16x256xf32>
    %143 = arith.addf %141, %142 : vector<16x256xf32>
    %cst_78 = arith.constant dense<0.000000e+00> : vector<16x256xf32>
    %144 = tpu.matmul %99, %95, %cst_78 {dimension_numbers = #tpu.dot_dimension_numbers<[1], [0], [0], [1], [0, 0, 1, 1], [], []>} : vector<16x16xf32>, vector<16x256xf32>, vector<16x256xf32> -> vector<16x256xf32>
    %145 = arith.addf %143, %144 : vector<16x256xf32>
    %146 = vector.broadcast %104 : vector<16x1xf32> to vector<16x256xf32>
    %147 = arith.addf %145, %146 : vector<16x256xf32>
    %cst_79 = arith.constant 0.000000e+00 : f32
    %148 = vector.broadcast %cst_79 : f32 to vector<16x256xf32>
    %149 = arith.cmpf oge, %147, %148 : vector<16x256xf32>
    %cst_80 = arith.constant 2.000000e-01 : f32
    %150 = vector.broadcast %cst_80 : f32 to vector<16x256xf32>
    %151 = arith.mulf %150, %147 : vector<16x256xf32>
    %152 = arith.select %149, %147, %151 : vector<16x256xi1>, vector<16x256xf32>
    %cst_81 = arith.constant dense<0.000000e+00> : vector<16x256xf32>
    %153 = tpu.matmul %100, %152, %cst_81 {dimension_numbers = #tpu.dot_dimension_numbers<[1], [0], [0], [1], [0, 0, 1, 1], [], []>} : vector<16x16xf32>, vector<16x256xf32>, vector<16x256xf32> -> vector<16x256xf32>
    %154 = vector.broadcast %105 : vector<16x1xf32> to vector<16x256xf32>
    %155 = arith.addf %153, %154 : vector<16x256xf32>
    %156 = arith.addf %18, %119 : vector<16x256xf32>
    %157 = arith.addf %140, %155 : vector<16x256xf32>
    %cst_82 = arith.constant 1.000000e-01 : f32
    %158 = vector.broadcast %cst_82 : f32 to vector<16x256xf32>
    %159 = arith.mulf %158, %157 : vector<16x256xf32>
    %160 = arith.addf %156, %159 : vector<16x256xf32>
    %c1 = arith.constant 1 : index
    %c0_83 = arith.constant 0 : index
    %c0_84 = arith.constant 0 : index
    %161 = vector.load %arg24[%c1, %c0_83, %c0_84] : memref<3x16x256xf32, #tpu.memory_space<vmem>>, vector<1x16x256xf32>
    %162 = vector.shape_cast %161 : vector<1x16x256xf32> to vector<16x256xf32>
    %163 = vector.shape_cast %160 : vector<16x256xf32> to vector<1x16x256xf32>
    tpu.vector_store %arg24[%c1, %c0_83, %c0_84], %163 {strides = array<i32>} : memref<3x16x256xf32, #tpu.memory_space<vmem>>, vector<1x16x256xf32>,
    %164 = arith.truncf %160 : vector<16x256xf32> to vector<16x256xbf16>
    %c0_85 = arith.constant 0 : index
    %c0_86 = arith.constant 0 : index
    %165 = vector.load %arg10[%c0_85, %c0_86] : memref<256x512xbf16, #tpu.memory_space<vmem>>, vector<256x512xbf16>
    %cst_87 = arith.constant dense<0.000000e+00> : vector<16x512xf32>
    %166 = tpu.matmul %164, %165, %cst_87 {dimension_numbers = #tpu.dot_dimension_numbers<[1], [0], [0], [1], [0, 0, 1, 1], [], []>} : vector<16x256xbf16>, vector<256x512xbf16>, vector<16x512xf32> -> vector<16x512xf32>
    %167 = vector.extract_strided_slice %166 {offsets = [0, 0], sizes = [16, 256], strides = [1, 1]} : vector<16x512xf32> to vector<16x256xf32>
    %168 = vector.extract_strided_slice %166 {offsets = [0, 256], sizes = [16, 256], strides = [1, 1]} : vector<16x512xf32> to vector<16x256xf32>
    %cst_88 = arith.constant dense<0.000000e+00> : vector<16xf32>
    %169 = vector.multi_reduction <add>, %160, %cst_88 [1] : vector<16x256xf32> to vector<16xf32>
    %170 = vector.shape_cast %169 : vector<16xf32> to vector<16x1xf32>
    %cst_89 = arith.constant 2.560000e+02 : f32
    %171 = vector.broadcast %cst_89 : f32 to vector<16x1xf32>
    %172 = arith.divf %170, %171 : vector<16x1xf32>
    %173 = arith.mulf %160, %160 : vector<16x256xf32>
    %cst_90 = arith.constant dense<0.000000e+00> : vector<16xf32>
    %174 = vector.multi_reduction <add>, %173, %cst_90 [1] : vector<16x256xf32> to vector<16xf32>
    %175 = vector.shape_cast %174 : vector<16xf32> to vector<16x1xf32>
    %cst_91 = arith.constant 2.560000e+02 : f32
    %176 = vector.broadcast %cst_91 : f32 to vector<16x1xf32>
    %177 = arith.divf %175, %176 : vector<16x1xf32>
    %178 = vector.broadcast %172 : vector<16x1xf32> to vector<16x256xf32>
    %179 = arith.subf %160, %178 : vector<16x256xf32>
    %180 = arith.mulf %172, %172 : vector<16x1xf32>
    %181 = arith.subf %177, %180 : vector<16x1xf32>
    %cst_92 = arith.constant 9.99999974E-6 : f32
    %182 = vector.broadcast %cst_92 : f32 to vector<16x1xf32>
    %183 = arith.addf %181, %182 : vector<16x1xf32>
    %184 = math.rsqrt %183 : vector<16x1xf32>
    %185 = vector.broadcast %184 : vector<16x1xf32> to vector<16x256xf32>
    %186 = arith.mulf %179, %185 : vector<16x256xf32>
    %cst_93 = arith.constant dense<0.000000e+00> : vector<16xf32>
    %187 = vector.multi_reduction <add>, %167, %cst_93 [1] : vector<16x256xf32> to vector<16xf32>
    %188 = vector.shape_cast %187 : vector<16xf32> to vector<16x1xf32>
    %cst_94 = arith.constant 2.560000e+02 : f32
    %189 = vector.broadcast %cst_94 : f32 to vector<16x1xf32>
    %190 = arith.divf %188, %189 : vector<16x1xf32>
    %191 = arith.mulf %167, %167 : vector<16x256xf32>
    %cst_95 = arith.constant dense<0.000000e+00> : vector<16xf32>
    %192 = vector.multi_reduction <add>, %191, %cst_95 [1] : vector<16x256xf32> to vector<16xf32>
    %193 = vector.shape_cast %192 : vector<16xf32> to vector<16x1xf32>
    %cst_96 = arith.constant 2.560000e+02 : f32
    %194 = vector.broadcast %cst_96 : f32 to vector<16x1xf32>
    %195 = arith.divf %193, %194 : vector<16x1xf32>
    %196 = vector.broadcast %190 : vector<16x1xf32> to vector<16x256xf32>
    %197 = arith.subf %167, %196 : vector<16x256xf32>
    %198 = arith.mulf %190, %190 : vector<16x1xf32>
    %199 = arith.subf %195, %198 : vector<16x1xf32>
    %cst_97 = arith.constant 9.99999974E-6 : f32
    %200 = vector.broadcast %cst_97 : f32 to vector<16x1xf32>
    %201 = arith.addf %199, %200 : vector<16x1xf32>
    %202 = math.rsqrt %201 : vector<16x1xf32>
    %203 = vector.broadcast %202 : vector<16x1xf32> to vector<16x256xf32>
    %204 = arith.mulf %197, %203 : vector<16x256xf32>
    %cst_98 = arith.constant dense<0.000000e+00> : vector<16xf32>
    %205 = vector.multi_reduction <add>, %168, %cst_98 [1] : vector<16x256xf32> to vector<16xf32>
    %206 = vector.shape_cast %205 : vector<16xf32> to vector<16x1xf32>
    %cst_99 = arith.constant 2.560000e+02 : f32
    %207 = vector.broadcast %cst_99 : f32 to vector<16x1xf32>
    %208 = arith.divf %206, %207 : vector<16x1xf32>
    %209 = arith.mulf %168, %168 : vector<16x256xf32>
    %cst_100 = arith.constant dense<0.000000e+00> : vector<16xf32>
    %210 = vector.multi_reduction <add>, %209, %cst_100 [1] : vector<16x256xf32> to vector<16xf32>
    %211 = vector.shape_cast %210 : vector<16xf32> to vector<16x1xf32>
    %cst_101 = arith.constant 2.560000e+02 : f32
    %212 = vector.broadcast %cst_101 : f32 to vector<16x1xf32>
    %213 = arith.divf %211, %212 : vector<16x1xf32>
    %214 = vector.broadcast %208 : vector<16x1xf32> to vector<16x256xf32>
    %215 = arith.subf %168, %214 : vector<16x256xf32>
    %216 = arith.mulf %208, %208 : vector<16x1xf32>
    %217 = arith.subf %213, %216 : vector<16x1xf32>
    %cst_102 = arith.constant 9.99999974E-6 : f32
    %218 = vector.broadcast %cst_102 : f32 to vector<16x1xf32>
    %219 = arith.addf %217, %218 : vector<16x1xf32>
    %220 = math.rsqrt %219 : vector<16x1xf32>
    %221 = vector.broadcast %220 : vector<16x1xf32> to vector<16x256xf32>
    %222 = arith.mulf %215, %221 : vector<16x256xf32>
    %cst_103 = arith.constant 0.000000e+00 : f32
    %223 = vector.broadcast %cst_103 : f32 to vector<16x256xf32>
    %224 = arith.cmpf oge, %186, %223 : vector<16x256xf32>
    %cst_104 = arith.constant 2.000000e-01 : f32
    %225 = vector.broadcast %cst_104 : f32 to vector<16x256xf32>
    %226 = arith.mulf %225, %186 : vector<16x256xf32>
    %227 = arith.select %224, %186, %226 : vector<16x256xi1>, vector<16x256xf32>
    %cst_105 = arith.constant 0.000000e+00 : f32
    %228 = vector.broadcast %cst_105 : f32 to vector<16x256xf32>
    %229 = arith.cmpf oge, %204, %228 : vector<16x256xf32>
    %cst_106 = arith.constant 2.000000e-01 : f32
    %230 = vector.broadcast %cst_106 : f32 to vector<16x256xf32>
    %231 = arith.mulf %230, %204 : vector<16x256xf32>
    %232 = arith.select %229, %204, %231 : vector<16x256xi1>, vector<16x256xf32>
    %cst_107 = arith.constant 0.000000e+00 : f32
    %233 = vector.broadcast %cst_107 : f32 to vector<16x256xf32>
    %234 = arith.cmpf oge, %222, %233 : vector<16x256xf32>
    %cst_108 = arith.constant 2.000000e-01 : f32
    %235 = vector.broadcast %cst_108 : f32 to vector<16x256xf32>
    %236 = arith.mulf %235, %222 : vector<16x256xf32>
    %237 = arith.select %234, %222, %236 : vector<16x256xi1>, vector<16x256xf32>
    %238 = vector.extract_strided_slice %12 {offsets = [0, 128], sizes = [16, 128], strides = [1, 1]} : vector<16x256xf32> to vector<16x128xf32>
    %239 = vector.extract_strided_slice %238 {offsets = [0, 0], sizes = [16, 16], strides = [1, 1]} : vector<16x128xf32> to vector<16x16xf32>
    %240 = vector.extract_strided_slice %238 {offsets = [0, 16], sizes = [16, 16], strides = [1, 1]} : vector<16x128xf32> to vector<16x16xf32>
    %241 = vector.extract_strided_slice %238 {offsets = [0, 32], sizes = [16, 16], strides = [1, 1]} : vector<16x128xf32> to vector<16x16xf32>
    %242 = vector.extract_strided_slice %238 {offsets = [0, 48], sizes = [16, 16], strides = [1, 1]} : vector<16x128xf32> to vector<16x16xf32>
    %243 = vector.extract_strided_slice %238 {offsets = [0, 64], sizes = [16, 16], strides = [1, 1]} : vector<16x128xf32> to vector<16x16xf32>
    %244 = vector.extract_strided_slice %238 {offsets = [0, 80], sizes = [16, 16], strides = [1, 1]} : vector<16x128xf32> to vector<16x16xf32>
    %245 = vector.extract_strided_slice %238 {offsets = [0, 96], sizes = [16, 16], strides = [1, 1]} : vector<16x128xf32> to vector<16x16xf32>
    %246 = vector.extract_strided_slice %238 {offsets = [0, 112], sizes = [16, 1], strides = [1, 1]} : vector<16x128xf32> to vector<16x1xf32>
    %247 = vector.extract_strided_slice %238 {offsets = [0, 113], sizes = [16, 1], strides = [1, 1]} : vector<16x128xf32> to vector<16x1xf32>
    %248 = vector.extract_strided_slice %238 {offsets = [0, 114], sizes = [16, 1], strides = [1, 1]} : vector<16x128xf32> to vector<16x1xf32>
    %c0_109 = arith.constant 0 : index
    %c0_110 = arith.constant 0 : index
    %249 = vector.load %arg11[%c0_109, %c0_110] : memref<16x16xf32, #tpu.memory_space<vmem>>, vector<16x16xf32>
    %250 = arith.addf %249, %243 : vector<16x16xf32>
    %cst_111 = arith.constant dense<0.000000e+00> : vector<16x256xf32>
    %251 = tpu.matmul %250, %186, %cst_111 {dimension_numbers = #tpu.dot_dimension_numbers<[1], [0], [0], [1], [0, 0, 1, 1], [], []>} : vector<16x16xf32>, vector<16x256xf32>, vector<16x256xf32> -> vector<16x256xf32>
    %c0_112 = arith.constant 0 : index
    %c0_113 = arith.constant 0 : index
    %252 = vector.load %arg12[%c0_112, %c0_113] : memref<16x16xf32, #tpu.memory_space<vmem>>, vector<16x16xf32>
    %253 = arith.addf %252, %244 : vector<16x16xf32>
    %cst_114 = arith.constant dense<0.000000e+00> : vector<16x256xf32>
    %254 = tpu.matmul %253, %204, %cst_114 {dimension_numbers = #tpu.dot_dimension_numbers<[1], [0], [0], [1], [0, 0, 1, 1], [], []>} : vector<16x16xf32>, vector<16x256xf32>, vector<16x256xf32> -> vector<16x256xf32>
    %255 = arith.addf %251, %254 : vector<16x256xf32>
    %c0_115 = arith.constant 0 : index
    %c0_116 = arith.constant 0 : index
    %256 = vector.load %arg13[%c0_115, %c0_116] : memref<16x16xf32, #tpu.memory_space<vmem>>, vector<16x16xf32>
    %257 = arith.addf %256, %245 : vector<16x16xf32>
    %cst_117 = arith.constant dense<0.000000e+00> : vector<16x256xf32>
    %258 = tpu.matmul %257, %222, %cst_117 {dimension_numbers = #tpu.dot_dimension_numbers<[1], [0], [0], [1], [0, 0, 1, 1], [], []>} : vector<16x16xf32>, vector<16x256xf32>, vector<16x256xf32> -> vector<16x256xf32>
    %259 = arith.addf %255, %258 : vector<16x256xf32>
    %260 = vector.broadcast %248 : vector<16x1xf32> to vector<16x256xf32>
    %261 = arith.addf %259, %260 : vector<16x256xf32>
    %c0_118 = arith.constant 0 : index
    %c0_119 = arith.constant 0 : index
    %262 = vector.load %arg14[%c0_118, %c0_119] : memref<16x16xf32, #tpu.memory_space<vmem>>, vector<16x16xf32>
    %cst_120 = arith.constant dense<0.000000e+00> : vector<16x256xf32>
    %263 = tpu.matmul %262, %227, %cst_120 {dimension_numbers = #tpu.dot_dimension_numbers<[1], [0], [0], [1], [0, 0, 1, 1], [], []>} : vector<16x16xf32>, vector<16x256xf32>, vector<16x256xf32> -> vector<16x256xf32>
    %c0_121 = arith.constant 0 : index
    %c0_122 = arith.constant 0 : index
    %264 = vector.load %arg15[%c0_121, %c0_122] : memref<16x16xf32, #tpu.memory_space<vmem>>, vector<16x16xf32>
    %cst_123 = arith.constant dense<0.000000e+00> : vector<16x256xf32>
    %265 = tpu.matmul %264, %232, %cst_123 {dimension_numbers = #tpu.dot_dimension_numbers<[1], [0], [0], [1], [0, 0, 1, 1], [], []>} : vector<16x16xf32>, vector<16x256xf32>, vector<16x256xf32> -> vector<16x256xf32>
    %266 = arith.addf %263, %265 : vector<16x256xf32>
    %c0_124 = arith.constant 0 : index
    %c0_125 = arith.constant 0 : index
    %267 = vector.load %arg16[%c0_124, %c0_125] : memref<16x16xf32, #tpu.memory_space<vmem>>, vector<16x16xf32>
    %cst_126 = arith.constant dense<0.000000e+00> : vector<16x256xf32>
    %268 = tpu.matmul %267, %237, %cst_126 {dimension_numbers = #tpu.dot_dimension_numbers<[1], [0], [0], [1], [0, 0, 1, 1], [], []>} : vector<16x16xf32>, vector<16x256xf32>, vector<16x256xf32> -> vector<16x256xf32>
    %269 = arith.addf %266, %268 : vector<16x256xf32>
    %c0_127 = arith.constant 0 : index
    %c0_128 = arith.constant 0 : index
    %270 = vector.load %arg18[%c0_127, %c0_128] : memref<16x1xf32, #tpu.memory_space<vmem>>, vector<16x1xf32>
    %271 = vector.broadcast %270 : vector<16x1xf32> to vector<16x256xf32>
    %272 = arith.addf %269, %271 : vector<16x256xf32>
    %c0_129 = arith.constant 0 : index
    %c0_130 = arith.constant 0 : index
    %273 = vector.load %arg17[%c0_129, %c0_130] : memref<16x16xf32, #tpu.memory_space<vmem>>, vector<16x16xf32>
    %cst_131 = arith.constant 0.000000e+00 : f32
    %274 = vector.broadcast %cst_131 : f32 to vector<16x256xf32>
    %275 = arith.cmpf oge, %272, %274 : vector<16x256xf32>
    %cst_132 = arith.constant 2.000000e-01 : f32
    %276 = vector.broadcast %cst_132 : f32 to vector<16x256xf32>
    %277 = arith.mulf %276, %272 : vector<16x256xf32>
    %278 = arith.select %275, %272, %277 : vector<16x256xi1>, vector<16x256xf32>
    %cst_133 = arith.constant dense<0.000000e+00> : vector<16x256xf32>
    %279 = tpu.matmul %273, %278, %cst_133 {dimension_numbers = #tpu.dot_dimension_numbers<[1], [0], [0], [1], [0, 0, 1, 1], [], []>} : vector<16x16xf32>, vector<16x256xf32>, vector<16x256xf32> -> vector<16x256xf32>
    %c0_134 = arith.constant 0 : index
    %c0_135 = arith.constant 0 : index
    %280 = vector.load %arg19[%c0_134, %c0_135] : memref<16x1xf32, #tpu.memory_space<vmem>>, vector<16x1xf32>
    %281 = vector.broadcast %280 : vector<16x1xf32> to vector<16x256xf32>
    %282 = arith.addf %279, %281 : vector<16x256xf32>
    %cst_136 = arith.constant dense<0.000000e+00> : vector<16x256xf32>
    %283 = tpu.matmul %239, %227, %cst_136 {dimension_numbers = #tpu.dot_dimension_numbers<[1], [0], [0], [1], [0, 0, 1, 1], [], []>} : vector<16x16xf32>, vector<16x256xf32>, vector<16x256xf32> -> vector<16x256xf32>
    %cst_137 = arith.constant dense<0.000000e+00> : vector<16x256xf32>
    %284 = tpu.matmul %240, %232, %cst_137 {dimension_numbers = #tpu.dot_dimension_numbers<[1], [0], [0], [1], [0, 0, 1, 1], [], []>} : vector<16x16xf32>, vector<16x256xf32>, vector<16x256xf32> -> vector<16x256xf32>
    %285 = arith.addf %283, %284 : vector<16x256xf32>
    %cst_138 = arith.constant dense<0.000000e+00> : vector<16x256xf32>
    %286 = tpu.matmul %241, %237, %cst_138 {dimension_numbers = #tpu.dot_dimension_numbers<[1], [0], [0], [1], [0, 0, 1, 1], [], []>} : vector<16x16xf32>, vector<16x256xf32>, vector<16x256xf32> -> vector<16x256xf32>
    %287 = arith.addf %285, %286 : vector<16x256xf32>
    %288 = vector.broadcast %246 : vector<16x1xf32> to vector<16x256xf32>
    %289 = arith.addf %287, %288 : vector<16x256xf32>
    %cst_139 = arith.constant 0.000000e+00 : f32
    %290 = vector.broadcast %cst_139 : f32 to vector<16x256xf32>
    %291 = arith.cmpf oge, %289, %290 : vector<16x256xf32>
    %cst_140 = arith.constant 2.000000e-01 : f32
    %292 = vector.broadcast %cst_140 : f32 to vector<16x256xf32>
    %293 = arith.mulf %292, %289 : vector<16x256xf32>
    %294 = arith.select %291, %289, %293 : vector<16x256xi1>, vector<16x256xf32>
    %cst_141 = arith.constant dense<0.000000e+00> : vector<16x256xf32>
    %295 = tpu.matmul %242, %294, %cst_141 {dimension_numbers = #tpu.dot_dimension_numbers<[1], [0], [0], [1], [0, 0, 1, 1], [], []>} : vector<16x16xf32>, vector<16x256xf32>, vector<16x256xf32> -> vector<16x256xf32>
    %296 = vector.broadcast %247 : vector<16x1xf32> to vector<16x256xf32>
    %297 = arith.addf %295, %296 : vector<16x256xf32>
    %298 = arith.addf %160, %261 : vector<16x256xf32>
    %299 = arith.addf %282, %297 : vector<16x256xf32>
    %cst_142 = arith.constant 1.000000e-01 : f32
    %300 = vector.broadcast %cst_142 : f32 to vector<16x256xf32>
    %301 = arith.mulf %300, %299 : vector<16x256xf32>
    %302 = arith.addf %298, %301 : vector<16x256xf32>
    %c2 = arith.constant 2 : index
    %c0_143 = arith.constant 0 : index
    %c0_144 = arith.constant 0 : index
    %303 = vector.load %arg24[%c2, %c0_143, %c0_144] : memref<3x16x256xf32, #tpu.memory_space<vmem>>, vector<1x16x256xf32>
    %304 = vector.shape_cast %303 : vector<1x16x256xf32> to vector<16x256xf32>
    %305 = vector.shape_cast %302 : vector<16x256xf32> to vector<1x16x256xf32>
    tpu.vector_store %arg24[%c2, %c0_143, %c0_144], %305 {strides = array<i32>} : memref<3x16x256xf32, #tpu.memory_space<vmem>>, vector<1x16x256xf32>,
    %c0_145 = arith.constant 0 : index
    %c0_146 = arith.constant 0 : index
    %306 = vector.load %arg20[%c0_145, %c0_146] : memref<256x256xf32, #tpu.memory_space<vmem>>, vector<256x256xf32>
    %cst_147 = arith.constant dense<0.000000e+00> : vector<16x256xf32>
    %307 = tpu.matmul %302, %306, %cst_147 {dimension_numbers = #tpu.dot_dimension_numbers<[1], [0], [0], [1], [0, 0, 1, 1], [], []>} : vector<16x256xf32>, vector<256x256xf32>, vector<16x256xf32> -> vector<16x256xf32>
    %308 = arith.mulf %307, %0 : vector<16x256xf32>
    %c0_148 = arith.constant 0 : index
    %c0_149 = arith.constant 0 : index
    %309 = vector.load %arg21[%c0_148, %c0_149] : memref<2x16xf32, #tpu.memory_space<vmem>>, vector<2x16xf32>
    %cst_150 = arith.constant dense<0.000000e+00> : vector<2x256xf32>
    %310 = tpu.matmul %309, %308, %cst_150 {dimension_numbers = #tpu.dot_dimension_numbers<[1], [0], [0], [1], [0, 0, 1, 1], [], []>} : vector<2x16xf32>, vector<16x256xf32>, vector<2x256xf32> -> vector<2x256xf32>
    %c0_151 = arith.constant 0 : index
    %c0_152 = arith.constant 0 : index
    %311 = vector.load %arg22[%c0_151, %c0_152] : memref<256x32xf32, #tpu.memory_space<vmem>>, vector<256x32xf32>
    %cst_153 = arith.constant dense<0.000000e+00> : vector<2x32xf32>
    %312 = tpu.matmul %310, %311, %cst_153 {dimension_numbers = #tpu.dot_dimension_numbers<[1], [0], [0], [1], [0, 0, 1, 1], [], []>} : vector<2x256xf32>, vector<256x32xf32>, vector<2x32xf32> -> vector<2x32xf32>
    %c0_154 = arith.constant 0 : index
    %c0_155 = arith.constant 0 : index
    %313 = vector.load %arg23[%c0_154, %c0_155] : memref<2x32xf32, #tpu.memory_space<vmem>>, vector<2x32xf32>
    %314 = arith.addf %312, %313 : vector<2x32xf32>
    %c0_156 = arith.constant 0 : index
    %c0_157 = arith.constant 0 : index
    %315 = vector.load %arg25[%c0_156, %c0_157] : memref<2x32xf32, #tpu.memory_space<vmem>>, vector<2x32xf32>
    tpu.vector_store %arg25[%c0_156, %c0_157], %314 {strides = array<i32>} : memref<2x32xf32, #tpu.memory_space<vmem>>, vector<2x32xf32>,
    return
  }
}

</mosaic_0001>

<bundles_post_ra>
// kernel: squeeze.5
= control target key start
LH: loop header
LB: loop body
LE: loop exit
PB: predicated region body
PF: predicated region fallthrough
CT: control target
= control target key end

     0   :  { %s353_s8 = smov 112   ;;  %s479_s0 = inlined_call_operand.vmem [shape: f32[1,16,256], index: 0, kind: input, shape index: {}]   ;;  %s480_s1 = inlined_call_operand.hbm [shape: f32[2,8,16,16], index: 1, kind: output, shape index: {}]  }
   0x1   :  { %v301_v0 = vld.sshfl [vmem:[%s479_s0 + $0x10] sm:$0xff pattern:$0xb3a29180]   ;;  %v42_v1 = vld.sshfl [vmem:[%s479_s0] sm:$0xff pattern:$0xb3a29180]  }
   0x2   :  { %61 = vrot.lane.b32.xlu1 %v301_v0, %s353_s8  ;;  %43 = vrot.lane.b32.xlu0 %v42_v1, %s353_s8  ;;  %v302_v2 = vld.sshfl [vmem:[%s479_s0 + $0x14] sm:$0xff pattern:$0xb3a29180]   ;;  %v300_v3 = vld.sshfl [vmem:[%s479_s0 + $0x4] sm:$0xff pattern:$0xb3a29180]  }
   0x3   :  { %2 = vsyncpa [#allocation1], 0  ;;  %s354_s15 = smov 96   ;;  %s355_s16 = smov 80   ;;  %vm4_vm0 = vcmask 130048   ;;  %v3_v4 = vld [vmem:[%s479_s0] sm:$0xff]  }
   0x4   :  { %s356_s17 = smov 64   ;;  %s357_s18 = smov 48   ;;  %v297_v5 = vld [vmem:[%s479_s0 + $0x8] sm:$0xff]   ;;  %v298_v6 = vld [vmem:[%s479_s0 + $0x10] sm:$0xff]   ;;  %v299_v7 = vld [vmem:[%s479_s0 + $0x18] sm:$0xff]  }
   0x5   :  { %s358_s25 = smov 32   ;;  %5 = vst.msk [vmem:[#allocation0] ss:$16 sm:$0x3] %vm4_vm0, %v3_v4   ;;  %s359_s0 = smov 16  }
   0x6   :  { %70 = vrot.lane.b32.xlu1 %v302_v2, %s353_s8  ;;  %52 = vrot.lane.b32.xlu0 %v300_v3, %s353_s8  ;;  %6 = vst.msk [vmem:[#allocation0] ss:$16 sm:$0xc] %vm4_vm0, %v3_v4   ;;  %7 = vst.msk [vmem:[#allocation0] ss:$16 sm:$0x30] %vm4_vm0, %v3_v4  }
   0x7   :  { %8 = vst.msk [vmem:[#allocation0] ss:$16 sm:$0xc0] %vm4_vm0, %v3_v4   ;;  %13 = vst.msk [vmem:[#allocation0 + $0x8] ss:$16 sm:$0x3] %vm4_vm0, %v297_v5  }
   0x8   :  { %15 = vst.msk [vmem:[#allocation0 + $0x8] ss:$16 sm:$0xc] %vm4_vm0, %v297_v5   ;;  %17 = vst.msk [vmem:[#allocation0 + $0x8] ss:$16 sm:$0x30] %vm4_vm0, %v297_v5  }
   0x9   :  { %19 = vst.msk [vmem:[#allocation0 + $0x8] ss:$16 sm:$0xc0] %vm4_vm0, %v297_v5   ;;  %24 = vst.msk [vmem:[#allocation0 + $0x80] ss:$16 sm:$0x3] %vm4_vm0, %v298_v6  }
   0xa   :  { %87 = vrot.lane.b32.xlu1 %v300_v3, %s354_s15  ;;  %78 = vrot.lane.b32.xlu0 %v42_v1, %s354_s15  ;;  %26 = vst.msk [vmem:[#allocation0 + $0x80] ss:$16 sm:$0xc] %vm4_vm0, %v298_v6   ;;  %28 = vst.msk [vmem:[#allocation0 + $0x80] ss:$16 sm:$0x30] %vm4_vm0, %v298_v6  }
   0xb   :  { %30 = vst.msk [vmem:[#allocation0 + $0x80] ss:$16 sm:$0xc0] %vm4_vm0, %v298_v6   ;;  %35 = vst.msk [vmem:[#allocation0 + $0x88] ss:$16 sm:$0x3] %vm4_vm0, %v299_v7  }
   0xc   :  { %37 = vst.msk [vmem:[#allocation0 + $0x88] ss:$16 sm:$0xc] %vm4_vm0, %v299_v7   ;;  %39 = vst.msk [vmem:[#allocation0 + $0x88] ss:$16 sm:$0x30] %vm4_vm0, %v299_v7  }
   0xd   :  { %41 = vst.msk [vmem:[#allocation0 + $0x88] ss:$16 sm:$0xc0] %vm4_vm0, %v299_v7   ;;  %s360_s28 = smov [#allocation0]  }
   0xe   :  { %105 = vrot.lane.b32.xlu1 %v302_v2, %s354_s15  ;;  %96 = vrot.lane.b32.xlu0 %v301_v0, %s354_s15  ;;  %s291_s29 = sshll.u32 %s360_s28, 4  ;;  %s292_s29 = int_to_ptr.vmem [resolvable:$true] %s291_s29 }
   0xf   :  { %s329_s30 = scalar_lea.vmem %s292_s29, 4096  ;;  %p334_p1 = scmp.lt.s32.totalorder %s292_s29, %s292_s29 }
  0x10   :  { %p330_p0 = scmp.ne.s32.totalorder %s292_s29, %s329_s30  ;;  %p335_p2 = scmp.lt.s32.totalorder %s329_s30, %s329_s30 }
  0x12   :  { %122 = vrot.lane.b32.xlu1 %v300_v3, %s355_s16  ;;  %113 = vrot.lane.b32.xlu0 %v42_v1, %s355_s16  ;;  %p336_p3 = por %p335_p2, %p334_p1 }
  0x14   :  { %p337_p4 = pnand %p336_p3, %p330_p0 }
  0x16   :  { %140 = vrot.lane.b32.xlu1 %v302_v2, %s355_s16  ;;  %131 = vrot.lane.b32.xlu0 %v301_v0, %s355_s16 }
  0x1a   :  { %157 = vrot.lane.b32.xlu1 %v300_v3, %s356_s17  ;;  %148 = vrot.lane.b32.xlu0 %v42_v1, %s356_s17 }
  0x1e   :  { %175 = vrot.lane.b32.xlu1 %v302_v2, %s356_s17  ;;  %166 = vrot.lane.b32.xlu0 %v301_v0, %s356_s17 }
  0x22   :  { %192 = vrot.lane.b32.xlu1 %v300_v3, %s357_s18  ;;  %183 = vrot.lane.b32.xlu0 %v42_v1, %s357_s18 }
  0x26   :  { %210 = vrot.lane.b32.xlu1 %v302_v2, %s357_s18  ;;  %201 = vrot.lane.b32.xlu0 %v301_v0, %s357_s18 }
  0x2a   :  { %227 = vrot.lane.b32.xlu1 %v300_v3, %s358_s25  ;;  %218 = vrot.lane.b32.xlu0 %v42_v1, %s358_s25 }
  0x2e   :  { %245 = vrot.lane.b32.xlu1 %v302_v2, %s358_s25  ;;  %236 = vrot.lane.b32.xlu0 %v301_v0, %s358_s25 }
  0x32   :  { %262 = vrot.lane.b32.xlu1 %v300_v3, %s359_s0  ;;  %253 = vrot.lane.b32.xlu0 %v42_v1, %s359_s0 }
  0x36   :  { %280 = vrot.lane.b32.xlu1 %v302_v2, %s359_s0  ;;  %271 = vrot.lane.b32.xlu0 %v301_v0, %s359_s0 }
  0x74   :  { %v62_v8 = vpop.permute.xlu1 %61   ;;  %v44_v9 = vpop.permute.xlu0 %43  }
  0x75   :  { %65 = vst.msk [vmem:[#allocation0 + $0x81] ss:$8 sm:$0xf] %vm4_vm0, %v62_v8   ;;  %67 = vst.msk [vmem:[#allocation0 + $0x81] ss:$8 sm:$0xf0] %vm4_vm0, %v62_v8  }
  0x76   :  { %47 = vst.msk [vmem:[#allocation0 + $0x1] ss:$8 sm:$0xf] %vm4_vm0, %v44_v9   ;;  %49 = vst.msk [vmem:[#allocation0 + $0x1] ss:$8 sm:$0xf0] %vm4_vm0, %v44_v9  }
  0x78   :  { %v71_v10 = vpop.permute.xlu1 %70   ;;  %v53_v11 = vpop.permute.xlu0 %52  }
  0x79   :  { %74 = vst.msk [vmem:[#allocation0 + $0xc1] ss:$8 sm:$0xf] %vm4_vm0, %v71_v10   ;;  %76 = vst.msk [vmem:[#allocation0 + $0xc1] ss:$8 sm:$0xf0] %vm4_vm0, %v71_v10  }
  0x7a   :  { %56 = vst.msk [vmem:[#allocation0 + $0x41] ss:$8 sm:$0xf] %vm4_vm0, %v53_v11   ;;  %58 = vst.msk [vmem:[#allocation0 + $0x41] ss:$8 sm:$0xf0] %vm4_vm0, %v53_v11  }
  0x7c   :  { %v88_v12 = vpop.permute.xlu1 %87   ;;  %v79_v13 = vpop.permute.xlu0 %78  }
  0x7d   :  { %91 = vst.msk [vmem:[#allocation0 + $0x42] ss:$8 sm:$0xf] %vm4_vm0, %v88_v12   ;;  %93 = vst.msk [vmem:[#allocation0 + $0x42] ss:$8 sm:$0xf0] %vm4_vm0, %v88_v12  }
  0x7e   :  { %82 = vst.msk [vmem:[#allocation0 + $0x2] ss:$8 sm:$0xf] %vm4_vm0, %v79_v13   ;;  %84 = vst.msk [vmem:[#allocation0 + $0x2] ss:$8 sm:$0xf0] %vm4_vm0, %v79_v13  }
  0x80   :  { %v106_v14 = vpop.permute.xlu1 %105   ;;  %v97_v15 = vpop.permute.xlu0 %96  }
  0x81   :  { %109 = vst.msk [vmem:[#allocation0 + $0xc2] ss:$8 sm:$0xf] %vm4_vm0, %v106_v14   ;;  %111 = vst.msk [vmem:[#allocation0 + $0xc2] ss:$8 sm:$0xf0] %vm4_vm0, %v106_v14  }
  0x82   :  { %100 = vst.msk [vmem:[#allocation0 + $0x82] ss:$8 sm:$0xf] %vm4_vm0, %v97_v15   ;;  %102 = vst.msk [vmem:[#allocation0 + $0x82] ss:$8 sm:$0xf0] %vm4_vm0, %v97_v15  }
  0x84   :  { %v123_v16 = vpop.permute.xlu1 %122   ;;  %v114_v17 = vpop.permute.xlu0 %113  }
  0x85   :  { %126 = vst.msk [vmem:[#allocation0 + $0x43] ss:$8 sm:$0xf] %vm4_vm0, %v123_v16   ;;  %128 = vst.msk [vmem:[#allocation0 + $0x43] ss:$8 sm:$0xf0] %vm4_vm0, %v123_v16  }
  0x86   :  { %117 = vst.msk [vmem:[#allocation0 + $0x3] ss:$8 sm:$0xf] %vm4_vm0, %v114_v17   ;;  %119 = vst.msk [vmem:[#allocation0 + $0x3] ss:$8 sm:$0xf0] %vm4_vm0, %v114_v17  }
  0x88   :  { %v141_v18 = vpop.permute.xlu1 %140   ;;  %v132_v19 = vpop.permute.xlu0 %131  }
  0x89   :  { %144 = vst.msk [vmem:[#allocation0 + $0xc3] ss:$8 sm:$0xf] %vm4_vm0, %v141_v18   ;;  %146 = vst.msk [vmem:[#allocation0 + $0xc3] ss:$8 sm:$0xf0] %vm4_vm0, %v141_v18  }
  0x8a   :  { %135 = vst.msk [vmem:[#allocation0 + $0x83] ss:$8 sm:$0xf] %vm4_vm0, %v132_v19   ;;  %137 = vst.msk [vmem:[#allocation0 + $0x83] ss:$8 sm:$0xf0] %vm4_vm0, %v132_v19  }
  0x8c   :  { %v158_v20 = vpop.permute.xlu1 %157   ;;  %v149_v21 = vpop.permute.xlu0 %148  }
  0x8d   :  { %161 = vst.msk [vmem:[#allocation0 + $0x44] ss:$8 sm:$0xf] %vm4_vm0, %v158_v20   ;;  %163 = vst.msk [vmem:[#allocation0 + $0x44] ss:$8 sm:$0xf0] %vm4_vm0, %v158_v20  }
  0x8e   :  { %152 = vst.msk [vmem:[#allocation0 + $0x4] ss:$8 sm:$0xf] %vm4_vm0, %v149_v21   ;;  %154 = vst.msk [vmem:[#allocation0 + $0x4] ss:$8 sm:$0xf0] %vm4_vm0, %v149_v21  }
  0x90   :  { %v176_v22 = vpop.permute.xlu1 %175   ;;  %v167_v23 = vpop.permute.xlu0 %166  }
  0x91   :  { %179 = vst.msk [vmem:[#allocation0 + $0xc4] ss:$8 sm:$0xf] %vm4_vm0, %v176_v22   ;;  %181 = vst.msk [vmem:[#allocation0 + $0xc4] ss:$8 sm:$0xf0] %vm4_vm0, %v176_v22  }
  0x92   :  { %170 = vst.msk [vmem:[#allocation0 + $0x84] ss:$8 sm:$0xf] %vm4_vm0, %v167_v23   ;;  %172 = vst.msk [vmem:[#allocation0 + $0x84] ss:$8 sm:$0xf0] %vm4_vm0, %v167_v23  }
  0x94   :  { %v193_v24 = vpop.permute.xlu1 %192   ;;  %v184_v25 = vpop.permute.xlu0 %183  }
  0x95   :  { %196 = vst.msk [vmem:[#allocation0 + $0x45] ss:$8 sm:$0xf] %vm4_vm0, %v193_v24   ;;  %198 = vst.msk [vmem:[#allocation0 + $0x45] ss:$8 sm:$0xf0] %vm4_vm0, %v193_v24  }
  0x96   :  { %187 = vst.msk [vmem:[#allocation0 + $0x5] ss:$8 sm:$0xf] %vm4_vm0, %v184_v25   ;;  %189 = vst.msk [vmem:[#allocation0 + $0x5] ss:$8 sm:$0xf0] %vm4_vm0, %v184_v25  }
  0x98   :  { %v211_v26 = vpop.permute.xlu1 %210   ;;  %v202_v27 = vpop.permute.xlu0 %201  }
  0x99   :  { %214 = vst.msk [vmem:[#allocation0 + $0xc5] ss:$8 sm:$0xf] %vm4_vm0, %v211_v26   ;;  %216 = vst.msk [vmem:[#allocation0 + $0xc5] ss:$8 sm:$0xf0] %vm4_vm0, %v211_v26  }
  0x9a   :  { %205 = vst.msk [vmem:[#allocation0 + $0x85] ss:$8 sm:$0xf] %vm4_vm0, %v202_v27   ;;  %207 = vst.msk [vmem:[#allocation0 + $0x85] ss:$8 sm:$0xf0] %vm4_vm0, %v202_v27  }
  0x9c   :  { %v228_v28 = vpop.permute.xlu1 %227   ;;  %v219_v29 = vpop.permute.xlu0 %218  }
  0x9d   :  { %231 = vst.msk [vmem:[#allocation0 + $0x46] ss:$8 sm:$0xf] %vm4_vm0, %v228_v28   ;;  %233 = vst.msk [vmem:[#allocation0 + $0x46] ss:$8 sm:$0xf0] %vm4_vm0, %v228_v28  }
  0x9e   :  { %222 = vst.msk [vmem:[#allocation0 + $0x6] ss:$8 sm:$0xf] %vm4_vm0, %v219_v29   ;;  %224 = vst.msk [vmem:[#allocation0 + $0x6] ss:$8 sm:$0xf0] %vm4_vm0, %v219_v29  }
  0xa0   :  { %v246_v30 = vpop.permute.xlu1 %245   ;;  %v237_v31 = vpop.permute.xlu0 %236  }
  0xa1   :  { %249 = vst.msk [vmem:[#allocation0 + $0xc6] ss:$8 sm:$0xf] %vm4_vm0, %v246_v30   ;;  %251 = vst.msk [vmem:[#allocation0 + $0xc6] ss:$8 sm:$0xf0] %vm4_vm0, %v246_v30  }
  0xa2   :  { %240 = vst.msk [vmem:[#allocation0 + $0x86] ss:$8 sm:$0xf] %vm4_vm0, %v237_v31   ;;  %242 = vst.msk [vmem:[#allocation0 + $0x86] ss:$8 sm:$0xf0] %vm4_vm0, %v237_v31  }
  0xa4   :  { %v263_v32 = vpop.permute.xlu1 %262   ;;  %v254_v33 = vpop.permute.xlu0 %253  }
  0xa5   :  { %266 = vst.msk [vmem:[#allocation0 + $0x47] ss:$8 sm:$0xf] %vm4_vm0, %v263_v32   ;;  %268 = vst.msk [vmem:[#allocation0 + $0x47] ss:$8 sm:$0xf0] %vm4_vm0, %v263_v32  }
  0xa6   :  { %257 = vst.msk [vmem:[#allocation0 + $0x7] ss:$8 sm:$0xf] %vm4_vm0, %v254_v33   ;;  %259 = vst.msk [vmem:[#allocation0 + $0x7] ss:$8 sm:$0xf0] %vm4_vm0, %v254_v33  }
  0xa8   :  { %v281_v34 = vpop.permute.xlu1 %280   ;;  %v272_v35 = vpop.permute.xlu0 %271  }
  0xa9   :  { %284 = vst.msk [vmem:[#allocation0 + $0xc7] ss:$8 sm:$0xf] %vm4_vm0, %v281_v34   ;;  %286 = vst.msk [vmem:[#allocation0 + $0xc7] ss:$8 sm:$0xf0] %vm4_vm0, %v281_v34  }
  0xaa   :  { %275 = vst.msk [vmem:[#allocation0 + $0x87] ss:$8 sm:$0xf] %vm4_vm0, %v272_v35   ;;  %277 = vst.msk [vmem:[#allocation0 + $0x87] ss:$8 sm:$0xf0] %vm4_vm0, %v272_v35  }
  0xab   :  { %340 = shalt.err (!%p337_p4)
}
  0xac   :  { %s341_s4 = scalar_lea.hbm %s480_s1, 4096 }
  0xad   :  { %p342_p5 = scmp.ne.s32.totalorder %s480_s1, %s341_s4  ;;  %p345_p6 = scmp.lt.u32.totalorder %s341_s4, %s480_s1 }
  0xaf   :  { %p347_p7 = pnand %p345_p6, %p342_p5 }
  0xb1   :  { %350 = shalt.err (!%p347_p7)
}
  0xb2   :  { %294 = dma.vmem_to_hbm [thread:$0]  %s292_s29, 4096, %s480_s1, [#allocation1]  }
  0xb3   :  { %351 = dma.done.wait [#allocation1], 4096  }
  0xb4   :  { %352 = vsyncadd [#allocation1], 4294963200 }
  0xb5   :  { %296 = vsyncpa [#allocation1], 1 }

// kernel: _lambda_.1
= control target key start
LH: loop header
LB: loop body
LE: loop exit
PB: predicated region body
PF: predicated region fallthrough
CT: control target
= control target key end

     0   :  { %s7122_s0 = inlined_call_operand.vmem [shape: f32[8,256], index: 0, kind: input, shape index: {}]   ;;  %s7123_s1 = inlined_call_operand.vmem [shape: f32[2,32], index: 1, kind: input, shape index: {}]   ;;  %s7124_s2 = inlined_call_operand.hbm [shape: f32[16,2], index: 2, kind: input, shape index: {}]   ;;  %s7125_s3 = inlined_call_operand.vmem [shape: f32[32,256], index: 3, kind: input, shape index: {}]   ;;  %s7126_s4 = inlined_call_operand.vmem [shape: f32[16,256], index: 4, kind: input, shape index: {}]   ;;  %s7127_s5 = inlined_call_operand.vmem [shape: f32[256,256], index: 5, kind: input, shape index: {}]   ;;  %s7128_s6 = inlined_call_operand.vmem [shape: f32[16,256], index: 6, kind: input, shape index: {}]   ;;  %s7129_s7 = inlined_call_operand.vmem [shape: f32[16,256], index: 7, kind: input, shape index: {}]   ;;  %s7130_s8 = inlined_call_operand.hbm [shape: f32[16,8], index: 8, kind: input, shape index: {}]   ;;  %s7131_s9 = inlined_call_operand.vmem [shape: f32[16,1], index: 9, kind: input, shape index: {}, may-alias: {9,18,19}]   ;;  %s7132_s10 = inlined_call_operand.vmem [shape: bf16[256,512], index: 10, kind: input, shape index: {}]   ;;  %s7133_s11 = inlined_call_operand.hbm [shape: f32[16,16], index: 11, kind: input, shape index: {}]   ;;  %s7134_s12 = inlined_call_operand.hbm [shape: f32[16,16], index: 12, kind: input, shape index: {}]   ;;  %s7135_s13 = inlined_call_operand.hbm [shape: f32[16,16], index: 13, kind: input, shape index: {}]   ;;  %s7136_s14 = inlined_call_operand.hbm [shape: f32[16,16], index: 14, kind: input, shape index: {}]   ;;  %s7137_s15 = inlined_call_operand.vmem [shape: f32[16,16], index: 15, kind: input, shape index: {}]   ;;  %s7138_s16 = inlined_call_operand.vmem [shape: f32[16,16], index: 16, kind: input, shape index: {}]   ;;  %s7139_s17 = inlined_call_operand.vmem [shape: f32[16,16], index: 17, kind: input, shape index: {}]   ;;  %s7140_s18 = inlined_call_operand.vmem [shape: f32[16,1], index: 18, kind: input, shape index: {}, may-alias: {9,18,19}]   ;;  %s7141_s19 = inlined_call_operand.vmem [shape: f32[16,1], index: 19, kind: input, shape index: {}, may-alias: {9,18,19}]   ;;  %s7142_s20 = inlined_call_operand.vmem [shape: f32[256,256], index: 20, kind: input, shape index: {}]   ;;  %s7143_s21 = inlined_call_operand.vmem [shape: f32[2,16], index: 21, kind: input, shape index: {}]   ;;  %s7144_s22 = inlined_call_operand.hbm [shape: f32[256,32], index: 22, kind: input, shape index: {}]   ;;  %s7145_s23 = inlined_call_operand.vmem [shape: f32[2,32], index: 23, kind: input, shape index: {}]   ;;  %s7146_s24 = inlined_call_operand.vmem [shape: f32[3,16,256], index: 24, kind: output, shape index: {0}]   ;;  %s7147_s25 = inlined_call_operand.hbm [shape: f32[2,32], index: 25, kind: output, shape index: {1}]  }
   0x1   :  { %7158 = sst [smem:[#allocation20_spill]] %s7122_s0 }
   0x2   :  { %7159 = sst [smem:[#allocation21_spill]] %s7123_s1 }
   0x3   :  { %7160 = sst [smem:[#allocation22_spill]] %s7124_s2 }
   0x4   :  { %7161 = sst [smem:[#allocation23_spill]] %s7125_s3 }
   0x5   :  { %7162 = sst [smem:[#allocation24_spill]] %s7126_s4 }
   0x6   :  { %7163 = sst [smem:[#allocation25_spill]] %s7127_s5 }
   0x7   :  { %7164 = sst [smem:[#allocation26_spill]] %s7128_s6 }
   0x8   :  { %7165 = sst [smem:[#allocation27_spill]] %s7129_s7 }
   0x9   :  { %7166 = sst [smem:[#allocation28_spill]] %s7130_s8 }
   0xa   :  { %7167 = sst [smem:[#allocation29_spill]] %s7131_s9 }
   0xb   :  { %7168 = sst [smem:[#allocation30_spill]] %s7147_s25 }
   0xc   :  { %31 = vsyncpa [#allocation3], 0 }
   0xd   :  { %32 = vsyncpa [#allocation6], 0 }
   0xe   :  { %33 = vsyncpa [#allocation9], 0 }
   0xf   :  { %34 = vsyncpa [#allocation12], 0 }
  0x10   :  { %35 = vsyncpa [#allocation4], 0  ;;  %s5366_s29 = smov [#allocation5]   ;;  %s5367_s6 = smov [#allocation8]  }
  0x11   :  { %s67_s2 = sshll.u32 %s5366_s29, 4  ;;  %s95_s30 = sshll.u32 %s5367_s6, 4  ;;  %s68_s2 = int_to_ptr.vmem [resolvable:$true] %s67_s2  ;;  %s5517_s30 = int_to_ptr.vmem [resolvable:$true] %s95_s30 }
  0x12   :  { %s7169_s26 = sld [smem:[#allocation28_spill]] }
  0x18   :  { %s5180_s1 = scalar_lea.hbm %s7169_s26, 256 }
  0x19   :  { %p5181_p0 = scmp.ne.s32.totalorder %s7169_s26, %s5180_s1  ;;  %p5184_p1 = scmp.lt.u32.totalorder %s5180_s1, %s7169_s26 }
  0x1b   :  { %p5186_p2 = pnand %p5184_p1, %p5181_p0 }
  0x1d   :  { %5189 = shalt.err (!%p5186_p2)
}
  0x1e   :  { %s5190_s9 = scalar_lea.vmem %s68_s2, 256  ;;  %p5195_p4 = scmp.lt.s32.totalorder %s68_s2, %s68_s2 }
  0x1f   :  { %p5191_p3 = scmp.ne.s32.totalorder %s68_s2, %s5190_s9  ;;  %p5196_p5 = scmp.lt.s32.totalorder %s5190_s9, %s5190_s9 }
  0x21   :  { %p5197_p6 = por %p5196_p5, %p5195_p4 }
  0x23   :  { %p5198_p7 = pnand %p5197_p6, %p5191_p3 }
  0x25   :  { %5201 = shalt.err (!%p5198_p7)
}
  0x26   :  { %s5368_s5 = smov 128   ;;  %s5369_s0 = smov 8  }
  0x27   :  { %73 = dma.hbm_to_vmem [thread:$0]  %s7169_s26, 256, %s68_s2, [#allocation6], %s5368_s5, %s5368_s5, %s5369_s0  }
  0x28   :  { %s5202_s1 = scalar_lea.hbm %s7134_s12, 256 }
  0x29   :  { %p5203_p8 = scmp.ne.s32.totalorder %s7134_s12, %s5202_s1  ;;  %p5206_p9 = scmp.lt.u32.totalorder %s5202_s1, %s7134_s12 }
  0x2b   :  { %p5208_p10 = pnand %p5206_p9, %p5203_p8 }
  0x2d   :  { %5211 = shalt.err (!%p5208_p10)
}
  0x2e   :  { %s5212_s9 = scalar_lea.vmem %s5517_s30, 256  ;;  %p5217_p12 = scmp.lt.s32.totalorder %s5517_s30, %s5517_s30 }
  0x2f   :  { %p5213_p11 = scmp.ne.s32.totalorder %s5517_s30, %s5212_s9  ;;  %p5218_p13 = scmp.lt.s32.totalorder %s5212_s9, %s5212_s9 }
  0x31   :  { %p5219_p0 = por %p5218_p13, %p5217_p12 }
  0x33   :  { %p5220_p1 = pnand %p5219_p0, %p5213_p11 }
  0x35   :  { %5223 = shalt.err (!%p5220_p1)
}
  0x36   :  { %101 = dma.hbm_to_vmem [thread:$0]  %s7134_s12, 256, %s5517_s30, [#allocation9], %s5368_s5, %s5368_s5, %s5369_s0  }
  0x37   :  { %s5370_s29 = smov [#allocation11]   ;;  %s5371_s7 = smov [#allocation2]  }
  0x38   :  { %s119_s6 = sshll.u32 %s5370_s29, 4  ;;  %s45_s3 = sshll.u32 %s5371_s7, 4  ;;  %s120_s6 = int_to_ptr.vmem [resolvable:$true] %s119_s6  ;;  %s5554_s3 = int_to_ptr.vmem [resolvable:$true] %s45_s3 }
  0x39   :  { %s5224_s27 = scalar_lea.hbm %s7136_s14, 256 }
  0x3a   :  { %p5225_p2 = scmp.ne.s32.totalorder %s7136_s14, %s5224_s27  ;;  %p5228_p3 = scmp.lt.u32.totalorder %s5224_s27, %s7136_s14 }
  0x3c   :  { %p5230_p4 = pnand %p5228_p3, %p5225_p2 }
  0x3e   :  { %5233 = shalt.err (!%p5230_p4)
}
  0x3f   :  { %s5234_s12 = scalar_lea.vmem %s120_s6, 256  ;;  %p5239_p6 = scmp.lt.s32.totalorder %s120_s6, %s120_s6 }
  0x40   :  { %p5235_p5 = scmp.ne.s32.totalorder %s120_s6, %s5234_s12  ;;  %p5240_p7 = scmp.lt.s32.totalorder %s5234_s12, %s5234_s12 }
  0x42   :  { %p5241_p8 = por %p5240_p7, %p5239_p6 }
  0x44   :  { %p5242_p9 = pnand %p5241_p8, %p5235_p5 }
  0x46   :  { %5245 = shalt.err (!%p5242_p9)
}
  0x47   :  { %125 = dma.hbm_to_vmem [thread:$0]  %s7136_s14, 256, %s120_s6, [#allocation12], %s5368_s5, %s5368_s5, %s5369_s0  }
  0x48   :  { %s7170_s25 = sld [smem:[#allocation22_spill]] }
  0x4e   :  { %s5246_s7 = scalar_lea.hbm %s7170_s25, 256 }
  0x4f   :  { %p5247_p10 = scmp.ne.s32.totalorder %s7170_s25, %s5246_s7  ;;  %p5250_p11 = scmp.lt.u32.totalorder %s5246_s7, %s7170_s25 }
  0x51   :  { %p5252_p12 = pnand %p5250_p11, %p5247_p10 }
  0x53   :  { %5255 = shalt.err (!%p5252_p12)
}
  0x54   :  { %s5256_s28 = scalar_lea.vmem %s5554_s3, 256  ;;  %p5261_p0 = scmp.lt.s32.totalorder %s5554_s3, %s5554_s3 }
  0x55   :  { %p5257_p13 = scmp.ne.s32.totalorder %s5554_s3, %s5256_s28  ;;  %p5262_p1 = scmp.lt.s32.totalorder %s5256_s28, %s5256_s28 }
  0x57   :  { %p5263_p2 = por %p5262_p1, %p5261_p0 }
  0x59   :  { %p5264_p3 = pnand %p5263_p2, %p5257_p13 }
  0x5b   :  { %5267 = shalt.err (!%p5264_p3)
}
  0x5c   :  { %51 = dma.hbm_to_vmem [thread:$0]  %s7170_s25, 256, %s5554_s3, [#allocation3], %s5368_s5, %s5368_s5, %s5369_s0  }
  0x5d   :  { %s5372_s9 = smov [#allocation7]   ;;  %s5373_s30 = smov [#allocation10]  }
  0x5e   :  { %s83_s12 = sshll.u32 %s5372_s9, 4  ;;  %s107_s2 = sshll.u32 %s5373_s30, 4  ;;  %s84_s12 = int_to_ptr.vmem [resolvable:$true] %s83_s12  ;;  %s5591_s2 = int_to_ptr.vmem [resolvable:$true] %s107_s2 }
  0x5f   :  { %s5268_s7 = scalar_lea.hbm %s7133_s11, 256 }
  0x60   :  { %p5269_p4 = scmp.ne.s32.totalorder %s7133_s11, %s5268_s7  ;;  %p5272_p5 = scmp.lt.u32.totalorder %s5268_s7, %s7133_s11 }
  0x62   :  { %p5274_p6 = pnand %p5272_p5, %p5269_p4 }
  0x64   :  { %5277 = shalt.err (!%p5274_p6)
}
  0x65   :  { %s5278_s3 = scalar_lea.vmem %s84_s12, 256  ;;  %p5283_p8 = scmp.lt.s32.totalorder %s84_s12, %s84_s12 }
  0x66   :  { %p5279_p7 = scmp.ne.s32.totalorder %s84_s12, %s5278_s3  ;;  %p5284_p9 = scmp.lt.s32.totalorder %s5278_s3, %s5278_s3 }
  0x68   :  { %p5285_p10 = por %p5284_p9, %p5283_p8 }
  0x6a   :  { %p5286_p11 = pnand %p5285_p10, %p5279_p7 }
  0x6c   :  { %5289 = shalt.err (!%p5286_p11)
}
  0x6d   :  { %89 = dma.hbm_to_vmem [thread:$0]  %s7133_s11, 256, %s84_s12, [#allocation6], %s5368_s5, %s5368_s5, %s5369_s0  }
  0x6e   :  { %s5290_s9 = scalar_lea.hbm %s7135_s13, 256 }
  0x6f   :  { %p5291_p12 = scmp.ne.s32.totalorder %s7135_s13, %s5290_s9  ;;  %p5294_p13 = scmp.lt.u32.totalorder %s5290_s9, %s7135_s13 }
  0x71   :  { %p5296_p0 = pnand %p5294_p13, %p5291_p12 }
  0x73   :  { %5299 = shalt.err (!%p5296_p0)
}
  0x74   :  { %s5300_s1 = scalar_lea.vmem %s5591_s2, 256  ;;  %p5305_p2 = scmp.lt.s32.totalorder %s5591_s2, %s5591_s2 }
  0x75   :  { %p5301_p1 = scmp.ne.s32.totalorder %s5591_s2, %s5300_s1  ;;  %p5306_p3 = scmp.lt.s32.totalorder %s5300_s1, %s5300_s1 }
  0x77   :  { %p5307_p4 = por %p5306_p3, %p5305_p2 }
  0x79   :  { %p5308_p5 = pnand %p5307_p4, %p5301_p1 }
  0x7b   :  { %5311 = shalt.err (!%p5308_p5)
}
  0x7c   :  { %113 = dma.hbm_to_vmem [thread:$0]  %s7135_s13, 256, %s5591_s2, [#allocation9], %s5368_s5, %s5368_s5, %s5369_s0  }
  0x7d   :  { %s5374_s8 = smov [#allocation13]   ;;  %s5312_s25 = scalar_lea.hbm %s7144_s22, 4096 }
  0x7e   :  { %s145_s27 = sshll.u32 %s5374_s8, 4  ;;  %p5313_p6 = scmp.ne.s32.totalorder %s7144_s22, %s5312_s25  ;;  %s146_s27 = int_to_ptr.vmem [resolvable:$true] %s145_s27 }
  0x7f   :  { %p5316_p7 = scmp.lt.u32.totalorder %s5312_s25, %s7144_s22 }
  0x81   :  { %p5318_p8 = pnand %p5316_p7, %p5313_p6 }
  0x83   :  { %5321 = shalt.err (!%p5318_p8)
}
  0x84   :  { %s5322_s30 = scalar_lea.vmem %s146_s27, 4096  ;;  %p5327_p10 = scmp.lt.s32.totalorder %s146_s27, %s146_s27 }
  0x85   :  { %p5323_p9 = scmp.ne.s32.totalorder %s146_s27, %s5322_s30  ;;  %p5328_p11 = scmp.lt.s32.totalorder %s5322_s30, %s5322_s30 }
  0x87   :  { %p5329_p12 = por %p5328_p11, %p5327_p10 }
  0x89   :  { %p5330_p13 = pnand %p5329_p12, %p5323_p9 }
  0x8b   :  { %5333 = shalt.err (!%p5330_p13)
}
  0x8c   :  { %151 = dma.hbm_to_vmem [thread:$0]  %s7144_s22, 4096, %s146_s27, [#allocation12], %s5368_s5, %s5368_s5, %s5369_s0  }
  0x8d   :  { %5356 = dma.done.wait [#allocation3], 256  }
  0x8e   :  { %5357 = vsyncadd [#allocation3], 4294967040 }
  0x8f   :  { %5358 = dma.done.wait [#allocation6], 512  }
  0x90   :  { %5359 = vsyncadd [#allocation6], 4294966784 }
  0x91   :  { %5360 = dma.done.wait [#allocation9], 512  }
  0x92   :  { %5361 = vsyncadd [#allocation9], 4294966784 }
  0x93   :  { %5362 = dma.done.wait [#allocation12], 4352  }
  0x94   :  { %5363 = vsyncadd [#allocation12], 4294962944  ;;  %vm189_vm0 = vcmask 1041408   ;;  %vm182_vm1 = vcmask 15360   ;;  %s7171_s7 = sld [smem:[#allocation21_spill]]  ;;  %v179_v1 = vld [vmem:[#allocation2] sm:$0xff] }
  0x95   :  { %v180_v2 = vld [vmem:[#allocation2 + $0x8] sm:$0xff]  ;;  %4578 = vmatprep.mubr.msk.f32.mxu0 %vm182_vm1, %v179_v1  ;;  %s7172_s5 = sld [smem:[#allocation23_spill]]  ;;  %v5375_v15 = vmov 0.0   ;;  %s7173_s29 = sld [smem:[#allocation20_spill]]  ;;  %v5376_v19 = vmov 0   ;;  %vm276_vm2 = vcmask 261120  }
  0x96   :  { %347 = vmatprep.mubr.f32.mxu1 %v5375_v15  ;;  %s7174_s22 = sld [smem:[#allocation29_spill]]  ;;  %4934 = vset.pattern.permute.xlu0 %v5376_v19  ;;  %vm533_vm3 = vcmask 64512   ;;  %s7176_s4 = sld [smem:[#allocation24_spill]]  ;;  %vm1260_vm5 = vcmask 130048  }
  0x97   :  { %4935 = vset.pattern.permute.xlu1 %v5376_v19  ;;  %s7177_s8 = sld [smem:[#allocation26_spill]]  ;;  %s7178_s25 = sld [smem:[#allocation27_spill]] }
  0x98   :  { %s5377_s28 = smov 48   ;;  %s5379_s13 = smov 112  }
  0x99   :  { %s5383_s1 = smov 64  }
  0x9a   :  { %v181_v0 = vld [vmem:[%s7171_s7] sm:$0x3]  ;;  %s5382_s7 = smov 80  }
  0x9b   :  { %4576 = vmatprep.subr.msk.mxu0 %vm189_vm0, %v181_v0  ;;  %v269_v3 = vld [vmem:[%s7172_s5 + $0x8] sm:$0xff]  ;;  %v271_v4 = vld [vmem:[%s7172_s5 + $0x18] sm:$0xff]  ;;  %v268_v5 = vld [vmem:[%s7172_s5] sm:$0xff] }
  0x9c   :  { %4577 = vmatpush3.msk.msra.mxu0 %vm189_vm0, %v181_v0  ;;  %v4581_v6 = vpack.c.bf16 %v271_v4, %v269_v3  ;;  %v270_v7 = vld [vmem:[%s7172_s5 + $0x10] sm:$0xff]  ;;  %v273_v8 = vld [vmem:[%s7172_s5 + $0x28] sm:$0xff]  ;;  %v275_v9 = vld [vmem:[%s7172_s5 + $0x38] sm:$0xff] }
  0x9d   :  { %4579 = vmatmul.mubr.msk.f32.vlgmr.msra.gmra.mrb[0].mxu0 %vm182_vm1, %v180_v2  ;;  %v4583_v10 = vpack.c.bf16 %v270_v7, %v268_v5  ;;  %v4585_v11 = vpack.c.bf16 %v275_v9, %v273_v8  ;;  %v272_v12 = vld [vmem:[%s7172_s5 + $0x20] sm:$0xff]  ;;  %v274_v13 = vld [vmem:[%s7172_s5 + $0x30] sm:$0xff]  ;;  %v520_v16 = vld [vmem:[%s7173_s29 + $0x8] sm:$0xff]  ;;  %s7175_s5 = sld [smem:[#allocation25_spill]] }
  0x9e   :  { %4582 = vmatprep.subr.bf16.mxu1 %v4581_v6  ;;  %v4587_v14 = vpack.c.bf16 %v274_v13, %v272_v12  ;;  %v521_v17 = vld [vmem:[%s7174_s22] sm:$0xff]  ;;  %v522_v20 = vld [vmem:[%s7174_s22 + $0x8] sm:$0xff] }
  0x9f   :  { %4584 = vmatpush1.bf16.msra.mxu1 %v4583_v10  ;;  %525 = vperm.xlu0 %4934, %v521_v17  }
  0xa0   :  { %4586 = vmatprep.subr.bf16.mxu1 %v4585_v11 }
  0xa3   :  { %4588 = vmatpush1.bf16.msra.mxu1 %v4587_v14  ;;  %v365_v18 = vld [vmem:[%s7175_s5 + $0x8] sm:$0xff]  ;;  %v367_v21 = vld [vmem:[%s7175_s5 + $0x18] sm:$0xff]  ;;  %v364_v22 = vld [vmem:[%s7175_s5] sm:$0xff]  ;;  %530 = vperm.xlu0 %4934, %v522_v20  }
  0xa4   :  { %540 = vmatprep.subr.mxu1 %v520_v16  ;;  %v366_v23 = vld [vmem:[%s7175_s5 + $0x10] sm:$0xff]  ;;  %v4589_v24 = vpack.c.bf16 %v367_v21, %v365_v18  ;;  %v369_v26 = vld [vmem:[%s7175_s5 + $0x28] sm:$0xff]  ;;  %v371_v27 = vld [vmem:[%s7175_s5 + $0x38] sm:$0xff] }
  0xa5   :  { %v4591_v25 = vpack.c.bf16 %v366_v23, %v364_v22  ;;  %v368_v28 = vld [vmem:[%s7175_s5 + $0x20] sm:$0xff]  ;;  %v4593_v29 = vpack.c.bf16 %v371_v27, %v369_v26  ;;  %v370_v30 = vld [vmem:[%s7175_s5 + $0x30] sm:$0xff]  ;;  %v373_v31 = vld [vmem:[%s7175_s5 + $0x48] sm:$0xff] }
  0xa6   :  { %v375_v32 = vld [vmem:[%s7175_s5 + $0x58] sm:$0xff]  ;;  %4590 = vmatprep.subr.bf16.mxu0 %v4589_v24  ;;  %v4595_v33 = vpack.c.bf16 %v370_v30, %v368_v28  ;;  %v372_v35 = vld [vmem:[%s7175_s5 + $0x40] sm:$0xff]  ;;  %v374_v36 = vld [vmem:[%s7175_s5 + $0x50] sm:$0xff] }
  0xa7   :  { %4592 = vmatpush1.bf16.msra.mxu0 %v4591_v25  ;;  %v4597_v34 = vpack.c.bf16 %v375_v32, %v373_v31  ;;  %v377_v37 = vld [vmem:[%s7175_s5 + $0x68] sm:$0xff]  ;;  %v379_v38 = vld [vmem:[%s7175_s5 + $0x78] sm:$0xff]  ;;  %v4599_v39 = vpack.c.bf16 %v374_v36, %v372_v35  ;;  %v376_v41 = vld [vmem:[%s7175_s5 + $0x60] sm:$0xff] }
  0xa8   :  { %4594 = vmatprep.subr.bf16.mxu0 %v4593_v29  ;;  %v4601_v40 = vpack.c.bf16 %v379_v38, %v377_v37  ;;  %v378_v42 = vld [vmem:[%s7175_s5 + $0x70] sm:$0xff]  ;;  %v381_v43 = vld [vmem:[%s7175_s5 + $0x88] sm:$0xff]  ;;  %v383_v44 = vld [vmem:[%s7175_s5 + $0x98] sm:$0xff] }
  0xa9   :  { %v4603_v45 = vpack.c.bf16 %v378_v42, %v376_v41  ;;  %v4605_v46 = vpack.c.bf16 %v383_v44, %v381_v43  ;;  %v380_v47 = vld [vmem:[%s7175_s5 + $0x80] sm:$0xff]  ;;  %v382_v48 = vld [vmem:[%s7175_s5 + $0x90] sm:$0xff]  ;;  %v385_v49 = vld [vmem:[%s7175_s5 + $0xa8] sm:$0xff] }
  0xaa   :  { %v387_v50 = vld [vmem:[%s7175_s5 + $0xb8] sm:$0xff]  ;;  %v4607_v51 = vpack.c.bf16 %v382_v48, %v380_v47  ;;  %v384_v53 = vld [vmem:[%s7175_s5 + $0xa0] sm:$0xff]  ;;  %v386_v54 = vld [vmem:[%s7175_s5 + $0xb0] sm:$0xff] }
  0xab   :  { %4596 = vmatpush1.bf16.msra.mxu0 %v4595_v33  ;;  %v4609_v52 = vpack.c.bf16 %v387_v50, %v385_v49  ;;  %v389_v55 = vld [vmem:[%s7175_s5 + $0xc8] sm:$0xff]  ;;  %v391_v56 = vld [vmem:[%s7175_s5 + $0xd8] sm:$0xff]  ;;  %v4611_v57 = vpack.c.bf16 %v386_v54, %v384_v53  ;;  %v388_v59 = vld [vmem:[%s7175_s5 + $0xc0] sm:$0xff] }
  0xac   :  { %4598 = vmatprep.subr.bf16.mxu0 %v4597_v34  ;;  %v4613_v58 = vpack.c.bf16 %v391_v56, %v389_v55  ;;  %v390_v60 = vld [vmem:[%s7175_s5 + $0xd0] sm:$0xff]  ;;  %v393_v61 = vld [vmem:[%s7175_s5 + $0xe8] sm:$0xff]  ;;  %v395_v62 = vld [vmem:[%s7175_s5 + $0xf8] sm:$0xff] }
  0xad   :  { %v4615_v63 = vpack.c.bf16 %v390_v60, %v388_v59  ;;  %v4617_v0 = vpack.c.bf16 %v395_v62, %v393_v61  ;;  %v392_v1 = vld [vmem:[%s7175_s5 + $0xe0] sm:$0xff]  ;;  %v394_v2 = vld [vmem:[%s7175_s5 + $0xf0] sm:$0xff]  ;;  %v397_v3 = vld [vmem:[%s7175_s5 + $0x108] sm:$0xff] }
  0xae   :  { %v399_v4 = vld [vmem:[%s7175_s5 + $0x118] sm:$0xff]  ;;  %v4619_v5 = vpack.c.bf16 %v394_v2, %v392_v1  ;;  %v396_v7 = vld [vmem:[%s7175_s5 + $0x100] sm:$0xff]  ;;  %v398_v8 = vld [vmem:[%s7175_s5 + $0x110] sm:$0xff] }
  0xaf   :  { %4600 = vmatpush1.bf16.msra.mxu0 %v4599_v39  ;;  %v4621_v6 = vpack.c.bf16 %v399_v4, %v397_v3  ;;  %v401_v9 = vld [vmem:[%s7175_s5 + $0x128] sm:$0xff]  ;;  %v403_v10 = vld [vmem:[%s7175_s5 + $0x138] sm:$0xff]  ;;  %v4623_v11 = vpack.c.bf16 %v398_v8, %v396_v7  ;;  %v400_v13 = vld [vmem:[%s7175_s5 + $0x120] sm:$0xff] }
  0xb0   :  { %4602 = vmatprep.subr.bf16.mxu0 %v4601_v40  ;;  %v4625_v12 = vpack.c.bf16 %v403_v10, %v401_v9  ;;  %v402_v14 = vld [vmem:[%s7175_s5 + $0x130] sm:$0xff]  ;;  %v405_v16 = vld [vmem:[%s7175_s5 + $0x148] sm:$0xff]  ;;  %v407_v17 = vld [vmem:[%s7175_s5 + $0x158] sm:$0xff] }
  0xb1   :  { %v4627_v18 = vpack.c.bf16 %v402_v14, %v400_v13  ;;  %v4629_v20 = vpack.c.bf16 %v407_v17, %v405_v16  ;;  %v404_v21 = vld [vmem:[%s7175_s5 + $0x140] sm:$0xff]  ;;  %v406_v22 = vld [vmem:[%s7175_s5 + $0x150] sm:$0xff]  ;;  %v409_v23 = vld [vmem:[%s7175_s5 + $0x168] sm:$0xff] }
  0xb2   :  { %v411_v24 = vld [vmem:[%s7175_s5 + $0x178] sm:$0xff]  ;;  %v4631_v25 = vpack.c.bf16 %v406_v22, %v404_v21  ;;  %v408_v27 = vld [vmem:[%s7175_s5 + $0x160] sm:$0xff]  ;;  %v410_v28 = vld [vmem:[%s7175_s5 + $0x170] sm:$0xff] }
  0xb3   :  { %4604 = vmatpush1.bf16.msra.mxu0 %v4603_v45  ;;  %v4633_v26 = vpack.c.bf16 %v411_v24, %v409_v23  ;;  %v413_v29 = vld [vmem:[%s7175_s5 + $0x188] sm:$0xff]  ;;  %v415_v30 = vld [vmem:[%s7175_s5 + $0x198] sm:$0xff]  ;;  %v4635_v31 = vpack.c.bf16 %v410_v28, %v408_v27  ;;  %v412_v33 = vld [vmem:[%s7175_s5 + $0x180] sm:$0xff] }
  0xb4   :  { %4606 = vmatprep.subr.bf16.mxu0 %v4605_v46  ;;  %v4637_v32 = vpack.c.bf16 %v415_v30, %v413_v29  ;;  %v414_v34 = vld [vmem:[%s7175_s5 + $0x190] sm:$0xff]  ;;  %v417_v35 = vld [vmem:[%s7175_s5 + $0x1a8] sm:$0xff]  ;;  %v419_v36 = vld [vmem:[%s7175_s5 + $0x1b8] sm:$0xff] }
  0xb5   :  { %v4639_v37 = vpack.c.bf16 %v414_v34, %v412_v33  ;;  %v4641_v38 = vpack.c.bf16 %v419_v36, %v417_v35  ;;  %v416_v39 = vld [vmem:[%s7175_s5 + $0x1a0] sm:$0xff]  ;;  %v418_v40 = vld [vmem:[%s7175_s5 + $0x1b0] sm:$0xff]  ;;  %v421_v41 = vld [vmem:[%s7175_s5 + $0x1c8] sm:$0xff] }
  0xb6   :  { %v423_v42 = vld [vmem:[%s7175_s5 + $0x1d8] sm:$0xff]  ;;  %v4643_v43 = vpack.c.bf16 %v418_v40, %v416_v39  ;;  %v420_v45 = vld [vmem:[%s7175_s5 + $0x1c0] sm:$0xff]  ;;  %v422_v46 = vld [vmem:[%s7175_s5 + $0x1d0] sm:$0xff] }
  0xb7   :  { %4608 = vmatpush1.bf16.msra.mxu0 %v4607_v51  ;;  %v4645_v44 = vpack.c.bf16 %v423_v42, %v421_v41  ;;  %v4647_v47 = vpack.c.bf16 %v422_v46, %v420_v45  ;;  %v519_v49 = vld [vmem:[%s7173_s29] sm:$0xff]  ;;  %v518_v55 = vld [vmem:[#allocation5 + $0x8] sm:$0xff]  ;;  %v425_v13 = vld [vmem:[%s7175_s5 + $0x1e8] sm:$0xff]  ;;  %s5380_s29 = smov 96  }
  0xb8   :  { %4610 = vmatprep.subr.bf16.mxu0 %v4609_v52  ;;  %v4954_v50 = vld [vmem:[%s7132_s10 + $0x4] ss:$16 sps:$4 sm:$0xff]   ;;  %v4952_v53 = vld [vmem:[%s7132_s10] ss:$16 sps:$4 sm:$0xff]   ;;  %v427_v14 = vld [vmem:[%s7175_s5 + $0x1f8] sm:$0xff] }
  0xb9   :  { %v517_v52 = vld [vmem:[#allocation5] sm:$0xff]  ;;  %v4649_v16 = vpack.c.bf16 %v427_v14, %v425_v13  ;;  %v424_v17 = vld [vmem:[%s7175_s5 + $0x1e0] sm:$0xff]  ;;  %v4993_v23 = vld [vmem:[%s7132_s10 + $0xc] ss:$16 sps:$4 sm:$0xff]  }
  0xba   :  { %v4957_v54 = vld [vmem:[%s7132_s10 + $0x24] ss:$16 sps:$4 sm:$0xff]   ;;  %v4955_v56 = vld [vmem:[%s7132_s10 + $0x20] ss:$16 sps:$4 sm:$0xff]   ;;  %v176_v30 = vld [vmem:[%s7176_s4 + $0x8] sm:$0xff] }
  0xbb   :  { %4612 = vmatpush1.bf16.msra.mxu0 %v4611_v57  ;;  %v4960_v57 = vld [vmem:[%s7132_s10 + $0x44] ss:$16 sps:$4 sm:$0xff]   ;;  %v4961_v60 = vld [vmem:[%s7132_s10 + $0x60] ss:$16 sps:$4 sm:$0xff]   ;;  %v4991_v35 = vld [vmem:[%s7132_s10 + $0x8] ss:$16 sps:$4 sm:$0xff]  }
  0xbc   :  { %4614 = vmatprep.subr.bf16.mxu0 %v4613_v58  ;;  %v4958_v58 = vld [vmem:[%s7132_s10 + $0x40] ss:$16 sps:$4 sm:$0xff]   ;;  %v4963_v59 = vld [vmem:[%s7132_s10 + $0x64] ss:$16 sps:$4 sm:$0xff]   ;;  %v5005_v46 = vld [vmem:[%s7132_s10 + $0x4c] ss:$16 sps:$4 sm:$0xff]  }
  0xbd   :  { %v4966_v61 = vld [vmem:[%s7132_s10 + $0x84] ss:$16 sps:$4 sm:$0xff]   ;;  %v4964_v62 = vld [vmem:[%s7132_s10 + $0x80] ss:$16 sps:$4 sm:$0xff]   ;;  %v5038_v13 = vld [vmem:[%s7132_s10 + $0x18c] ss:$16 sps:$4 sm:$0xff]  }
  0xbe   :  { %v4972_v1 = vld [vmem:[%s7132_s10 + $0xc4] ss:$16 sps:$4 sm:$0xff]   ;;  %v4970_v2 = vld [vmem:[%s7132_s10 + $0xc0] ss:$16 sps:$4 sm:$0xff]   ;;  %v5036_v14 = vld [vmem:[%s7132_s10 + $0x188] ss:$16 sps:$4 sm:$0xff]  }
  0xbf   :  { %4616 = vmatpush1.bf16.msra.mxu0 %v4615_v63  ;;  %v4969_v63 = vld [vmem:[%s7132_s10 + $0xa4] ss:$16 sps:$4 sm:$0xff]   ;;  %v4973_v4 = vld [vmem:[%s7132_s10 + $0xe0] ss:$16 sps:$4 sm:$0xff]  }
  0xc0   :  { %4618 = vmatprep.subr.bf16.mxu0 %v4617_v0  ;;  %v4967_v0 = vld [vmem:[%s7132_s10 + $0xa0] ss:$16 sps:$4 sm:$0xff]   ;;  %v4975_v3 = vld [vmem:[%s7132_s10 + $0xe4] ss:$16 sps:$4 sm:$0xff]  }
  0xc1   :  { %v4981_v7 = vld [vmem:[%s7132_s10 + $0x124] ss:$16 sps:$4 sm:$0xff]   ;;  %v4979_v8 = vld [vmem:[%s7132_s10 + $0x120] ss:$16 sps:$4 sm:$0xff]  }
  0xc2   :  { %v4984_v9 = vld [vmem:[%s7132_s10 + $0x144] ss:$16 sps:$4 sm:$0xff]   ;;  %v4982_v10 = vld [vmem:[%s7132_s10 + $0x140] ss:$16 sps:$4 sm:$0xff]  }
  0xc3   :  { %4620 = vmatpush1.bf16.msra.mxu0 %v4619_v5  ;;  %v4978_v5 = vld [vmem:[%s7132_s10 + $0x104] ss:$16 sps:$4 sm:$0xff]   ;;  %v4988_v22 = vld [vmem:[%s7132_s10 + $0x180] ss:$16 sps:$4 sm:$0xff]  }
  0xc4   :  { %4622 = vmatprep.subr.bf16.mxu0 %v4621_v6  ;;  %v4976_v6 = vld [vmem:[%s7132_s10 + $0x100] ss:$16 sps:$4 sm:$0xff]   ;;  %v4990_v21 = vld [vmem:[%s7132_s10 + $0x184] ss:$16 sps:$4 sm:$0xff]  }
  0xc5   :  { %v4994_v24 = vld [vmem:[%s7132_s10 + $0x1a0] ss:$16 sps:$4 sm:$0xff]   ;;  %v5008_v28 = vld [vmem:[%s7132_s10 + $0x1e4] ss:$16 sps:$4 sm:$0xff]  }
  0xc6   :  { %v5000_v27 = vld [vmem:[%s7132_s10 + $0x1c0] ss:$16 sps:$4 sm:$0xff]  }
  0xc7   :  { %4624 = vmatpush1.bf16.msra.mxu0 %v4623_v11  ;;  %v4987_v11 = vld [vmem:[%s7132_s10 + $0x164] ss:$16 sps:$4 sm:$0xff]   ;;  %v5006_v29 = vld [vmem:[%s7132_s10 + $0x1e0] ss:$16 sps:$4 sm:$0xff]  }
  0xc8   :  { %4626 = vmatprep.subr.bf16.mxu0 %v4625_v12  ;;  %v4985_v12 = vld [vmem:[%s7132_s10 + $0x160] ss:$16 sps:$4 sm:$0xff]  }
  0xc9   :  { %v177_v39 = vld [vmem:[%s7176_s4 + $0x10] sm:$0xff] }
  0xcb   :  { %4628 = vmatpush1.bf16.msra.mxu0 %v4627_v18  ;;  %v426_v18 = vld [vmem:[%s7175_s5 + $0x1f0] sm:$0xff]  ;;  %s5378_s5 = smov 32  }
  0xcc   :  { %4630 = vmatprep.subr.bf16.mxu0 %v4629_v20  ;;  %v4651_v20 = vpack.c.bf16 %v426_v18, %v424_v17  ;;  %v5039_v17 = vld [vmem:[%s7132_s10 + $0x1a8] ss:$16 sps:$4 sm:$0xff]   ;;  %v5044_v18 = vld [vmem:[%s7132_s10 + $0x1cc] ss:$16 sps:$4 sm:$0xff]  }
  0xcf   :  { %4632 = vmatpush1.bf16.msra.mxu0 %v4631_v25  ;;  %v4996_v25 = vld [vmem:[%s7132_s10 + $0x1a4] ss:$16 sps:$4 sm:$0xff]  }
  0xd0   :  { %4634 = vmatprep.subr.bf16.mxu0 %v4633_v26  ;;  %v5002_v26 = vld [vmem:[%s7132_s10 + $0x1c4] ss:$16 sps:$4 sm:$0xff]  }
  0xd3   :  { %4636 = vmatpush1.bf16.msra.mxu0 %v4635_v31  ;;  %v175_v31 = vld [vmem:[%s7176_s4] sm:$0xff] }
  0xd4   :  { %4638 = vmatprep.subr.bf16.mxu0 %v4637_v32 }
  0xd7   :  { %4640 = vmatpush1.bf16.msra.mxu0 %v4639_v37  ;;  %v178_v37 = vld [vmem:[%s7176_s4 + $0x18] sm:$0xff] }
  0xd8   :  { %4642 = vmatprep.subr.bf16.mxu0 %v4641_v38  ;;  %v4999_v38 = vld [vmem:[%s7132_s10 + $0x2c] ss:$16 sps:$4 sm:$0xff]  }
  0xdb   :  { %4644 = vmatpush1.bf16.msra.mxu0 %v4643_v43 }
  0xdc   :  { %4646 = vmatprep.subr.bf16.mxu0 %v4645_v44  ;;  %v4997_v44 = vld [vmem:[%s7132_s10 + $0x28] ss:$16 sps:$4 sm:$0xff]  }
  0xdf   :  { %4648 = vmatpush1.bf16.msra.mxu0 %v4647_v47 }
  0xe0   :  { %4650 = vmatprep.subr.bf16.mxu0 %v4649_v16  ;;  %v5041_v16 = vld [vmem:[%s7132_s10 + $0x1ac] ss:$16 sps:$4 sm:$0xff]  }
  0xe3   :  { %4652 = vmatpush1.bf16.msra.mxu0 %v4651_v20  ;;  %v5042_v20 = vld [vmem:[%s7132_s10 + $0x1c8] ss:$16 sps:$4 sm:$0xff]  }
  0xe4   :  { %1050 = vmatprep.subr.bf16.mxu0 %v4993_v23 }
 0x11e   :  { %v526_v42 = vpop.permute.xlu0 %525 }
 0x170   :  { %v4580_v48 = vpop.f32.mrb[0].mxu0 }
 0x171   :  { %v259_v51 = vpop.f32.mrb[1].mxu0 }
 0x172   :  { %4353 = vmatmul.mubr.msk.f32.vlgmr.msra.gmra.mrb[0].mxu1 %vm276_vm2, %v259_v51  ;;  %v5003_v51 = vld [vmem:[%s7132_s10 + $0x48] ss:$16 sps:$4 sm:$0xff]  }
 0x173   :  { %353 = vmatprep.mubr.f32.mxu1 %v5375_v15  ;;  %541 = vmatpush1.msra.mxu1 %v519_v49 }
 0x174   :  { %1007 = vmatprep.subr.bf16.mxu1 %v4954_v50 }
 0x176   :  { %4354 = vmatmul.mubr.msk.f32.gmra.mrb[2].mxu1 %vm276_vm2, %v4580_v48 }
 0x177   :  { %604 = vmatprep.mubr.f32.mxu1 %v5375_v15 }
 0x17a   :  { %4355 = vmatmul.mubr.msk.f32.vlgmr.msra.gmra.mrb[4].mxu1 %vm533_vm3, %v517_v52  ;;  %v5011_v52 = vld [vmem:[%s7132_s10 + $0x6c] ss:$16 sps:$4 sm:$0xff]  }
 0x17b   :  { %610 = vmatprep.mubr.f32.mxu1 %v5375_v15  ;;  %1008 = vmatpush1.bf16.msra.mxu1 %v4952_v53  ;;  %v531_v53 = vpop.permute.xlu0 %530 }
 0x17c   :  { %1009 = vmatprep.subr.bf16.mxu1 %v4957_v54 }
 0x17e   :  { %4356 = vmatmul.mubr.msk.f32.gmra.mrb[6].mxu1 %vm533_vm3, %v518_v55 }
 0x17f   :  { %1010 = vmatpush1.bf16.msra.mxu1 %v4955_v56 }
 0x180   :  { %1011 = vmatprep.subr.bf16.mxu1 %v4960_v57 }
 0x183   :  { %1012 = vmatpush1.bf16.msra.mxu1 %v4958_v58  ;;  %v5009_v58 = vld [vmem:[%s7132_s10 + $0x68] ss:$16 sps:$4 sm:$0xff]  }
 0x184   :  { %1013 = vmatprep.subr.bf16.mxu1 %v4963_v59 }
 0x187   :  { %1014 = vmatpush1.bf16.msra.mxu1 %v4961_v60  ;;  %v5014_v60 = vld [vmem:[%s7132_s10 + $0x8c] ss:$16 sps:$4 sm:$0xff]  }
 0x188   :  { %1015 = vmatprep.subr.bf16.mxu1 %v4966_v61 }
 0x18b   :  { %1016 = vmatpush1.bf16.msra.mxu1 %v4964_v62  ;;  %v5012_v62 = vld [vmem:[%s7132_s10 + $0x88] ss:$16 sps:$4 sm:$0xff]  }
 0x18c   :  { %1017 = vmatprep.subr.bf16.mxu1 %v4969_v63  ;;  %v5017_v63 = vld [vmem:[%s7132_s10 + $0xac] ss:$16 sps:$4 sm:$0xff]  }
 0x18f   :  { %1018 = vmatpush1.bf16.msra.mxu1 %v4967_v0  ;;  %v5015_v0 = vld [vmem:[%s7132_s10 + $0xa8] ss:$16 sps:$4 sm:$0xff]  }
 0x190   :  { %1019 = vmatprep.subr.bf16.mxu1 %v4972_v1  ;;  %v5020_v1 = vld [vmem:[%s7132_s10 + $0xcc] ss:$16 sps:$4 sm:$0xff]  }
 0x193   :  { %1020 = vmatpush1.bf16.msra.mxu1 %v4970_v2  ;;  %v5018_v2 = vld [vmem:[%s7132_s10 + $0xc8] ss:$16 sps:$4 sm:$0xff]  }
 0x194   :  { %1021 = vmatprep.subr.bf16.mxu1 %v4975_v3  ;;  %v5023_v3 = vld [vmem:[%s7132_s10 + $0xec] ss:$16 sps:$4 sm:$0xff]  }
 0x197   :  { %1022 = vmatpush1.bf16.msra.mxu1 %v4973_v4  ;;  %v5021_v4 = vld [vmem:[%s7132_s10 + $0xe8] ss:$16 sps:$4 sm:$0xff]  }
 0x198   :  { %1023 = vmatprep.subr.bf16.mxu1 %v4978_v5  ;;  %v5026_v5 = vld [vmem:[%s7132_s10 + $0x10c] ss:$16 sps:$4 sm:$0xff]  }
 0x19b   :  { %1024 = vmatpush1.bf16.msra.mxu1 %v4976_v6  ;;  %v5024_v6 = vld [vmem:[%s7132_s10 + $0x108] ss:$16 sps:$4 sm:$0xff]  }
 0x19c   :  { %1025 = vmatprep.subr.bf16.mxu1 %v4981_v7  ;;  %v5029_v7 = vld [vmem:[%s7132_s10 + $0x12c] ss:$16 sps:$4 sm:$0xff]  }
 0x19f   :  { %1026 = vmatpush1.bf16.msra.mxu1 %v4979_v8  ;;  %v5027_v8 = vld [vmem:[%s7132_s10 + $0x128] ss:$16 sps:$4 sm:$0xff]  }
 0x1a0   :  { %1027 = vmatprep.subr.bf16.mxu1 %v4984_v9  ;;  %v5032_v9 = vld [vmem:[%s7132_s10 + $0x14c] ss:$16 sps:$4 sm:$0xff]  }
 0x1a3   :  { %1028 = vmatpush1.bf16.msra.mxu1 %v4982_v10  ;;  %v5030_v10 = vld [vmem:[%s7132_s10 + $0x148] ss:$16 sps:$4 sm:$0xff]  }
 0x1a4   :  { %1029 = vmatprep.subr.bf16.mxu1 %v4987_v11  ;;  %v5035_v11 = vld [vmem:[%s7132_s10 + $0x16c] ss:$16 sps:$4 sm:$0xff]  }
 0x1a7   :  { %1030 = vmatpush1.bf16.msra.mxu1 %v4985_v12  ;;  %v5033_v12 = vld [vmem:[%s7132_s10 + $0x168] ss:$16 sps:$4 sm:$0xff]  }
 0x1a8   :  { %1031 = vmatprep.subr.bf16.mxu1 %v4990_v21  ;;  %v5047_v21 = vld [vmem:[%s7132_s10 + $0x1ec] ss:$16 sps:$4 sm:$0xff]  }
 0x1ab   :  { %1032 = vmatpush1.bf16.msra.mxu1 %v4988_v22  ;;  %v5045_v22 = vld [vmem:[%s7132_s10 + $0x1e8] ss:$16 sps:$4 sm:$0xff]  }
 0x1ac   :  { %1033 = vmatprep.subr.bf16.mxu1 %v4996_v25 }
 0x1af   :  { %1034 = vmatpush1.bf16.msra.mxu1 %v4994_v24 }
 0x1b0   :  { %1035 = vmatprep.subr.bf16.mxu1 %v5002_v26 }
 0x1b3   :  { %1036 = vmatpush1.bf16.msra.mxu1 %v5000_v27 }
 0x1b4   :  { %1037 = vmatprep.subr.bf16.mxu1 %v5008_v28 }
 0x1b7   :  { %1038 = vmatpush1.bf16.msra.mxu1 %v5006_v29 }
 0x245   :  { %v349_v32 = vpop.f32.mrb[0].mxu1 }
 0x246   :  { %v351_v33 = vpop.f32.mrb[1].mxu1  ;;  %v360_v36 = vmul.f32 %v349_v32, %v175_v31 }
 0x247   :  { %v361_v34 = vmul.f32 %v351_v33, %v176_v30 }
 0x249   :  { %v355_v40 = vpop.f32.mrb[2].mxu1  ;;  %496 = vmatprep.mubr.f32.mxu0 %v361_v34 }
 0x24a   :  { %v357_v41 = vpop.f32.mrb[3].mxu1  ;;  %497 = vmatmul.mubr.f32.vlgmr.msra.gmra.mrb[2].mxu0 %v360_v36  ;;  %v362_v45 = vmul.f32 %v355_v40, %v177_v39 }
 0x24b   :  { %v363_v43 = vmul.f32 %v357_v41, %v178_v37  ;;  %1051 = vmatpush1.bf16.msra.mxu0 %v4991_v35 }
 0x24c   :  { %1052 = vmatprep.subr.bf16.mxu0 %v4999_v38 }
 0x24d   :  { %502 = vmatprep.mubr.f32.mxu0 %v363_v43  ;;  %v606_v47 = vpop.f32.mrb[4].mxu1 }
 0x24e   :  { %v6003_v48 = vadd.f32 %v606_v47, %v526_v42  ;;  %503 = vmatmul.mubr.f32.gmra.mrb[4].mxu0 %v362_v45  ;;  %v608_v49 = vpop.f32.mrb[5].mxu1  ;;  %v428_v47 = vld [vmem:[%s7177_s8] sm:$0xff] }
 0x24f   :  { %v6005_v50 = vadd.f32 %v608_v49, %v526_v42  ;;  %1053 = vmatpush1.bf16.msra.mxu0 %v4997_v44 }
 0x250   :  { %617 = vst [vmem:[%s7146_s24] sm:$0xff] %v6003_v48  ;;  %1054 = vmatprep.subr.bf16.mxu0 %v5005_v46  ;;  %v1102_v41 = vmul.f32 %v6003_v48, %v6003_v48 }
 0x251   :  { %618 = vst [vmem:[%s7146_s24 + $0x8] sm:$0xff] %v6005_v50  ;;  %v612_v54 = vpop.f32.mrb[6].mxu1  ;;  %v1093_v39 = vadd.f32 %v6005_v50, %v6003_v48  ;;  %v1103_v42 = vmul.f32 %v6005_v50, %v6005_v50 }
 0x252   :  { %v6021_v55 = vadd.f32 %v612_v54, %v531_v53  ;;  %v614_v56 = vpop.f32.mrb[7].mxu1 }
 0x253   :  { %v6023_v57 = vadd.f32 %v614_v56, %v531_v53  ;;  %1055 = vmatpush1.bf16.msra.mxu0 %v5003_v51  ;;  %v1106_v43 = vadd.f32 %v1103_v42, %v1102_v41  ;;  %v509_v51 = vld [vmem:[%s7178_s25] sm:$0xff] }
 0x254   :  { %619 = vst [vmem:[%s7146_s24 + $0x10] sm:$0xff] %v6021_v55  ;;  %1056 = vmatprep.subr.bf16.mxu0 %v5011_v52  ;;  %v621_v61 = vpack.c.bf16 %v6021_v55, %v6003_v48  ;;  %v1104_v44 = vmul.f32 %v6021_v55, %v6021_v55 }
 0x255   :  { %620 = vst [vmem:[%s7146_s24 + $0x18] sm:$0xff] %v6023_v57  ;;  %v622_v59 = vpack.c.bf16 %v6023_v57, %v6005_v50  ;;  %v1096_v40 = vadd.f32 %v6023_v57, %v6021_v55  ;;  %v1105_v45 = vmul.f32 %v6023_v57, %v6023_v57 }
 0x257   :  { %1057 = vmatpush1.bf16.msra.mxu0 %v5009_v58  ;;  %1039 = vmatprep.mubr.bf16.mxu1 %v622_v59  ;;  %v1109_v46 = vadd.f32 %v1105_v45, %v1104_v44 }
 0x258   :  { %1082 = vmatprep.mubr.bf16.mxu0 %v622_v59  ;;  %1040 = vmatmul.mubr.bf16.vlgmr.msra.gmra.mrb[8].mxu1 %v621_v61 }
 0x259   :  { %1058 = vmatprep.subr.bf16.mxu0 %v5014_v60  ;;  %1331 = vmatprep.mubr.f32.mxu1 %v5375_v15 }
 0x25b   :  { %1059 = vmatpush1.bf16.msra.mxu0 %v5012_v62 }
 0x25c   :  { %1060 = vmatprep.subr.bf16.mxu0 %v5017_v63 }
 0x25f   :  { %1061 = vmatpush1.bf16.msra.mxu0 %v5015_v0 }
 0x260   :  { %1062 = vmatprep.subr.bf16.mxu0 %v5020_v1 }
 0x263   :  { %1063 = vmatpush1.bf16.msra.mxu0 %v5018_v2 }
 0x264   :  { %1064 = vmatprep.subr.bf16.mxu0 %v5023_v3  ;;  %v430_v3 = vld [vmem:[%s7177_s8 + $0x10] sm:$0xff] }
 0x267   :  { %1065 = vmatpush1.bf16.msra.mxu0 %v5021_v4 }
 0x268   :  { %1066 = vmatprep.subr.bf16.mxu0 %v5026_v5  ;;  %v511_v5 = vld [vmem:[%s7178_s25 + $0x10] sm:$0xff] }
 0x26b   :  { %1067 = vmatpush1.bf16.msra.mxu0 %v5024_v6 }
 0x26c   :  { %1068 = vmatprep.subr.bf16.mxu0 %v5029_v7  ;;  %v1795_v7 = vld [vmem:[%s7140_s18] sm:$0xff] }
 0x26f   :  { %1069 = vmatpush1.bf16.msra.mxu0 %v5027_v8  ;;  %v5381_v8 = vmov 112  }
 0x270   :  { %1070 = vmatprep.subr.bf16.mxu0 %v5032_v9  ;;  %v1826_v9 = vld [vmem:[%s7141_s19 + $0x8] sm:$0xff] }
 0x273   :  { %1071 = vmatpush1.bf16.msra.mxu0 %v5030_v10  ;;  %v5384_v10 = vmov 114  }
 0x274   :  { %1072 = vmatprep.subr.bf16.mxu0 %v5035_v11  ;;  %v1796_v11 = vld [vmem:[%s7140_s18 + $0x8] sm:$0xff] }
 0x277   :  { %1073 = vmatpush1.bf16.msra.mxu0 %v5033_v12  ;;  %v1825_v12 = vld [vmem:[%s7141_s19] sm:$0xff] }
 0x278   :  { %1074 = vmatprep.subr.bf16.mxu0 %v5038_v13  ;;  %v5385_v13 = vmov 113  }
 0x27b   :  { %1075 = vmatpush1.bf16.msra.mxu0 %v5036_v14 }
 0x27c   :  { %1076 = vmatprep.subr.bf16.mxu0 %v5041_v16 }
 0x27f   :  { %1077 = vmatpush1.bf16.msra.mxu0 %v5039_v17 }
 0x280   :  { %1078 = vmatprep.subr.bf16.mxu0 %v5044_v18 }
 0x283   :  { %1079 = vmatpush1.bf16.msra.mxu0 %v5042_v20 }
 0x284   :  { %1080 = vmatprep.subr.bf16.mxu0 %v5047_v21 }
 0x287   :  { %1081 = vmatpush1.bf16.msra.mxu0 %v5045_v22 }
 0x28a   :  { %1083 = vmatmul.mubr.bf16.vlgmr.msra.gmra.mrb[8].mxu0 %v621_v61 }
 0x28b   :  { %1992 = vmatprep.mubr.f32.mxu0 %v5375_v15 }
 0x31d   :  { %v498_v23 = vpop.f32.mrb[2].mxu0 }
 0x31e   :  { %v6114_v24 = vpop.f32.mrb[3].mxu0  ;;  %v499_v49 = vadd.f32 %v498_v23, %v428_v47 }
 0x320   :  { %v6156_v52 = vmul.f32 %v509_v51, %v499_v49 }
 0x321   :  { %v504_v25 = vpop.f32.mrb[4].mxu0 }
 0x322   :  { %v6116_v26 = vpop.f32.mrb[5].mxu0  ;;  %v505_v4 = vadd.f32 %v504_v25, %v430_v3 }
 0x324   :  { %v6186_v6 = vmul.f32 %v511_v5, %v505_v4 }
 0x32b   :  { %v6118_v27 = vpop.f32.mrb[8].mxu1 }
 0x32c   :  { %v6120_v28 = vpop.f32.mrb[9].mxu1  ;;  %v1138_v29 = vmul.f32 %v6118_v27, %v6118_v27 }
 0x32d   :  { %v6124_v30 = vpop.f32.mrb[10].mxu1  ;;  %v1130_v31 = vadd.f32 %v6120_v28, %v6118_v27  ;;  %v1139_v32 = vmul.f32 %v6120_v28, %v6120_v28 }
 0x32e   :  { %v6130_v33 = vpop.f32.mrb[11].mxu1  ;;  %v1140_v34 = vmul.f32 %v6124_v30, %v6124_v30 }
 0x32f   :  { %1131 = vadd.xlane.f32.xlu1 %v1130_v31  ;;  %v1142_v35 = vadd.f32 %v1139_v32, %v1138_v29  ;;  %v1133_v36 = vadd.f32 %v6130_v33, %v6124_v30  ;;  %v1141_v37 = vmul.f32 %v6130_v33, %v6130_v33 }
 0x331   :  { %1143 = vadd.xlane.f32.xlu0 %v1142_v35  ;;  %v1145_v38 = vadd.f32 %v1141_v37, %v1140_v34 }
 0x333   :  { %1134 = vadd.xlane.f32.xlu1 %v1133_v36 }
 0x337   :  { %1094 = vadd.xlane.f32.xlu1 %v1093_v39 }
 0x33b   :  { %1097 = vadd.xlane.f32.xlu1 %v1096_v40 }
 0x33f   :  { %1107 = vadd.xlane.f32.xlu1 %v1106_v43 }
 0x343   :  { %1110 = vadd.xlane.f32.xlu1 %v1109_v46 }
 0x354   :  { %1252 = vrot.lane.b32.xlu1 %v6156_v52, %s5377_s28 }
 0x35d   :  { %v6160_v53 = vpop.f32.mrb[8].mxu0 }
 0x35e   :  { %v6162_v54 = vpop.f32.mrb[9].mxu0  ;;  %v1174_v56 = vmul.f32 %v6160_v53, %v6160_v53 }
 0x35f   :  { %v6166_v58 = vpop.f32.mrb[10].mxu0  ;;  %v1166_v59 = vadd.f32 %v6162_v54, %v6160_v53  ;;  %v1175_v60 = vmul.f32 %v6162_v54, %v6162_v54 }
 0x360   :  { %v6172_v61 = vpop.f32.mrb[11].mxu0  ;;  %v1176_v62 = vmul.f32 %v6166_v58, %v6166_v58 }
 0x361   :  { %v1177_v63 = vmul.f32 %v6172_v61, %v6172_v61  ;;  %v1169_v0 = vadd.f32 %v6172_v61, %v6166_v58  ;;  %v1178_v1 = vadd.f32 %v1175_v60, %v1174_v56 }
 0x363   :  { %v1181_v2 = vadd.f32 %v1177_v63, %v1176_v62 }
 0x365   :  { %1182 = vadd.xlane.f32.xlu0 %v1181_v2 }
 0x378   :  { %1146 = vadd.xlane.f32.xlu1 %v1145_v38 }
 0x37b   :  { %1254 = vrot.lane.b32.xlu0 %v6186_v6, %s5377_s28 }
 0x37c   :  { %1167 = vadd.xlane.f32.xlu1 %v1166_v59 }
 0x37f   :  { %1429 = vrot.lane.b32.xlu0 %v6156_v52, %s5378_s5 }
 0x380   :  { %1170 = vadd.xlane.f32.xlu1 %v1169_v0 }
 0x383   :  { %1920 = vrot.lane.b32.xlu0 %v6156_v52, %s5379_s13 }
 0x384   :  { %1179 = vadd.xlane.f32.xlu1 %v1178_v1 }
 0x387   :  { %2086 = vrot.lane.b32.xlu0 %v6156_v52, %s5380_s29 }
 0x38b   :  { %1799 = vperm.xlu0 %4934, %v1795_v7  }
 0x38f   :  { %4936 = vset.pattern.permute.xlu0 %v5381_v8 }
 0x390   :  { %2176 = vperm.xlu0 %4936, %v6156_v52  }
 0x394   :  { %2209 = vrot.lane.b32.xlu0 %v6186_v6, %s5382_s7 }
 0x395   :  { %1242 = vrot.lane.b32.xlu1 %v6156_v52, %s5383_s1  ;;  %4939 = vset.pattern.permute.xlu0 %v5376_v19 }
 0x398   :  { %1834 = vperm.xlu0 %4939, %v1826_v9  }
 0x399   :  { %1244 = vrot.lane.b32.xlu1 %v6186_v6, %s5383_s1 }
 0x39c   :  { %4941 = vset.pattern.permute.xlu0 %v5384_v10 }
 0x39d   :  { %1525 = vperm.xlu0 %4941, %v6156_v52   ;;  %1431 = vrot.lane.b32.xlu1 %v6186_v6, %s5378_s5 }
 0x3a1   :  { %1922 = vrot.lane.b32.xlu1 %v6186_v6, %s5379_s13  ;;  %4943 = vset.pattern.permute.xlu0 %v5376_v19 }
 0x3a5   :  { %2088 = vrot.lane.b32.xlu1 %v6186_v6, %s5380_s29 }
 0x3a9   :  { %1804 = vperm.xlu1 %4935, %v1796_v11  }
 0x3ad   :  { %4937 = vset.pattern.permute.xlu1 %v5381_v8 }
 0x3ae   :  { %2180 = vperm.xlu1 %4937, %v6186_v6  }
 0x3b2   :  { %2207 = vrot.lane.b32.xlu1 %v6156_v52, %s5382_s7 }
 0x3b3   :  { %4938 = vset.pattern.permute.xlu1 %v5376_v19 }
 0x3b6   :  { %1829 = vperm.xlu1 %4938, %v1825_v12  }
 0x3ba   :  { %4940 = vset.pattern.permute.xlu1 %v5385_v13 }
 0x3bb   :  { %2200 = vperm.xlu1 %4940, %v6156_v52  }
 0x3bc   :  { %v1132_v14 = vpop.xlane.xlu1 %1131 }
 0x3bd   :  { %v1136_v20 = vmul.f32 0.00390625, %v1132_v14 }
 0x3be   :  { %v1144_v22 = vpop.xlane.xlu0 %1143 }
 0x3bf   :  { %2204 = vperm.xlu1 %4940, %v6186_v6   ;;  %v1148_v23 = vmul.f32 0.00390625, %v1144_v22  ;;  %v1154_v25 = vmul.f32 %v1136_v20, %v1136_v20  ;;  %v1151_v62 = vsub.f32 %v6120_v28, %v1136_v20  ;;  %v1150_v4 = vsub.f32 %v6118_v27, %v1136_v20 }
 0x3c0   :  { %v1135_v16 = vpop.xlane.xlu1 %1134 }
 0x3c1   :  { %v1156_v32 = vsub.f32 %v1148_v23, %v1154_v25  ;;  %v1137_v43 = vmul.f32 0.00390625, %v1135_v16 }
 0x3c3   :  { %4942 = vset.pattern.permute.xlu1 %v5384_v10  ;;  %v1158_v38 = vadd.f32 1e-05, %v1156_v32  ;;  %v1155_v47 = vmul.f32 %v1137_v43, %v1137_v43 }
 0x3c4   :  { %1529 = vperm.xlu1 %4942, %v6186_v6   ;;  %v1095_v17 = vpop.xlane.xlu1 %1094 }
 0x3c5   :  { %v1100_v34 = vmul.f32 0.00390625, %v1095_v17  ;;  %5144 = vrsqrt.f32 %v1158_v38 }
 0x3c7   :  { %v1118_v39 = vmul.f32 %v1100_v34, %v1100_v34  ;;  %v1115_v14 = vsub.f32 %v6005_v50, %v1100_v34  ;;  %v1152_v50 = vsub.f32 %v6124_v30, %v1137_v43 }
 0x3c8   :  { %4944 = vset.pattern.permute.xlu1 %v5376_v19  ;;  %v1098_v18 = vpop.xlane.xlu1 %1097 }
 0x3c9   :  { %v1101_v31 = vmul.f32 0.00390625, %v1098_v18 }
 0x3cb   :  { %v1119_v37 = vmul.f32 %v1101_v31, %v1101_v31  ;;  %v1116_v28 = vsub.f32 %v6021_v55, %v1101_v31  ;;  %v1117_v16 = vsub.f32 %v6023_v57, %v1101_v31  ;;  %v1153_v55 = vsub.f32 %v6130_v33, %v1137_v43 }
 0x3cc   :  { %v1108_v21 = vpop.xlane.xlu1 %1107  ;;  %v1114_v57 = vsub.f32 %v6003_v48, %v1100_v34 }
 0x3cd   :  { %v1112_v36 = vmul.f32 0.00390625, %v1108_v21 }
 0x3cf   :  { %v1120_v41 = vsub.f32 %v1112_v36, %v1118_v39  ;;  %v5145_v60 = vpop.eup %5144 }
 0x3d0   :  { %v1111_v29 = vpop.xlane.xlu1 %1110  ;;  %v1163_v3 = vmul.f32 %v5145_v60, %v1151_v62  ;;  %v1162_v12 = vmul.f32 %v5145_v60, %v1150_v4 }
 0x3d1   :  { %v1113_v35 = vmul.f32 0.00390625, %v1111_v29  ;;  %v1122_v45 = vadd.f32 1e-05, %v1120_v41 }
 0x3d2   :  { %v1219_v27 = vmul.f32 0.2, %v1163_v3  ;;  %vm1215_vm4 = vcmp.ge.f32.partialorder %v1163_v3, 0.0  ;;  %vm1214_vm6 = vcmp.ge.f32.partialorder %v1162_v12, 0.0  ;;  %v1218_v39 = vmul.f32 0.2, %v1162_v12 }
 0x3d3   :  { %v1121_v40 = vsub.f32 %v1113_v35, %v1119_v37 }
 0x3d4   :  { %v6237_v42 = vpop.permute.xlu1 %1252  ;;  %v1223_v38 = vsel %vm1215_vm4, %v1163_v3, %v1219_v27 }
 0x3d5   :  { %v1123_v44 = vadd.f32 1e-05, %v1121_v40 }
 0x3d7   :  { %5146 = vrsqrt.f32 %v1123_v44 }
 0x3d8   :  { %5148 = vrsqrt.f32 %v1122_v45 }
 0x3e1   :  { %v5147_v5 = vpop.eup %5146 }
 0x3e2   :  { %v5149_v11 = vpop.eup %5148  ;;  %v1129_v20 = vmul.f32 %v5147_v5, %v1117_v16  ;;  %v1128_v23 = vmul.f32 %v5147_v5, %v1116_v28  ;;  %v1251_v5 = vld [vmem:[#allocation8 + $0x8] sm:$0xff] }
 0x3e3   :  { %v1127_v32 = vmul.f32 %v5149_v11, %v1115_v14  ;;  %v1126_v40 = vmul.f32 %v5149_v11, %v1114_v57 }
 0x3e4   :  { %v1209_v45 = vmul.f32 0.2, %v1129_v20  ;;  %vm1205_vm7 = vcmp.ge.f32.partialorder %v1129_v20, 0.0  ;;  %vm1204_vm11 = vcmp.ge.f32.partialorder %v1128_v23, 0.0 }
 0x3e5   :  { %v1207_v30 = vmul.f32 0.2, %v1127_v32  ;;  %vm1203_vm10 = vcmp.ge.f32.partialorder %v1127_v32, 0.0  ;;  %v1206_v62 = vmul.f32 0.2, %v1126_v40  ;;  %vm1202_vm12 = vcmp.ge.f32.partialorder %v1126_v40, 0.0 }
 0x3e6   :  { %v1213_v60 = vsel %vm1205_vm7, %v1129_v20, %v1209_v45  ;;  %v4659_v14 = vpack.c.bf16 %v1128_v23, %v1126_v40 }
 0x3f2   :  { %v1183_v63 = vpop.xlane.xlu0 %1182 }
 0x3f3   :  { %v1185_v7 = vmul.f32 0.00390625, %v1183_v63 }
 0x3f6   :  { %v1255_v31 = vpop.permute.xlu0 %1254 }
 0x405   :  { %v1147_v46 = vpop.xlane.xlu1 %1146 }
 0x406   :  { %v1149_v49 = vmul.f32 0.00390625, %v1147_v46  ;;  %v1208_v46 = vmul.f32 0.2, %v1128_v23 }
 0x408   :  { %v1157_v51 = vsub.f32 %v1149_v49, %v1155_v47  ;;  %v1250_v47 = vld [vmem:[#allocation8] sm:$0xff]  ;;  %v1212_v11 = vsel %vm1204_vm11, %v1128_v23, %v1208_v46  ;;  %v1238_v23 = vld [vmem:[#allocation7] sm:$0xff] }
 0x409   :  { %v1168_v56 = vpop.xlane.xlu1 %1167  ;;  %v1258_v4 = vadd.f32 %v6237_v42, %v1250_v47  ;;  %v1536_v47 = vld [vmem:[#allocation11] sm:$0xff] }
 0x40a   :  { %v1159_v59 = vadd.f32 1e-05, %v1157_v51  ;;  %v6240_v1 = vmul.f32 0.00390625, %v1168_v56  ;;  %v6259_v51 = vpop.permute.xlu0 %1429  ;;  %v4657_v56 = vpack.c.bf16 %v1129_v20, %v1127_v32 }
 0x40c   :  { %5150 = vrsqrt.f32 %v1159_v59  ;;  %v1190_v21 = vmul.f32 %v6240_v1, %v6240_v1 }
 0x40d   :  { %v1171_v0 = vpop.xlane.xlu1 %1170 }
 0x40e   :  { %v6242_v2 = vmul.f32 0.00390625, %v1171_v0  ;;  %v1222_v0 = vsel %vm1214_vm6, %v1162_v12, %v1218_v39  ;;  %v1921_v27 = vpop.permute.xlu0 %1920 }
 0x410   :  { %v1191_v9 = vmul.f32 %v6242_v2, %v6242_v2  ;;  %v1189_v16 = vsub.f32 %v6172_v61, %v6242_v2  ;;  %v1187_v61 = vsub.f32 %v6162_v54, %v6240_v1 }
 0x411   :  { %v1180_v17 = vpop.xlane.xlu1 %1179 }
 0x412   :  { %v1193_v18 = vsub.f32 %v1185_v7, %v1191_v9  ;;  %v1184_v22 = vmul.f32 0.00390625, %v1180_v17  ;;  %v1211_v9 = vsel %vm1203_vm10, %v1127_v32, %v1207_v30  ;;  %v1210_v17 = vsel %vm1202_vm12, %v1126_v40, %v1206_v62  ;;  %v1427_v30 = vld [vmem:[#allocation10] sm:$0xff]  ;;  %v5059_v62 = vld [vmem:[%s7132_s10 + $0x2c] ss:$16 sps:$4 sm:$0xff]  }
 0x413   :  { %v6271_v28 = vpack.c.bf16 %v1213_v60, %v1211_v9  ;;  %v1435_v46 = vadd.f32 %v6259_v51, %v1427_v30  ;;  %v1706_v51 = vld [vmem:[%s7138_s16] sm:$0xff]  ;;  %v5053_v60 = vld [vmem:[%s7132_s10 + $0xc] ss:$16 sps:$4 sm:$0xff]   ;;  %v5075_v9 = vld [vmem:[%s7132_s10 + $0x88] ss:$16 sps:$4 sm:$0xff]  }
 0x414   :  { %v1195_v25 = vadd.f32 1e-05, %v1193_v18  ;;  %v1192_v29 = vsub.f32 %v1184_v22, %v1190_v21  ;;  %v1259_v21 = vadd.f32 %v1255_v31, %v1251_v5  ;;  %v6282_v22 = vpack.c.bf16 %v1212_v11, %v1210_v17  ;;  %v5069_v5 = vld [vmem:[%s7132_s10 + $0x68] ss:$16 sps:$4 sm:$0xff]   ;;  %v5083_v11 = vld [vmem:[%s7132_s10 + $0xac] ss:$16 sps:$4 sm:$0xff]  }
 0x415   :  { %v6255_v35 = vpop.permute.xlu1 %1242  ;;  %v5101_v17 = vld [vmem:[%s7132_s10 + $0x10c] ss:$16 sps:$4 sm:$0xff]  }
 0x416   :  { %v5151_v36 = vpop.eup %5150  ;;  %5152 = vrsqrt.f32 %v1195_v25  ;;  %v1194_v37 = vadd.f32 1e-05, %v1192_v29 }
 0x417   :  { %v1164_v41 = vmul.f32 %v5151_v36, %v1152_v50  ;;  %v1165_v44 = vmul.f32 %v5151_v36, %v1153_v55  ;;  %v1239_v36 = vld [vmem:[#allocation7 + $0x8] sm:$0xff] }
 0x418   :  { %5154 = vrsqrt.f32 %v1194_v37 }
 0x419   :  { %v6257_v33 = vpop.permute.xlu1 %1244  ;;  %v4653_v48 = vpack.c.bf16 %v1165_v44, %v1163_v3  ;;  %v4655_v34 = vpack.c.bf16 %v1164_v41, %v1162_v12  ;;  %vm1217_vm8 = vcmp.ge.f32.partialorder %v1165_v44, 0.0  ;;  %v1221_v43 = vmul.f32 0.2, %v1165_v44 }
 0x41a   :  { %vm1216_vm9 = vcmp.ge.f32.partialorder %v1164_v41, 0.0  ;;  %v1220_v49 = vmul.f32 0.2, %v1164_v41  ;;  %v1188_v12 = vsub.f32 %v6166_v58, %v6242_v2  ;;  %v1186_v58 = vsub.f32 %v6160_v53, %v6240_v1 }
 0x41b   :  { %4654 = vmatprep.subr.bf16.mxu1 %v4653_v48  ;;  %v1225_v59 = vsel %vm1217_vm8, %v1165_v44, %v1221_v43  ;;  %v1248_v53 = vadd.f32 %v6255_v35, %v1238_v23  ;;  %v1249_v44 = vadd.f32 %v6257_v33, %v1239_v36  ;;  %v1428_v33 = vld [vmem:[#allocation10 + $0x8] sm:$0xff] }
 0x41c   :  { %4656 = vmatpush1.bf16.msra.mxu1 %v4655_v34  ;;  %v6262_v63 = vpack.c.bf16 %v1225_v59, %v1223_v38  ;;  %v1224_v3 = vsel %vm1216_vm9, %v1164_v41, %v1220_v49  ;;  %v6333_v43 = vld [vmem:[%s7137_s15 + $0x8] sm:$0xff]  ;;  %v1537_v49 = vld [vmem:[#allocation11 + $0x8] sm:$0xff] }
 0x41d   :  { %4658 = vmatprep.subr.bf16.mxu1 %v4657_v56  ;;  %v6266_v7 = vpack.c.bf16 %v1224_v3, %v1222_v0  ;;  %v6277_v42 = vpop.permute.xlu1 %1431  ;;  %v1707_v56 = vld [vmem:[%s7138_s16 + $0x8] sm:$0xff] }
 0x41e   :  { %4682 = vmatprep.subr.bf16.mxu0 %v6262_v63  ;;  %v1436_v48 = vadd.f32 %v6277_v42, %v1428_v33  ;;  %v5051_v59 = vld [vmem:[%s7132_s10 + $0x8] ss:$16 sps:$4 sm:$0xff]   ;;  %v5065_v0 = vld [vmem:[%s7132_s10 + $0x4c] ss:$16 sps:$4 sm:$0xff]  }
 0x41f   :  { %4421 = vmatmul.mubr.msk.f32.vlgmr.msra.gmra.mrb[12].mxu1 %vm1260_vm5, %v1258_v4  ;;  %4684 = vmatpush1.bf16.msra.mxu0 %v6266_v7  ;;  %v5063_v3 = vld [vmem:[%s7132_s10 + $0x48] ss:$16 sps:$4 sm:$0xff]   ;;  %v5071_v4 = vld [vmem:[%s7132_s10 + $0x6c] ss:$16 sps:$4 sm:$0xff]  }
 0x420   :  { %v5153_v18 = vpop.eup %5152  ;;  %4660 = vmatpush1.bf16.msra.mxu1 %v4659_v14  ;;  %4686 = vmatprep.subr.bf16.mxu0 %v6271_v28  ;;  %v5081_v14 = vld [vmem:[%s7132_s10 + $0xa8] ss:$16 sps:$4 sm:$0xff]  }
 0x421   :  { %v1200_v2 = vmul.f32 %v5153_v18, %v1188_v12  ;;  %v1201_v20 = vmul.f32 %v5153_v18, %v1189_v16  ;;  %1337 = vmatprep.mubr.f32.mxu1 %v5375_v15  ;;  %v1923_v1 = vpop.permute.xlu1 %1922  ;;  %v5087_v12 = vld [vmem:[%s7132_s10 + $0xc8] ss:$16 sps:$4 sm:$0xff]   ;;  %v5095_v16 = vld [vmem:[%s7132_s10 + $0xec] ss:$16 sps:$4 sm:$0xff]  }
 0x422   :  { %v5155_v25 = vpop.eup %5154  ;;  %4435 = vmatmul.mubr.msk.f32.vlgmr.msra.gmra.mrb[6].mxu0 %vm1260_vm5, %v1921_v27  ;;  %v5093_v42 = vld [vmem:[%s7132_s10 + $0xe8] ss:$16 sps:$4 sm:$0xff]   ;;  %v5113_v27 = vld [vmem:[%s7132_s10 + $0x14c] ss:$16 sps:$4 sm:$0xff]  }
 0x423   :  { %v1198_v29 = vmul.f32 %v5155_v25, %v1186_v58  ;;  %4422 = vmatmul.mubr.msk.f32.gmra.mrb[14].mxu1 %vm1260_vm5, %v1259_v21  ;;  %4688 = vmatpush1.bf16.msra.mxu0 %v6282_v22  ;;  %v1199_v32 = vmul.f32 %v5155_v25, %v1187_v61  ;;  %v1233_v50 = vmul.f32 0.2, %v1201_v20  ;;  %vm1229_vm13 = vcmp.ge.f32.partialorder %v1201_v20, 0.0  ;;  %v5099_v18 = vld [vmem:[%s7132_s10 + $0x108] ss:$16 sps:$4 sm:$0xff]  }
 0x424   :  { %1998 = vmatprep.mubr.f32.mxu0 %v5375_v15  ;;  %1414 = vmatprep.mubr.f32.mxu1 %v5375_v15  ;;  %vm1228_vm14 = vcmp.ge.f32.partialorder %v1200_v2, 0.0  ;;  %v1232_v54 = vmul.f32 0.2, %v1200_v2  ;;  %v5107_v21 = vld [vmem:[%s7132_s10 + $0x12c] ss:$16 sps:$4 sm:$0xff]  }
 0x425   :  { %v4661_v55 = vpack.c.bf16 %v1201_v20, %v1199_v32  ;;  %v4663_v57 = vpack.c.bf16 %v1200_v2, %v1198_v29  ;;  %vm1227_vm15 = vcmp.ge.f32.partialorder %v1199_v32, 0.0  ;;  %v1231_v31 = vmul.f32 0.2, %v1199_v32  ;;  %v2089_v34 = vpop.permute.xlu1 %2088  ;;  %v5111_v58 = vld [vmem:[%s7132_s10 + $0x148] ss:$16 sps:$4 sm:$0xff]  }
 0x426   :  { %4436 = vmatmul.mubr.msk.f32.gmra.mrb[12].mxu0 %vm1260_vm5, %v1923_v1  ;;  %vm1226_vm0 = vcmp.ge.f32.partialorder %v1198_v29, 0.0  ;;  %v1230_v37 = vmul.f32 0.2, %v1198_v29  ;;  %v1237_v38 = vsel %vm1229_vm13, %v1201_v20, %v1233_v50  ;;  %v1236_v41 = vsel %vm1228_vm14, %v1200_v2, %v1232_v54  ;;  %v5119_v61 = vld [vmem:[%s7132_s10 + $0x16c] ss:$16 sps:$4 sm:$0xff]  }
 0x427   :  { %4423 = vmatmul.mubr.msk.f32.vlgmr.msra.gmra.mrb[12].mxu1 %vm1260_vm5, %v1248_v53  ;;  %4662 = vmatprep.subr.bf16.mxu1 %v4661_v55  ;;  %v1235_v35 = vsel %vm1227_vm15, %v1199_v32, %v1231_v31  ;;  %v5117_v2 = vld [vmem:[%s7132_s10 + $0x168] ss:$16 sps:$4 sm:$0xff]   ;;  %v5125_v20 = vld [vmem:[%s7132_s10 + $0x18c] ss:$16 sps:$4 sm:$0xff]  }
 0x428   :  { %4664 = vmatpush1.bf16.msra.mxu1 %v4663_v57  ;;  %2073 = vmatprep.mubr.f32.mxu0 %v5375_v15  ;;  %v4673_v39 = vpack.c.bf16 %v1237_v38, %v1235_v35  ;;  %v1234_v40 = vsel %vm1226_vm0, %v1198_v29, %v1230_v37  ;;  %v5123_v23 = vld [vmem:[%s7132_s10 + $0x188] ss:$16 sps:$4 sm:$0xff]  }
 0x429   :  { %4666 = vmatprep.subr.bf16.mxu1 %v6262_v63  ;;  %1420 = vmatprep.mubr.f32.mxu1 %v5375_v15  ;;  %v4675_v45 = vpack.c.bf16 %v1236_v41, %v1234_v40  ;;  %v5057_v63 = vld [vmem:[%s7132_s10 + $0x28] ss:$16 sps:$4 sm:$0xff]   ;;  %v1805_v32 = vpop.permute.xlu1 %1804 }
 0x42a   :  { %4437 = vmatmul.mubr.msk.f32.vlgmr.msra.gmra.mrb[6].mxu0 %vm1260_vm5, %v6156_v52  ;;  %4690 = vmatprep.subr.bf16.mxu0 %v4673_v39  ;;  %v2087_v52 = vpop.permute.xlu0 %2086 }
 0x42b   :  { %4424 = vmatmul.mubr.msk.f32.gmra.mrb[14].mxu1 %vm1260_vm5, %v1249_v44  ;;  %4692 = vmatpush1.bf16.msra.mxu0 %v4675_v45 }
 0x42c   :  { %2079 = vmatprep.mubr.f32.mxu0 %v5375_v15  ;;  %1507 = vmatprep.mubr.f32.mxu1 %v5375_v15 }
 0x42d   :  { %2742 = vmatprep.subr.bf16.mxu0 %v5053_v60  ;;  %v2181_v37 = vpop.permute.xlu1 %2180 }
 0x42e   :  { %4438 = vmatmul.mubr.msk.f32.gmra.mrb[12].mxu0 %vm1260_vm5, %v6186_v6  ;;  %v6323_v6 = vld [vmem:[%s7137_s15] sm:$0xff]  ;;  %v1800_v25 = vpop.permute.xlu0 %1799 }
 0x42f   :  { %4425 = vmatmul.mubr.msk.f32.vlgmr.msra.gmra.mrb[12].mxu1 %vm1260_vm5, %v1435_v46  ;;  %2158 = vmatprep.mubr.f32.mxu0 %v5375_v15 }
 0x430   :  { %4668 = vmatpush1.bf16.msra.mxu1 %v6266_v7  ;;  %1513 = vmatprep.mubr.f32.mxu1 %v5375_v15  ;;  %v5077_v7 = vld [vmem:[%s7132_s10 + $0x8c] ss:$16 sps:$4 sm:$0xff]  }
 0x431   :  { %4670 = vmatprep.subr.bf16.mxu1 %v6271_v28  ;;  %v5089_v28 = vld [vmem:[%s7132_s10 + $0xcc] ss:$16 sps:$4 sm:$0xff]  }
 0x432   :  { %4439 = vmatmul.mubr.msk.f32.vlgmr.msra.gmra.mrb[6].mxu0 %vm1260_vm5, %v2087_v52  ;;  %v2177_v53 = vpop.permute.xlu0 %2176 }
 0x433   :  { %4426 = vmatmul.mubr.msk.f32.gmra.mrb[14].mxu1 %vm1260_vm5, %v1436_v48  ;;  %2164 = vmatprep.mubr.f32.mxu0 %v5375_v15 }
 0x434   :  { %1610 = vmatprep.mubr.f32.mxu1 %v5375_v15  ;;  %2743 = vmatpush1.bf16.msra.mxu0 %v5051_v59 }
 0x435   :  { %2744 = vmatprep.subr.bf16.mxu0 %v5059_v62 }
 0x436   :  { %4440 = vmatmul.mubr.msk.f32.gmra.mrb[12].mxu0 %vm1260_vm5, %v2089_v34 }
 0x437   :  { %4427 = vmatmul.mubr.msk.f32.vlgmr.msra.gmra.mrb[16].mxu1 %vm1260_vm5, %v6323_v6 }
 0x438   :  { %4672 = vmatpush1.bf16.msra.mxu1 %v6282_v22  ;;  %1616 = vmatprep.mubr.f32.mxu1 %v5375_v15  ;;  %v5105_v22 = vld [vmem:[%s7132_s10 + $0x128] ss:$16 sps:$4 sm:$0xff]  }
 0x439   :  { %4674 = vmatprep.subr.bf16.mxu1 %v4673_v39  ;;  %2745 = vmatpush1.bf16.msra.mxu0 %v5057_v63 }
 0x43a   :  { %2746 = vmatprep.subr.bf16.mxu0 %v5065_v0 }
 0x43b   :  { %4428 = vmatmul.mubr.msk.f32.gmra.mrb[18].mxu1 %vm1260_vm5, %v6333_v43 }
 0x43c   :  { %1693 = vmatprep.mubr.f32.mxu1 %v5375_v15 }
 0x43d   :  { %2747 = vmatpush1.bf16.msra.mxu0 %v5063_v3 }
 0x43e   :  { %2748 = vmatprep.subr.bf16.mxu0 %v5071_v4 }
 0x43f   :  { %4429 = vmatmul.mubr.msk.f32.vlgmr.msra.gmra.mrb[16].mxu1 %vm1260_vm5, %v1536_v47 }
 0x440   :  { %4676 = vmatpush1.bf16.msra.mxu1 %v4675_v45  ;;  %1699 = vmatprep.mubr.f32.mxu1 %v5375_v15 }
 0x441   :  { %2749 = vmatpush1.bf16.msra.mxu0 %v5069_v5 }
 0x442   :  { %2750 = vmatprep.subr.bf16.mxu0 %v5077_v7 }
 0x443   :  { %4430 = vmatmul.mubr.msk.f32.gmra.mrb[18].mxu1 %vm1260_vm5, %v1537_v49 }
 0x444   :  { %1778 = vmatprep.mubr.f32.mxu1 %v5375_v15 }
 0x445   :  { %2751 = vmatpush1.bf16.msra.mxu0 %v5075_v9 }
 0x446   :  { %2752 = vmatprep.subr.bf16.mxu0 %v5083_v11 }
 0x447   :  { %4431 = vmatmul.mubr.msk.f32.vlgmr.msra.gmra.mrb[16].mxu1 %vm1260_vm5, %v1706_v51 }
 0x448   :  { %1784 = vmatprep.mubr.f32.mxu1 %v5375_v15 }
 0x449   :  { %2753 = vmatpush1.bf16.msra.mxu0 %v5081_v14 }
 0x44a   :  { %2754 = vmatprep.subr.bf16.mxu0 %v5089_v28 }
 0x44b   :  { %4432 = vmatmul.mubr.msk.f32.gmra.mrb[18].mxu1 %vm1260_vm5, %v1707_v56 }
 0x44c   :  { %1907 = vmatprep.mubr.f32.mxu1 %v5375_v15 }
 0x44d   :  { %2755 = vmatpush1.bf16.msra.mxu0 %v5087_v12 }
 0x44e   :  { %2756 = vmatprep.subr.bf16.mxu0 %v5095_v16 }
 0x451   :  { %2757 = vmatpush1.bf16.msra.mxu0 %v5093_v42  ;;  %v1811_v42 = vld [vmem:[%s7139_s17] sm:$0xff] }
 0x452   :  { %2758 = vmatprep.subr.bf16.mxu0 %v5101_v17  ;;  %v5050_v17 = vld [vmem:[%s7132_s10 + $0x4] ss:$16 sps:$4 sm:$0xff]  }
 0x455   :  { %2759 = vmatpush1.bf16.msra.mxu0 %v5099_v18  ;;  %v1812_v18 = vld [vmem:[%s7139_s17 + $0x8] sm:$0xff] }
 0x456   :  { %2760 = vmatprep.subr.bf16.mxu0 %v5107_v21  ;;  %v5048_v21 = vld [vmem:[%s7132_s10] ss:$16 sps:$4 sm:$0xff]  }
 0x459   :  { %2761 = vmatpush1.bf16.msra.mxu0 %v5105_v22  ;;  %v5056_v22 = vld [vmem:[%s7132_s10 + $0x24] ss:$16 sps:$4 sm:$0xff]  }
 0x45a   :  { %2762 = vmatprep.subr.bf16.mxu0 %v5113_v27  ;;  %v2208_v27 = vpop.permute.xlu1 %2207 }
 0x45d   :  { %2763 = vmatpush1.bf16.msra.mxu0 %v5111_v58  ;;  %v5054_v58 = vld [vmem:[%s7132_s10 + $0x20] ss:$16 sps:$4 sm:$0xff]  }
 0x45e   :  { %2764 = vmatprep.subr.bf16.mxu0 %v5119_v61  ;;  %v5062_v61 = vld [vmem:[%s7132_s10 + $0x44] ss:$16 sps:$4 sm:$0xff]  }
 0x461   :  { %2765 = vmatpush1.bf16.msra.mxu0 %v5117_v2  ;;  %v2210_v2 = vpop.permute.xlu0 %2209 }
 0x462   :  { %2766 = vmatprep.subr.bf16.mxu0 %v5125_v20  ;;  %v5060_v20 = vld [vmem:[%s7132_s10 + $0x40] ss:$16 sps:$4 sm:$0xff]  }
 0x465   :  { %2767 = vmatpush1.bf16.msra.mxu0 %v5123_v23  ;;  %v5068_v23 = vld [vmem:[%s7132_s10 + $0x64] ss:$16 sps:$4 sm:$0xff]  }
 0x502   :  { %v6430_v29 = vpop.f32.mrb[12].mxu1 }
 0x503   :  { %v6432_v50 = vpop.f32.mrb[13].mxu1 }
 0x505   :  { %v2160_v54 = vpop.f32.mrb[6].mxu0 }
 0x506   :  { %v2183_v1 = vadd.f32 %v2177_v53, %v2160_v54  ;;  %v6434_v55 = vpop.f32.mrb[14].mxu1  ;;  %v2162_v57 = vpop.f32.mrb[7].mxu0  ;;  %v5080_v54 = vld [vmem:[%s7132_s10 + $0xa4] ss:$16 sps:$4 sm:$0xff]  }
 0x507   :  { %v2184_v31 = vadd.f32 %v2177_v53, %v2162_v57  ;;  %v6436_v36 = vpop.f32.mrb[15].mxu1  ;;  %v5072_v53 = vld [vmem:[%s7132_s10 + $0x80] ss:$16 sps:$4 sm:$0xff]   ;;  %v5086_v57 = vld [vmem:[%s7132_s10 + $0xc4] ss:$16 sps:$4 sm:$0xff]  }
 0x508   :  { %v2191_v38 = vmul.f32 0.2, %v2183_v1  ;;  %vm2187_vm1 = vcmp.ge.f32.partialorder %v2183_v1, 0.0 }
 0x509   :  { %v2166_v35 = vpop.f32.mrb[12].mxu0  ;;  %v2192_v41 = vmul.f32 0.2, %v2184_v31  ;;  %vm2188_vm2 = vcmp.ge.f32.partialorder %v2184_v31, 0.0 }
 0x50a   :  { %v2185_v39 = vadd.f32 %v2181_v37, %v2166_v35  ;;  %v2168_v40 = vpop.f32.mrb[13].mxu0  ;;  %v2195_v46 = vsel %vm2187_vm1, %v2183_v1, %v2191_v38  ;;  %v5078_v1 = vld [vmem:[%s7132_s10 + $0xa0] ss:$16 sps:$4 sm:$0xff]   ;;  %v5098_v38 = vld [vmem:[%s7132_s10 + $0x104] ss:$16 sps:$4 sm:$0xff]  }
 0x50b   :  { %v2186_v44 = vadd.f32 %v2181_v37, %v2168_v40  ;;  %v2196_v48 = vsel %vm2188_vm2, %v2184_v31, %v2192_v41  ;;  %v5084_v31 = vld [vmem:[%s7132_s10 + $0xc0] ss:$16 sps:$4 sm:$0xff]   ;;  %v5092_v37 = vld [vmem:[%s7132_s10 + $0xe4] ss:$16 sps:$4 sm:$0xff]  }
 0x50c   :  { %vm2189_vm3 = vcmp.ge.f32.partialorder %v2185_v39, 0.0  ;;  %v2193_v45 = vmul.f32 0.2, %v2185_v39  ;;  %v5090_v35 = vld [vmem:[%s7132_s10 + $0xe0] ss:$16 sps:$4 sm:$0xff]  }
 0x50d   :  { %vm2190_vm4 = vcmp.ge.f32.partialorder %v2186_v44, 0.0  ;;  %v2194_v30 = vmul.f32 0.2, %v2186_v44  ;;  %v5104_v40 = vld [vmem:[%s7132_s10 + $0x124] ss:$16 sps:$4 sm:$0xff]  }
 0x50e   :  { %v2197_v33 = vsel %vm2189_vm3, %v2185_v39, %v2193_v45  ;;  %v5096_v39 = vld [vmem:[%s7132_s10 + $0x100] ss:$16 sps:$4 sm:$0xff]  }
 0x50f   :  { %v4695_v52 = vpack.c.bf16 %v2197_v33, %v2195_v46  ;;  %v2198_v34 = vsel %vm2190_vm4, %v2186_v44, %v2194_v30  ;;  %v5102_v41 = vld [vmem:[%s7132_s10 + $0x120] ss:$16 sps:$4 sm:$0xff]   ;;  %v5110_v44 = vld [vmem:[%s7132_s10 + $0x144] ss:$16 sps:$4 sm:$0xff]  }
 0x510   :  { %v4693_v47 = vpack.c.bf16 %v2198_v34, %v2196_v48  ;;  %v5108_v45 = vld [vmem:[%s7132_s10 + $0x140] ss:$16 sps:$4 sm:$0xff]   ;;  %v5116_v30 = vld [vmem:[%s7132_s10 + $0x164] ss:$16 sps:$4 sm:$0xff]   ;;  %v5131_v34 = vld [vmem:[%s7132_s10 + $0x1ac] ss:$16 sps:$4 sm:$0xff]  }
 0x511   :  { %v5114_v46 = vld [vmem:[%s7132_s10 + $0x160] ss:$16 sps:$4 sm:$0xff]   ;;  %v5122_v33 = vld [vmem:[%s7132_s10 + $0x184] ss:$16 sps:$4 sm:$0xff]   ;;  %2768 = vmatprep.subr.bf16.mxu0 %v5131_v34 }
 0x512   :  { %v5128_v48 = vld [vmem:[%s7132_s10 + $0x1a4] ss:$16 sps:$4 sm:$0xff]  }
 0x51a   :  { %v1780_v49 = vpop.f32.mrb[16].mxu1 }
 0x51b   :  { %v1807_v51 = vadd.f32 %v1800_v25, %v1780_v49  ;;  %v1782_v56 = vpop.f32.mrb[17].mxu1  ;;  %v5129_v49 = vld [vmem:[%s7132_s10 + $0x1a8] ss:$16 sps:$4 sm:$0xff]  }
 0x51c   :  { %v1808_v59 = vadd.f32 %v1800_v25, %v1782_v56  ;;  %v5066_v25 = vld [vmem:[%s7132_s10 + $0x60] ss:$16 sps:$4 sm:$0xff]   ;;  %2769 = vmatpush1.bf16.msra.mxu0 %v5129_v49  ;;  %v5137_v56 = vld [vmem:[%s7132_s10 + $0x1cc] ss:$16 sps:$4 sm:$0xff]  }
 0x51d   :  { %v1817_v62 = vmul.f32 0.2, %v1807_v51  ;;  %vm1813_vm6 = vcmp.ge.f32.partialorder %v1807_v51, 0.0  ;;  %2770 = vmatprep.subr.bf16.mxu0 %v5137_v56 }
 0x51e   :  { %v1786_v60 = vpop.f32.mrb[18].mxu1  ;;  %v1818_v3 = vmul.f32 0.2, %v1808_v59  ;;  %vm1814_vm7 = vcmp.ge.f32.partialorder %v1808_v59, 0.0 }
 0x51f   :  { %v1809_v63 = vadd.f32 %v1805_v32, %v1786_v60  ;;  %v1788_v0 = vpop.f32.mrb[19].mxu1  ;;  %v1821_v9 = vsel %vm1813_vm6, %v1807_v51, %v1817_v62  ;;  %v5134_v51 = vld [vmem:[%s7132_s10 + $0x1c4] ss:$16 sps:$4 sm:$0xff]   ;;  %v5135_v60 = vld [vmem:[%s7132_s10 + $0x1c8] ss:$16 sps:$4 sm:$0xff]  }
 0x520   :  { %v1810_v4 = vadd.f32 %v1805_v32, %v1788_v0  ;;  %v1822_v28 = vsel %vm1814_vm7, %v1808_v59, %v1818_v3  ;;  %v5074_v32 = vld [vmem:[%s7132_s10 + $0x84] ss:$16 sps:$4 sm:$0xff]   ;;  %v5132_v59 = vld [vmem:[%s7132_s10 + $0x1c0] ss:$16 sps:$4 sm:$0xff]   ;;  %2771 = vmatpush1.bf16.msra.mxu0 %v5135_v60  ;;  %v5141_v3 = vld [vmem:[%s7132_s10 + $0x1e8] ss:$16 sps:$4 sm:$0xff]  }
 0x521   :  { %vm1815_vm8 = vcmp.ge.f32.partialorder %v1809_v63, 0.0  ;;  %v1819_v5 = vmul.f32 0.2, %v1809_v63  ;;  %v5140_v62 = vld [vmem:[%s7132_s10 + $0x1e4] ss:$16 sps:$4 sm:$0xff]  }
 0x522   :  { %vm1816_vm9 = vcmp.ge.f32.partialorder %v1810_v4, 0.0  ;;  %v1820_v7 = vmul.f32 0.2, %v1810_v4  ;;  %v5138_v0 = vld [vmem:[%s7132_s10 + $0x1e0] ss:$16 sps:$4 sm:$0xff]  }
 0x523   :  { %v1823_v11 = vsel %vm1815_vm8, %v1809_v63, %v1819_v5  ;;  %v5143_v63 = vld [vmem:[%s7132_s10 + $0x1ec] ss:$16 sps:$4 sm:$0xff]  }
 0x524   :  { %v4679_v14 = vpack.c.bf16 %v1823_v11, %v1821_v9  ;;  %v1824_v12 = vsel %vm1816_vm9, %v1810_v4, %v1820_v7  ;;  %2772 = vmatprep.subr.bf16.mxu0 %v5143_v63  ;;  %v1830_v4 = vpop.permute.xlu1 %1829  ;;  %v1835_v7 = vpop.permute.xlu0 %1834 }
 0x525   :  { %v4677_v16 = vpack.c.bf16 %v1824_v12, %v1822_v28  ;;  %2773 = vmatpush1.bf16.msra.mxu0 %v5141_v3 }
 0x527   :  { %4678 = vmatprep.subr.bf16.mxu1 %v4677_v16 }
 0x528   :  { %4680 = vmatpush1.bf16.msra.mxu1 %v4679_v14  ;;  %v2201_v5 = vpop.permute.xlu1 %2200  ;;  %v1526_v11 = vpop.permute.xlu0 %1525 }
 0x529   :  { %4694 = vmatprep.subr.bf16.mxu1 %v4693_v47  ;;  %v5126_v47 = vld [vmem:[%s7132_s10 + $0x1a0] ss:$16 sps:$4 sm:$0xff]   ;;  %v4841_v14 = vadd.f32 %v2201_v5, %v1830_v4  ;;  %v1532_v28 = vadd.f32 %v1526_v11, %v6430_v29  ;;  %v1533_v12 = vadd.f32 %v1526_v11, %v6432_v50  ;;  %v5169_v29 = vld [vmem:[%s7146_s24 + $0x8] sm:$0xff] }
 0x52b   :  { %4433 = vmatmul.mubr.msk.f32.vlgmr.msra.gmra.mrb[20].mxu1 %vm1260_vm5, %v1811_v42 }
 0x52c   :  { %4696 = vmatpush1.bf16.msra.mxu1 %v4695_v52  ;;  %1913 = vmatprep.mubr.f32.mxu1 %v5375_v15  ;;  %v5120_v52 = vld [vmem:[%s7132_s10 + $0x180] ss:$16 sps:$4 sm:$0xff]   ;;  %v2205_v9 = vpop.permute.xlu1 %2204 }
 0x52d   :  { %2699 = vmatprep.subr.bf16.mxu1 %v5050_v17 }
 0x52f   :  { %4434 = vmatmul.mubr.msk.f32.gmra.mrb[22].mxu1 %vm1260_vm5, %v1812_v18 }
 0x530   :  { %2279 = vmatprep.mubr.f32.mxu1 %v5375_v15  ;;  %v1530_v18 = vpop.permute.xlu1 %1529 }
 0x531   :  { %v1535_v50 = vadd.f32 %v1530_v18, %v6436_v36 }
 0x533   :  { %4441 = vmatmul.mubr.msk.f32.vlgmr.msra.gmra.mrb[20].mxu1 %vm1260_vm5, %v2208_v27  ;;  %v5168_v27 = vld [vmem:[%s7146_s24] sm:$0xff] }
 0x534   :  { %2285 = vmatprep.mubr.f32.mxu1 %v5375_v15  ;;  %2700 = vmatpush1.bf16.msra.mxu1 %v5048_v21 }
 0x535   :  { %2701 = vmatprep.subr.bf16.mxu1 %v5056_v22  ;;  %v4845_v22 = vadd.f32 %v2205_v9, %v1835_v7 }
 0x537   :  { %4442 = vmatmul.mubr.msk.f32.gmra.mrb[22].mxu1 %vm1260_vm5, %v2210_v2 }
 0x538   :  { %2702 = vmatpush1.bf16.msra.mxu1 %v5054_v58  ;;  %v2292_v58 = vadd.f32 %v5168_v27, %v1532_v28 }
 0x539   :  { %2703 = vmatprep.subr.bf16.mxu1 %v5062_v61  ;;  %v1534_v61 = vadd.f32 %v1530_v18, %v6434_v55  ;;  %v5170_v55 = vld [vmem:[%s7146_s24 + $0x10] sm:$0xff] }
 0x53c   :  { %2704 = vmatpush1.bf16.msra.mxu1 %v5060_v20  ;;  %v2293_v20 = vadd.f32 %v5169_v29, %v1533_v12  ;;  %v512_v29 = vld [vmem:[%s7178_s25 + $0x18] sm:$0xff] }
 0x53d   :  { %2705 = vmatprep.subr.bf16.mxu1 %v5068_v23 }
 0x540   :  { %2706 = vmatpush1.bf16.msra.mxu1 %v5066_v25 }
 0x541   :  { %2707 = vmatprep.subr.bf16.mxu1 %v5074_v32 }
 0x544   :  { %2708 = vmatpush1.bf16.msra.mxu1 %v5072_v53 }
 0x545   :  { %2709 = vmatprep.subr.bf16.mxu1 %v5080_v54 }
 0x548   :  { %2710 = vmatpush1.bf16.msra.mxu1 %v5078_v1 }
 0x549   :  { %2711 = vmatprep.subr.bf16.mxu1 %v5086_v57 }
 0x54c   :  { %2712 = vmatpush1.bf16.msra.mxu1 %v5084_v31  ;;  %v2294_v31 = vadd.f32 %v5170_v55, %v1534_v61 }
 0x54d   :  { %2713 = vmatprep.subr.bf16.mxu1 %v5092_v37  ;;  %v5171_v37 = vld [vmem:[%s7146_s24 + $0x18] sm:$0xff] }
 0x550   :  { %2714 = vmatpush1.bf16.msra.mxu1 %v5090_v35  ;;  %v2295_v35 = vadd.f32 %v5171_v37, %v1535_v50 }
 0x551   :  { %2715 = vmatprep.subr.bf16.mxu1 %v5098_v38 }
 0x554   :  { %2716 = vmatpush1.bf16.msra.mxu1 %v5096_v39 }
 0x555   :  { %2717 = vmatprep.subr.bf16.mxu1 %v5104_v40 }
 0x558   :  { %2718 = vmatpush1.bf16.msra.mxu1 %v5102_v41 }
 0x559   :  { %2719 = vmatprep.subr.bf16.mxu1 %v5110_v44 }
 0x55c   :  { %2720 = vmatpush1.bf16.msra.mxu1 %v5108_v45 }
 0x55d   :  { %2721 = vmatprep.subr.bf16.mxu1 %v5116_v30 }
 0x560   :  { %2722 = vmatpush1.bf16.msra.mxu1 %v5114_v46 }
 0x561   :  { %2723 = vmatprep.subr.bf16.mxu1 %v5122_v33 }
 0x564   :  { %2724 = vmatpush1.bf16.msra.mxu1 %v5120_v52 }
 0x565   :  { %2725 = vmatprep.subr.bf16.mxu1 %v5128_v48 }
 0x568   :  { %2726 = vmatpush1.bf16.msra.mxu1 %v5126_v47 }
 0x569   :  { %2727 = vmatprep.subr.bf16.mxu1 %v5134_v51 }
 0x56c   :  { %2728 = vmatpush1.bf16.msra.mxu1 %v5132_v59 }
 0x56d   :  { %2729 = vmatprep.subr.bf16.mxu1 %v5140_v62 }
 0x570   :  { %2730 = vmatpush1.bf16.msra.mxu1 %v5138_v0 }
 0x606   :  { %v2281_v16 = vpop.f32.mrb[20].mxu1 }
 0x607   :  { %v4842_v42 = vadd.f32 %v4841_v14, %v2281_v16  ;;  %v2283_v17 = vpop.f32.mrb[21].mxu1 }
 0x608   :  { %v4844_v21 = vadd.f32 %v4841_v14, %v2283_v17 }
 0x609   :  { %v2300_v2 = vmul.f32 0.1, %v4842_v42 }
 0x60a   :  { %v2301_v23 = vmul.f32 0.1, %v4844_v21  ;;  %v2287_v25 = vpop.f32.mrb[22].mxu1 }
 0x60b   :  { %v6575_v32 = vadd.f32 %v2300_v2, %v2292_v58  ;;  %v4846_v53 = vadd.f32 %v4845_v22, %v2287_v25  ;;  %v2289_v54 = vpop.f32.mrb[23].mxu1  ;;  %v431_v58 = vld [vmem:[%s7177_s8 + $0x18] sm:$0xff]  ;;  %v429_v2 = vld [vmem:[%s7177_s8 + $0x8] sm:$0xff] }
 0x60c   :  { %v6577_v1 = vadd.f32 %v2301_v23, %v2293_v20  ;;  %v4848_v57 = vadd.f32 %v4845_v22, %v2289_v54  ;;  %v507_v61 = vadd.f32 %v6116_v26, %v431_v58  ;;  %v501_v20 = vadd.f32 %v6114_v24, %v429_v2  ;;  %v510_v23 = vld [vmem:[%s7178_s25 + $0x8] sm:$0xff]  ;;  %v3485_v24 = vld [vmem:[%s7140_s18] sm:$0xff] }
 0x60d   :  { %4443 = vst [vmem:[%s7146_s24 + $0x20] sm:$0xff] %v6575_v32  ;;  %v2302_v36 = vmul.f32 0.1, %v4846_v53  ;;  %v2793_v18 = vmul.f32 %v6575_v32, %v6575_v32  ;;  %v3486_v25 = vld [vmem:[%s7140_s18 + $0x8] sm:$0xff] }
 0x60e   :  { %4444 = vst [vmem:[%s7146_s24 + $0x28] sm:$0xff] %v6577_v1  ;;  %v2303_v38 = vmul.f32 0.1, %v4848_v57  ;;  %v2785_v17 = vadd.f32 %v6577_v1, %v6575_v32  ;;  %v2794_v21 = vmul.f32 %v6577_v1, %v6577_v1  ;;  %v6674_v50 = vmul.f32 %v512_v29, %v507_v61  ;;  %v3516_v53 = vld [vmem:[%s7141_s19 + $0x8] sm:$0xff] }
 0x60f   :  { %v6593_v39 = vadd.f32 %v2302_v36, %v2294_v31  ;;  %v6681_v26 = vmul.f32 %v510_v23, %v501_v20 }
 0x610   :  { %v6595_v40 = vadd.f32 %v2303_v38, %v2295_v35  ;;  %v2797_v27 = vadd.f32 %v2794_v21, %v2793_v18 }
 0x611   :  { %4445 = vst [vmem:[%s7146_s24 + $0x30] sm:$0xff] %v6593_v39  ;;  %v2313_v44 = vpack.c.bf16 %v6593_v39, %v6575_v32  ;;  %v2795_v16 = vmul.f32 %v6593_v39, %v6593_v39 }
 0x612   :  { %4446 = vst [vmem:[%s7146_s24 + $0x38] sm:$0xff] %v6595_v40  ;;  %v2314_v41 = vpack.c.bf16 %v6595_v40, %v6577_v1  ;;  %v2788_v12 = vadd.f32 %v6595_v40, %v6593_v39  ;;  %v2796_v42 = vmul.f32 %v6595_v40, %v6595_v40 }
 0x614   :  { %2731 = vmatprep.mubr.bf16.mxu1 %v2314_v41  ;;  %2774 = vmatprep.mubr.bf16.mxu0 %v2314_v41  ;;  %v2800_v22 = vadd.f32 %v2796_v42, %v2795_v16 }
 0x615   :  { %2732 = vmatmul.mubr.bf16.vlgmr.msra.gmra.mrb[24].mxu1 %v2313_v44  ;;  %2775 = vmatmul.mubr.bf16.vlgmr.msra.gmra.mrb[16].mxu0 %v2313_v44 }
 0x616   :  { %3021 = vmatprep.mubr.f32.mxu1 %v5375_v15  ;;  %3300 = vmatprep.mubr.f32.mxu0 %v5375_v15 }
 0x6e8   :  { %v6611_v45 = vpop.f32.mrb[24].mxu1  ;;  %v6613_v30 = vpop.f32.mrb[16].mxu0 }
 0x6e9   :  { %v6615_v46 = vpop.f32.mrb[25].mxu1  ;;  %v6617_v33 = vpop.f32.mrb[17].mxu0  ;;  %v2829_v52 = vmul.f32 %v6611_v45, %v6611_v45  ;;  %v2865_v48 = vmul.f32 %v6613_v30, %v6613_v30 }
 0x6ea   :  { %v6623_v34 = vpop.f32.mrb[26].mxu1  ;;  %v6625_v47 = vpop.f32.mrb[18].mxu0  ;;  %v2821_v49 = vadd.f32 %v6615_v46, %v6611_v45  ;;  %v2830_v51 = vmul.f32 %v6615_v46, %v6615_v46  ;;  %v2857_v56 = vadd.f32 %v6617_v33, %v6613_v30  ;;  %v2866_v59 = vmul.f32 %v6617_v33, %v6617_v33 }
 0x6eb   :  { %v6635_v60 = vpop.f32.mrb[27].mxu1  ;;  %v6637_v62 = vpop.f32.mrb[19].mxu0  ;;  %v2831_v63 = vmul.f32 %v6623_v34, %v6623_v34  ;;  %v2867_v0 = vmul.f32 %v6625_v47, %v6625_v47 }
 0x6ec   :  { %2822 = vadd.xlane.f32.xlu1 %v2821_v49  ;;  %v2824_v3 = vadd.f32 %v6635_v60, %v6623_v34  ;;  %v2832_v4 = vmul.f32 %v6635_v60, %v6635_v60  ;;  %v2833_v5 = vadd.f32 %v2830_v51, %v2829_v52  ;;  %v2860_v7 = vadd.f32 %v6637_v62, %v6625_v47 }
 0x6ed   :  { %v2868_v9 = vmul.f32 %v6637_v62, %v6637_v62  ;;  %v2869_v11 = vadd.f32 %v2866_v59, %v2865_v48 }
 0x6ee   :  { %2825 = vadd.xlane.f32.xlu0 %v2824_v3  ;;  %v2836_v14 = vadd.f32 %v2832_v4, %v2831_v63 }
 0x6ef   :  { %v2872_v28 = vadd.f32 %v2868_v9, %v2867_v0 }
 0x6f0   :  { %2837 = vadd.xlane.f32.xlu1 %v2836_v14 }
 0x6f2   :  { %2834 = vadd.xlane.f32.xlu0 %v2833_v5 }
 0x6f4   :  { %2789 = vadd.xlane.f32.xlu1 %v2788_v12 }
 0x6f6   :  { %2786 = vadd.xlane.f32.xlu0 %v2785_v17 }
 0x6f8   :  { %2801 = vadd.xlane.f32.xlu1 %v2800_v22 }
 0x6fa   :  { %2798 = vadd.xlane.f32.xlu0 %v2797_v27 }
 0x6fc   :  { %2861 = vadd.xlane.f32.xlu1 %v2860_v7 }
 0x6fe   :  { %2858 = vadd.xlane.f32.xlu0 %v2857_v56 }
 0x700   :  { %2873 = vadd.xlane.f32.xlu1 %v2872_v28 }
 0x702   :  { %2870 = vadd.xlane.f32.xlu0 %v2869_v11 }
 0x711   :  { %2945 = vrot.lane.b32.xlu1 %v6674_v50, %s5377_s28 }
 0x715   :  { %2933 = vrot.lane.b32.xlu1 %v6681_v26, %s5383_s1 }
 0x718   :  { %2943 = vrot.lane.b32.xlu0 %v6681_v26, %s5377_s28 }
 0x719   :  { %3494 = vperm.xlu1 %4944, %v3486_v25  }
 0x71c   :  { %3489 = vperm.xlu0 %4943, %v3485_v24  }
 0x71d   :  { %2935 = vrot.lane.b32.xlu1 %v6674_v50, %s5383_s1 }
 0x71e   :  { %4946 = vset.pattern.permute.xlu1 %v5381_v8 }
 0x720   :  { %3119 = vrot.lane.b32.xlu0 %v6681_v26, %s5378_s5 }
 0x721   :  { %3121 = vrot.lane.b32.xlu1 %v6674_v50, %s5378_s5  ;;  %4945 = vset.pattern.permute.xlu0 %v5381_v8  ;;  %v3515_v8 = vld [vmem:[%s7141_s19] sm:$0xff] }
 0x724   :  { %3610 = vrot.lane.b32.xlu0 %v6681_v26, %s5379_s13 }
 0x725   :  { %3612 = vrot.lane.b32.xlu1 %v6674_v50, %s5379_s13 }
 0x728   :  { %3776 = vrot.lane.b32.xlu0 %v6681_v26, %s5380_s29 }
 0x729   :  { %3778 = vrot.lane.b32.xlu1 %v6674_v50, %s5380_s29 }
 0x72c   :  { %3866 = vperm.xlu0 %4945, %v6681_v26  }
 0x72d   :  { %3870 = vperm.xlu1 %4946, %v6674_v50  }
 0x730   :  { %3899 = vrot.lane.b32.xlu0 %v6674_v50, %s5382_s7 }
 0x731   :  { %3897 = vrot.lane.b32.xlu1 %v6681_v26, %s5382_s7  ;;  %4948 = vset.pattern.permute.xlu0 %v5385_v13 }
 0x732   :  { %4947 = vset.pattern.permute.xlu1 %v5376_v19 }
 0x734   :  { %3890 = vperm.xlu0 %4948, %v6681_v26  }
 0x735   :  { %3519 = vperm.xlu1 %4947, %v3515_v8  }
 0x738   :  { %3894 = vperm.xlu0 %4948, %v6674_v50  }
 0x739   :  { %4949 = vset.pattern.permute.xlu1 %v5384_v10 }
 0x73a   :  { %3215 = vperm.xlu1 %4949, %v6681_v26  }
 0x73e   :  { %4950 = vset.pattern.permute.xlu1 %v5376_v19 }
 0x73f   :  { %3524 = vperm.xlu1 %4950, %v3516_v53  }
 0x743   :  { %4951 = vset.pattern.permute.xlu1 %v5384_v10 }
 0x744   :  { %3219 = vperm.xlu1 %4951, %v6674_v50  }
 0x779   :  { %v2823_v13 = vpop.xlane.xlu1 %2822 }
 0x77a   :  { %v2827_v57 = vmul.f32 0.00390625, %v2823_v13 }
 0x77b   :  { %v2826_v54 = vpop.xlane.xlu0 %2825 }
 0x77c   :  { %v2828_v55 = vmul.f32 0.00390625, %v2826_v54  ;;  %v2845_v41 = vmul.f32 %v2827_v57, %v2827_v57  ;;  %v2841_v61 = vsub.f32 %v6611_v45, %v2827_v57  ;;  %v2842_v2 = vsub.f32 %v6615_v46, %v2827_v57 }
 0x77d   :  { %v2838_v31 = vpop.xlane.xlu1 %2837 }
 0x77e   :  { %v2840_v36 = vmul.f32 0.00390625, %v2838_v31  ;;  %v2846_v37 = vmul.f32 %v2828_v55, %v2828_v55  ;;  %v2843_v42 = vsub.f32 %v6623_v34, %v2828_v55  ;;  %v2844_v22 = vsub.f32 %v6635_v60, %v2828_v55 }
 0x77f   :  { %v2835_v35 = vpop.xlane.xlu0 %2834 }
 0x780   :  { %v2848_v38 = vsub.f32 %v2840_v36, %v2846_v37  ;;  %v2839_v44 = vmul.f32 0.00390625, %v2835_v35 }
 0x781   :  { %v2790_v52 = vpop.xlane.xlu1 %2789 }
 0x782   :  { %v2850_v48 = vadd.f32 1e-05, %v2848_v38  ;;  %v2847_v49 = vsub.f32 %v2839_v44, %v2845_v41  ;;  %v6730_v19 = vmul.f32 0.00390625, %v2790_v52 }
 0x783   :  { %v2787_v51 = vpop.xlane.xlu0 %2786 }
 0x784   :  { %5156 = vrsqrt.f32 %v2850_v48  ;;  %v2849_v10 = vadd.f32 1e-05, %v2847_v49  ;;  %v6732_v56 = vmul.f32 0.00390625, %v2787_v51  ;;  %v2810_v63 = vmul.f32 %v6730_v19, %v6730_v19 }
 0x785   :  { %v2802_v59 = vpop.xlane.xlu1 %2801  ;;  %v2807_v20 = vsub.f32 %v6593_v39, %v6730_v19  ;;  %v2808_v13 = vsub.f32 %v6595_v40, %v6730_v19  ;;  %v2941_v39 = vld [vmem:[#allocation8] sm:$0xff] }
 0x786   :  { %5158 = vrsqrt.f32 %v2849_v10  ;;  %v2804_v0 = vmul.f32 0.00390625, %v2802_v59  ;;  %v2809_v5 = vmul.f32 %v6732_v56, %v6732_v56  ;;  %v2805_v38 = vsub.f32 %v6575_v32, %v6732_v56 }
 0x787   :  { %v2799_v3 = vpop.xlane.xlu0 %2798  ;;  %v2806_v40 = vsub.f32 %v6577_v1, %v6732_v56 }
 0x788   :  { %v2812_v4 = vsub.f32 %v2804_v0, %v2810_v63  ;;  %v2803_v7 = vmul.f32 0.00390625, %v2799_v3  ;;  %v2942_v63 = vld [vmem:[#allocation8 + $0x8] sm:$0xff] }
 0x789   :  { %v2862_v9 = vpop.xlane.xlu1 %2861 }
 0x78a   :  { %v2814_v11 = vadd.f32 1e-05, %v2812_v4  ;;  %v2811_v14 = vsub.f32 %v2803_v7, %v2809_v5  ;;  %v6738_v28 = vmul.f32 0.00390625, %v2862_v9 }
 0x78b   :  { %v2859_v12 = vpop.xlane.xlu0 %2858 }
 0x78c   :  { %5160 = vrsqrt.f32 %v2814_v11  ;;  %v2813_v16 = vadd.f32 1e-05, %v2811_v14  ;;  %v6741_v17 = vmul.f32 0.00390625, %v2859_v12  ;;  %v2882_v27 = vmul.f32 %v6738_v28, %v6738_v28 }
 0x78d   :  { %v2874_v18 = vpop.xlane.xlu1 %2873  ;;  %v2879_v7 = vsub.f32 %v6625_v47, %v6738_v28 }
 0x78e   :  { %v5157_v21 = vpop.eup %5156  ;;  %5162 = vrsqrt.f32 %v2813_v16  ;;  %v2876_v58 = vmul.f32 0.00390625, %v2874_v18  ;;  %v2881_v24 = vmul.f32 %v6741_v17, %v6741_v17 }
 0x78f   :  { %v2855_v29 = vmul.f32 %v5157_v21, %v2843_v42  ;;  %v2871_v34 = vpop.xlane.xlu0 %2870  ;;  %v2856_v8 = vmul.f32 %v5157_v21, %v2844_v22  ;;  %v2880_v21 = vsub.f32 %v6637_v62, %v6738_v28  ;;  %v2877_v22 = vsub.f32 %v6613_v30, %v6741_v17 }
 0x790   :  { %v5159_v23 = vpop.eup %5158  ;;  %v2884_v25 = vsub.f32 %v2876_v58, %v2882_v27  ;;  %v2875_v60 = vmul.f32 0.00390625, %v2871_v34  ;;  %v2878_v58 = vsub.f32 %v6617_v33, %v6741_v17 }
 0x791   :  { %v2853_v53 = vmul.f32 %v5159_v23, %v2841_v61  ;;  %v2946_v54 = vpop.permute.xlu1 %2945  ;;  %v2854_v45 = vmul.f32 %v5159_v23, %v2842_v2  ;;  %vm2907_vm10 = vcmp.ge.f32.partialorder %v2855_v29, 0.0  ;;  %vm2908_vm11 = vcmp.ge.f32.partialorder %v2856_v8, 0.0  ;;  %v2929_v61 = vld [vmem:[#allocation7] sm:$0xff] }
 0x792   :  { %v2886_v46 = vadd.f32 1e-05, %v2884_v25  ;;  %v2883_v57 = vsub.f32 %v2875_v60, %v2881_v24  ;;  %v2911_v55 = vmul.f32 0.2, %v2855_v29  ;;  %v2912_v44 = vmul.f32 0.2, %v2856_v8 }
 0x793   :  { %v2944_v31 = vpop.permute.xlu0 %2943  ;;  %v4697_v36 = vpack.c.bf16 %v2856_v8, %v2854_v45  ;;  %v4699_v37 = vpack.c.bf16 %v2855_v29, %v2853_v53  ;;  %vm2906_vm12 = vcmp.ge.f32.partialorder %v2854_v45, 0.0  ;;  %v2910_v35 = vmul.f32 0.2, %v2854_v45  ;;  %v2930_v60 = vld [vmem:[#allocation7 + $0x8] sm:$0xff] }
 0x794   :  { %5164 = vrsqrt.f32 %v2886_v46  ;;  %v2885_v41 = vadd.f32 1e-05, %v2883_v57  ;;  %vm2905_vm13 = vcmp.ge.f32.partialorder %v2853_v53, 0.0  ;;  %v2909_v49 = vmul.f32 0.2, %v2853_v53 }
 0x795   :  { %v2934_v52 = vpop.permute.xlu1 %2933  ;;  %4698 = vmatprep.subr.bf16.mxu1 %v4697_v36  ;;  %v2914_v48 = vsel %vm2906_vm12, %v2854_v45, %v2910_v35  ;;  %v2949_v51 = vadd.f32 %v2944_v31, %v2941_v39  ;;  %v2916_v10 = vsel %vm2908_vm11, %v2856_v8, %v2912_v44  ;;  %v2915_v59 = vsel %vm2907_vm10, %v2855_v29, %v2911_v55  ;;  %v3117_v31 = vld [vmem:[#allocation10] sm:$0xff] }
 0x796   :  { %v5161_v19 = vpop.eup %5160  ;;  %5166 = vrsqrt.f32 %v2885_v41  ;;  %4700 = vmatpush1.bf16.msra.mxu1 %v4699_v37  ;;  %v6760_v0 = vpack.c.bf16 %v2916_v10, %v2914_v48  ;;  %v2913_v3 = vsel %vm2905_vm13, %v2853_v53, %v2909_v49  ;;  %v2950_v14 = vadd.f32 %v2946_v54, %v2942_v63  ;;  %v3226_v54 = vld [vmem:[#allocation11] sm:$0xff]  ;;  %v3118_v49 = vld [vmem:[#allocation10 + $0x8] sm:$0xff] }
 0x797   :  { %v2819_v32 = vmul.f32 %v5161_v19, %v2807_v20  ;;  %v2820_v4 = vmul.f32 %v5161_v19, %v2808_v13  ;;  %v6762_v56 = vpack.c.bf16 %v2915_v59, %v2913_v3  ;;  %v2939_v25 = vadd.f32 %v2934_v52, %v2929_v61  ;;  %v3397_v59 = vld [vmem:[%s7138_s16 + $0x8] sm:$0xff] }
 0x798   :  { %v5163_v1 = vpop.eup %5162  ;;  %4710 = vmatprep.subr.bf16.mxu0 %v6760_v0 }
 0x799   :  { %v2817_v5 = vmul.f32 %v5163_v1, %v2805_v38  ;;  %4511 = vmatmul.mubr.msk.f32.vlgmr.msra.gmra.mrb[28].mxu1 %vm1260_vm5, %v2949_v51  ;;  %v2818_v9 = vmul.f32 %v5163_v1, %v2806_v40  ;;  %v2900_v11 = vmul.f32 0.2, %v2820_v4  ;;  %4712 = vmatpush1.bf16.msra.mxu0 %v6762_v56  ;;  %vm2896_vm14 = vcmp.ge.f32.partialorder %v2820_v4, 0.0  ;;  %v6770_v16 = vpop.permute.xlu1 %3494  ;;  %v3227_v38 = vld [vmem:[#allocation11 + $0x8] sm:$0xff]  ;;  %v3396_v51 = vld [vmem:[%s7138_s16] sm:$0xff]  ;;  %s5386_s16 = smov [#allocation14]  }
 0x79a   :  { %3027 = vmatprep.mubr.f32.mxu1 %v5375_v15  ;;  %vm2895_vm15 = vcmp.ge.f32.partialorder %v2819_v32, 0.0  ;;  %v2899_v12 = vmul.f32 0.2, %v2819_v32  ;;  %s4336_s1 = sshll.u32 %s5386_s16, 4  ;;  %s4337_s1 = int_to_ptr.vmem [resolvable:$true] %s4336_s1 }
 0x79b   :  { %v4701_v42 = vpack.c.bf16 %v2820_v4, %v2818_v9  ;;  %v4703_v18 = vpack.c.bf16 %v2819_v32, %v2817_v5  ;;  %vm2894_vm0 = vcmp.ge.f32.partialorder %v2818_v9, 0.0  ;;  %v2898_v47 = vmul.f32 0.2, %v2818_v9  ;;  %v6786_v33 = vpop.permute.xlu0 %3489  ;;  %p5339_p1 = scmp.lt.s32.totalorder %s4337_s1, %s4337_s1 }
 0x79c   :  { %vm2893_vm1 = vcmp.ge.f32.partialorder %v2817_v5, 0.0  ;;  %v2897_v27 = vmul.f32 0.2, %v2817_v5  ;;  %4517 = vmatmul.mubr.msk.f32.vlgmr.msra.gmra.mrb[14].mxu0 %vm1260_vm5, %v6323_v6  ;;  %v2904_v29 = vsel %vm2896_vm14, %v2820_v4, %v2900_v11  ;;  %v2903_v28 = vsel %vm2895_vm15, %v2819_v32, %v2899_v12 }
 0x79d   :  { %4512 = vmatmul.mubr.msk.f32.gmra.mrb[30].mxu1 %vm1260_vm5, %v2950_v14  ;;  %v2902_v2 = vsel %vm2894_vm0, %v2818_v9, %v2898_v47  ;;  %4702 = vmatprep.subr.bf16.mxu1 %v4701_v42  ;;  %v2936_v8 = vpop.permute.xlu1 %2935 }
 0x79e   :  { %v5165_v20 = vpop.eup %5164  ;;  %3306 = vmatprep.mubr.f32.mxu0 %v5375_v15  ;;  %v6783_v62 = vpack.c.bf16 %v2904_v29, %v2902_v2  ;;  %v2901_v30 = vsel %vm2893_vm1, %v2817_v5, %v2897_v27  ;;  %4704 = vmatpush1.bf16.msra.mxu1 %v4703_v18  ;;  %v2940_v39 = vadd.f32 %v2936_v8, %v2930_v60  ;;  %v4007_v60 = vld [vmem:[%s7142_s20 + $0x20] sm:$0xff]  ;;  %v4009_v8 = vld [vmem:[%s7142_s20 + $0x30] sm:$0xff] }
 0x79f   :  { %v2891_v34 = vmul.f32 %v5165_v20, %v2879_v7  ;;  %3104 = vmatprep.mubr.f32.mxu1 %v5375_v15  ;;  %v6789_v6 = vpack.c.bf16 %v2903_v28, %v2901_v30  ;;  %v2892_v17 = vmul.f32 %v5165_v20, %v2880_v21  ;;  %v3120_v36 = vpop.permute.xlu0 %3119  ;;  %v3501_v30 = vld [vmem:[%s7139_s17] sm:$0xff] }
 0x7a0   :  { %v5167_v23 = vpop.eup %5166  ;;  %4714 = vmatprep.subr.bf16.mxu0 %v6783_v62  ;;  %4518 = vmatmul.mubr.msk.f32.gmra.mrb[20].mxu0 %vm1260_vm5, %v6333_v43  ;;  %v3125_v48 = vadd.f32 %v3120_v36, %v3117_v31  ;;  %v4015_v36 = vld [vmem:[%s7142_s20 + $0x60] sm:$0xff] }
 0x7a1   :  { %v2889_v24 = vmul.f32 %v5167_v23, %v2877_v22  ;;  %v2890_v53 = vmul.f32 %v5167_v23, %v2878_v58  ;;  %v2924_v13 = vmul.f32 0.2, %v2892_v17  ;;  %4513 = vmatmul.mubr.msk.f32.vlgmr.msra.gmra.mrb[28].mxu1 %vm1260_vm5, %v2939_v25  ;;  %4716 = vmatpush1.bf16.msra.mxu0 %v6789_v6  ;;  %vm2920_vm2 = vcmp.ge.f32.partialorder %v2892_v17, 0.0  ;;  %v3122_v19 = vpop.permute.xlu1 %3121  ;;  %v4010_v23 = vld [vmem:[%s7142_s20 + $0x38] sm:$0xff] }
 0x7a2   :  { %vm2919_vm3 = vcmp.ge.f32.partialorder %v2891_v34, 0.0  ;;  %v2923_v45 = vmul.f32 0.2, %v2891_v34  ;;  %3383 = vmatprep.mubr.f32.mxu0 %v5375_v15  ;;  %3110 = vmatprep.mubr.f32.mxu1 %v5375_v15  ;;  %v3126_v10 = vadd.f32 %v3122_v19, %v3118_v49  ;;  %v4026_v49 = vld [vmem:[%s7142_s20 + $0xb8] sm:$0xff] }
 0x7a3   :  { %v4705_v46 = vpack.c.bf16 %v2892_v17, %v2890_v53  ;;  %v4707_v57 = vpack.c.bf16 %v2891_v34, %v2889_v24  ;;  %vm2918_vm4 = vcmp.ge.f32.partialorder %v2890_v53, 0.0  ;;  %v2922_v55 = vmul.f32 0.2, %v2890_v53  ;;  %v3611_v28 = vpop.permute.xlu0 %3610 }
 0x7a4   :  { %vm2917_vm6 = vcmp.ge.f32.partialorder %v2889_v24, 0.0  ;;  %v2921_v43 = vmul.f32 0.2, %v2889_v24  ;;  %4519 = vmatmul.mubr.msk.f32.vlgmr.msra.gmra.mrb[14].mxu0 %vm1260_vm5, %v3226_v54  ;;  %v2928_v35 = vsel %vm2920_vm2, %v2892_v17, %v2924_v13  ;;  %v2927_v40 = vsel %vm2919_vm3, %v2891_v34, %v2923_v45  ;;  %v4003_v34 = vld [vmem:[%s7142_s20] sm:$0xff]  ;;  %v4008_v17 = vld [vmem:[%s7142_s20 + $0x28] sm:$0xff]  ;;  %v4014_v13 = vld [vmem:[%s7142_s20 + $0x58] sm:$0xff] }
 0x7a5   :  { %4706 = vmatprep.subr.bf16.mxu1 %v4705_v46  ;;  %v2926_v37 = vsel %vm2918_vm4, %v2890_v53, %v2922_v55  ;;  %4514 = vmatmul.mubr.msk.f32.gmra.mrb[30].mxu1 %vm1260_vm5, %v2940_v39  ;;  %v4012_v53 = vld [vmem:[%s7142_s20 + $0x48] sm:$0xff]  ;;  %v4747_v54 = vpack.c.bf16 %v4009_v8, %v4007_v60  ;;  %v4011_v46 = vld [vmem:[%s7142_s20 + $0x40] sm:$0xff]  ;;  %v4018_v39 = vld [vmem:[%s7142_s20 + $0x78] sm:$0xff] }
 0x7a6   :  { %3389 = vmatprep.mubr.f32.mxu0 %v5375_v15  ;;  %v6802_v41 = vpack.c.bf16 %v2928_v35, %v2926_v37  ;;  %v2925_v44 = vsel %vm2917_vm6, %v2889_v24, %v2921_v43  ;;  %4708 = vmatpush1.bf16.msra.mxu1 %v4707_v57  ;;  %v4745_v24 = vpack.c.bf16 %v4010_v23, %v4008_v17  ;;  %v4013_v57 = vld [vmem:[%s7142_s20 + $0x50] sm:$0xff]  ;;  %v4016_v55 = vld [vmem:[%s7142_s20 + $0x68] sm:$0xff]  ;;  %v4047_v8 = vld [vmem:[%s7142_s20 + $0x160] sm:$0xff] }
 0x7a7   :  { %3197 = vmatprep.mubr.f32.mxu1 %v5375_v15  ;;  %v6806_v52 = vpack.c.bf16 %v2927_v40, %v2925_v44  ;;  %v4749_v45 = vpack.c.bf16 %v4014_v13, %v4012_v53  ;;  %v4751_v43 = vpack.c.bf16 %v4013_v57, %v4011_v46  ;;  %v4753_v31 = vpack.c.bf16 %v4018_v39, %v4016_v55  ;;  %v4017_v37 = vld [vmem:[%s7142_s20 + $0x70] sm:$0xff]  ;;  %v4020_v35 = vld [vmem:[%s7142_s20 + $0x88] sm:$0xff]  ;;  %v4019_v40 = vld [vmem:[%s7142_s20 + $0x80] sm:$0xff] }
 0x7a8   :  { %4718 = vmatprep.subr.bf16.mxu0 %v6802_v41  ;;  %4520 = vmatmul.mubr.msk.f32.gmra.mrb[20].mxu0 %vm1260_vm5, %v3227_v38  ;;  %v4022_v38 = vld [vmem:[%s7142_s20 + $0x98] sm:$0xff]  ;;  %v4045_v17 = vld [vmem:[%s7142_s20 + $0x150] sm:$0xff]  ;;  %v4048_v23 = vld [vmem:[%s7142_s20 + $0x168] sm:$0xff] }
 0x7a9   :  { %4515 = vmatmul.mubr.msk.f32.vlgmr.msra.gmra.mrb[28].mxu1 %vm1260_vm5, %v3125_v48  ;;  %4720 = vmatpush1.bf16.msra.mxu0 %v6806_v52  ;;  %v4757_v44 = vpack.c.bf16 %v4022_v38, %v4020_v35  ;;  %v4024_v48 = vld [vmem:[%s7142_s20 + $0xa8] sm:$0xff]  ;;  %v4049_v53 = vld [vmem:[%s7142_s20 + $0x170] sm:$0xff]  ;;  %v4051_v57 = vld [vmem:[%s7142_s20 + $0x180] sm:$0xff] }
 0x7aa   :  { %3468 = vmatprep.mubr.f32.mxu0 %v5375_v15  ;;  %3203 = vmatprep.mubr.f32.mxu1 %v5375_v15  ;;  %v4052_v13 = vld [vmem:[%s7142_s20 + $0x188] sm:$0xff]  ;;  %v4053_v55 = vld [vmem:[%s7142_s20 + $0x190] sm:$0xff] }
 0x7ab   :  { %v4056_v39 = vld [vmem:[%s7142_s20 + $0x1a8] sm:$0xff]  ;;  %v4057_v35 = vld [vmem:[%s7142_s20 + $0x1b0] sm:$0xff] }
 0x7ac   :  { %4521 = vmatmul.mubr.msk.f32.vlgmr.msra.gmra.mrb[14].mxu0 %vm1260_vm5, %v3396_v51  ;;  %v4761_v51 = vpack.c.bf16 %v4026_v49, %v4024_v48 }
 0x7ad   :  { %4516 = vmatmul.mubr.msk.f32.gmra.mrb[30].mxu1 %vm1260_vm5, %v3126_v10  ;;  %3474 = vmatprep.mubr.f32.mxu0 %v5375_v15  ;;  %v4023_v10 = vld [vmem:[%s7142_s20 + $0xa0] sm:$0xff] }
 0x7ae   :  { %3597 = vmatprep.mubr.f32.mxu1 %v5375_v15 }
 0x7b0   :  { %4522 = vmatmul.mubr.msk.f32.gmra.mrb[20].mxu0 %vm1260_vm5, %v3397_v59  ;;  %v4025_v59 = vld [vmem:[%s7142_s20 + $0xb0] sm:$0xff] }
 0x87c   :  { %v6825_v32 = vpop.f32.mrb[28].mxu1 }
 0x87d   :  { %v6827_v63 = vpop.f32.mrb[29].mxu1 }
 0x87f   :  { %v3470_v3 = vpop.f32.mrb[14].mxu0 }
 0x880   :  { %v3497_v4 = vadd.f32 %v6786_v33, %v3470_v3  ;;  %v6830_v1 = vpop.f32.mrb[30].mxu1  ;;  %v3472_v5 = vpop.f32.mrb[15].mxu0  ;;  %v4028_v3 = vld [vmem:[%s7142_s20 + $0xc8] sm:$0xff] }
 0x881   :  { %v3498_v7 = vadd.f32 %v6786_v33, %v3472_v5  ;;  %v6833_v9 = vpop.f32.mrb[31].mxu1  ;;  %v4763_v5 = vpack.c.bf16 %v4025_v59, %v4023_v10 }
 0x882   :  { %v3507_v14 = vmul.f32 0.2, %v3497_v4  ;;  %vm3503_vm7 = vcmp.ge.f32.partialorder %v3497_v4, 0.0 }
 0x883   :  { %v3476_v11 = vpop.f32.mrb[20].mxu0  ;;  %v3508_v18 = vmul.f32 0.2, %v3498_v7  ;;  %vm3504_vm8 = vcmp.ge.f32.partialorder %v3498_v7, 0.0 }
 0x884   :  { %v3499_v12 = vadd.f32 %v6770_v16, %v3476_v11  ;;  %v3478_v42 = vpop.f32.mrb[21].mxu0  ;;  %v3511_v27 = vsel %vm3503_vm7, %v3497_v4, %v3507_v14  ;;  %v4030_v4 = vld [vmem:[%s7142_s20 + $0xd8] sm:$0xff]  ;;  %v4027_v11 = vld [vmem:[%s7142_s20 + $0xc0] sm:$0xff]  ;;  %v4029_v14 = vld [vmem:[%s7142_s20 + $0xd0] sm:$0xff] }
 0x885   :  { %v3500_v47 = vadd.f32 %v6770_v16, %v3478_v42  ;;  %v3512_v2 = vsel %vm3504_vm8, %v3498_v7, %v3508_v18  ;;  %v3502_v16 = vld [vmem:[%s7139_s17 + $0x8] sm:$0xff]  ;;  %v4765_v7 = vpack.c.bf16 %v4030_v4, %v4028_v3  ;;  %v4034_v42 = vld [vmem:[%s7142_s20 + $0xf8] sm:$0xff]  ;;  %v4767_v18 = vpack.c.bf16 %v4029_v14, %v4027_v11 }
 0x886   :  { %vm3505_vm9 = vcmp.ge.f32.partialorder %v3499_v12, 0.0  ;;  %v3509_v21 = vmul.f32 0.2, %v3499_v12 }
 0x887   :  { %vm3506_vm10 = vcmp.ge.f32.partialorder %v3500_v47, 0.0  ;;  %v3510_v22 = vmul.f32 0.2, %v3500_v47 }
 0x888   :  { %v3513_v58 = vsel %vm3505_vm9, %v3499_v12, %v3509_v21  ;;  %v4032_v12 = vld [vmem:[%s7142_s20 + $0xe8] sm:$0xff]  ;;  %v4031_v21 = vld [vmem:[%s7142_s20 + $0xe0] sm:$0xff] }
 0x889   :  { %v4723_v61 = vpack.c.bf16 %v3513_v58, %v3511_v27  ;;  %v3514_v29 = vsel %vm3506_vm10, %v3500_v47, %v3510_v22  ;;  %v4769_v47 = vpack.c.bf16 %v4034_v42, %v4032_v12  ;;  %v4033_v22 = vld [vmem:[%s7142_s20 + $0xf0] sm:$0xff]  ;;  %v4036_v27 = vld [vmem:[%s7142_s20 + $0x108] sm:$0xff]  ;;  %v4038_v58 = vld [vmem:[%s7142_s20 + $0x118] sm:$0xff] }
 0x88a   :  { %v4721_v20 = vpack.c.bf16 %v3514_v29, %v3512_v2  ;;  %v4773_v2 = vpack.c.bf16 %v4038_v58, %v4036_v27  ;;  %v4035_v29 = vld [vmem:[%s7142_s20 + $0x100] sm:$0xff]  ;;  %v4060_v27 = vld [vmem:[%s7142_s20 + $0x1c8] sm:$0xff]  ;;  %v4062_v58 = vld [vmem:[%s7142_s20 + $0x1d8] sm:$0xff] }
 0x88c   :  { %4722 = vmatprep.subr.bf16.mxu1 %v4721_v20  ;;  %v4037_v20 = vld [vmem:[%s7142_s20 + $0x110] sm:$0xff] }
 0x88d   :  { %4724 = vmatpush1.bf16.msra.mxu1 %v4723_v61  ;;  %v4771_v61 = vpack.c.bf16 %v4033_v22, %v4031_v21 }
 0x88e   :  { %4726 = vmatprep.subr.bf16.mxu1 %v6760_v0  ;;  %v3613_v0 = vpop.permute.xlu1 %3612 }
 0x890   :  { %4523 = vmatmul.mubr.msk.f32.vlgmr.msra.gmra.mrb[32].mxu1 %vm1260_vm5, %v3501_v30  ;;  %v4040_v30 = vld [vmem:[%s7142_s20 + $0x128] sm:$0xff] }
 0x891   :  { %4728 = vmatpush1.bf16.msra.mxu1 %v6762_v56  ;;  %3603 = vmatprep.mubr.f32.mxu1 %v5375_v15  ;;  %v3777_v56 = vpop.permute.xlu0 %3776 }
 0x892   :  { %4730 = vmatprep.subr.bf16.mxu1 %v6783_v62  ;;  %v3779_v62 = vpop.permute.xlu1 %3778 }
 0x894   :  { %4524 = vmatmul.mubr.msk.f32.gmra.mrb[34].mxu1 %vm1260_vm5, %v3502_v16  ;;  %v4042_v16 = vld [vmem:[%s7142_s20 + $0x138] sm:$0xff] }
 0x895   :  { %3682 = vmatprep.mubr.f32.mxu1 %v5375_v15 }
 0x896   :  { %v3871_v49 = vpop.permute.xlu1 %3870 }
 0x898   :  { %4525 = vmatmul.mubr.msk.f32.vlgmr.msra.gmra.mrb[36].mxu1 %vm1260_vm5, %v3611_v28  ;;  %v4775_v28 = vpack.c.bf16 %v4037_v20, %v4035_v29  ;;  %v4061_v29 = vld [vmem:[%s7142_s20 + $0x1d0] sm:$0xff] }
 0x899   :  { %4732 = vmatpush1.bf16.msra.mxu1 %v6789_v6  ;;  %3688 = vmatprep.mubr.f32.mxu1 %v5375_v15  ;;  %v4005_v6 = vld [vmem:[%s7142_s20 + $0x10] sm:$0xff] }
 0x89a   :  { %4734 = vmatprep.subr.bf16.mxu1 %v6802_v41  ;;  %v4743_v25 = vpack.c.bf16 %v4005_v6, %v4003_v34  ;;  %v4755_v41 = vpack.c.bf16 %v4017_v37, %v4015_v36  ;;  %v4043_v6 = vld [vmem:[%s7142_s20 + $0x140] sm:$0xff]  ;;  %v3898_v21 = vpop.permute.xlu1 %3897 }
 0x89b   :  { %v4055_v37 = vld [vmem:[%s7142_s20 + $0x1a0] sm:$0xff] }
 0x89c   :  { %4526 = vmatmul.mubr.msk.f32.gmra.mrb[38].mxu1 %vm1260_vm5, %v3613_v0  ;;  %v4777_v0 = vpack.c.bf16 %v4042_v16, %v4040_v30  ;;  %v4795_v38 = vpack.c.bf16 %v4057_v35, %v4055_v37  ;;  %v4066_v30 = vld [vmem:[%s7142_s20 + $0x1f8] sm:$0xff] }
 0x89d   :  { %3763 = vmatprep.mubr.f32.mxu1 %v5375_v15 }
 0x8a0   :  { %4527 = vmatmul.mubr.msk.f32.vlgmr.msra.gmra.mrb[36].mxu1 %vm1260_vm5, %v6681_v26  ;;  %v4004_v26 = vld [vmem:[%s7142_s20 + $0x8] sm:$0xff] }
 0x8a1   :  { %4736 = vmatpush1.bf16.msra.mxu1 %v6806_v52  ;;  %3769 = vmatprep.mubr.f32.mxu1 %v5375_v15  ;;  %v4021_v52 = vld [vmem:[%s7142_s20 + $0x90] sm:$0xff] }
 0x8a2   :  { %v4759_v19 = vpack.c.bf16 %v4021_v52, %v4019_v40 }
 0x8a4   :  { %4528 = vmatmul.mubr.msk.f32.gmra.mrb[38].mxu1 %vm1260_vm5, %v6674_v50  ;;  %v4006_v50 = vld [vmem:[%s7142_s20 + $0x18] sm:$0xff] }
 0x8a5   :  { %3848 = vmatprep.mubr.f32.mxu1 %v5375_v15  ;;  %v4741_v33 = vpack.c.bf16 %v4006_v50, %v4004_v26  ;;  %v4044_v26 = vld [vmem:[%s7142_s20 + $0x148] sm:$0xff]  ;;  %v4046_v50 = vld [vmem:[%s7142_s20 + $0x158] sm:$0xff] }
 0x8a7   :  { %4742 = vmatprep.subr.bf16.mxu0 %v4741_v33  ;;  %v4781_v33 = vpack.c.bf16 %v4046_v50, %v4044_v26 }
 0x8a8   :  { %4529 = vmatmul.mubr.msk.f32.vlgmr.msra.gmra.mrb[36].mxu1 %vm1260_vm5, %v3777_v56  ;;  %4744 = vmatpush1.bf16.msra.mxu0 %v4743_v25  ;;  %v4039_v56 = vld [vmem:[%s7142_s20 + $0x120] sm:$0xff]  ;;  %v4050_v25 = vld [vmem:[%s7142_s20 + $0x178] sm:$0xff] }
 0x8a9   :  { %3854 = vmatprep.mubr.f32.mxu1 %v5375_v15  ;;  %4746 = vmatprep.subr.bf16.mxu0 %v4745_v24  ;;  %v4783_v24 = vpack.c.bf16 %v4045_v17, %v4043_v6  ;;  %v4785_v60 = vpack.c.bf16 %v4050_v25, %v4048_v23 }
 0x8ac   :  { %4530 = vmatmul.mubr.msk.f32.gmra.mrb[38].mxu1 %vm1260_vm5, %v3779_v62  ;;  %4748 = vmatpush1.bf16.msra.mxu0 %v4747_v54  ;;  %v4041_v62 = vld [vmem:[%s7142_s20 + $0x130] sm:$0xff]  ;;  %v4054_v54 = vld [vmem:[%s7142_s20 + $0x198] sm:$0xff] }
 0x8ad   :  { %3969 = vmatprep.mubr.f32.mxu1 %v5375_v15  ;;  %4750 = vmatprep.subr.bf16.mxu0 %v4749_v45  ;;  %v4779_v34 = vpack.c.bf16 %v4041_v62, %v4039_v56  ;;  %v4787_v45 = vpack.c.bf16 %v4049_v53, %v4047_v8  ;;  %v4789_v46 = vpack.c.bf16 %v4054_v54, %v4052_v13  ;;  %v3520_v62 = vpop.permute.xlu1 %3519  ;;  %v5172_v54 = vld [vmem:[%s7146_s24 + $0x20] sm:$0xff] }
 0x8b0   :  { %4752 = vmatpush1.bf16.msra.mxu0 %v4751_v43  ;;  %v4058_v43 = vld [vmem:[%s7142_s20 + $0x1b8] sm:$0xff] }
 0x8b1   :  { %4754 = vmatprep.subr.bf16.mxu0 %v4753_v31  ;;  %v4791_v31 = vpack.c.bf16 %v4053_v55, %v4051_v57  ;;  %v4793_v36 = vpack.c.bf16 %v4058_v43, %v4056_v39  ;;  %v3216_v26 = vpop.permute.xlu1 %3215 }
 0x8b2   :  { %v3222_v6 = vadd.f32 %v3216_v26, %v6825_v32  ;;  %v3223_v17 = vadd.f32 %v3216_v26, %v6827_v63  ;;  %v5173_v32 = vld [vmem:[%s7146_s24 + $0x28] sm:$0xff] }
 0x8b4   :  { %4756 = vmatpush1.bf16.msra.mxu0 %v4755_v41  ;;  %v3867_v41 = vpop.permute.xlu0 %3866  ;;  %v3983_v63 = vadd.f32 %v5173_v32, %v3223_v17 }
 0x8b5   :  { %4758 = vmatprep.subr.bf16.mxu0 %v4757_v44 }
 0x8b8   :  { %4760 = vmatpush1.bf16.msra.mxu0 %v4759_v19  ;;  %v3900_v22 = vpop.permute.xlu0 %3899 }
 0x8b9   :  { %4762 = vmatprep.subr.bf16.mxu0 %v4761_v51 }
 0x8bc   :  { %4764 = vmatpush1.bf16.msra.mxu0 %v4763_v5  ;;  %v3891_v50 = vpop.permute.xlu0 %3890 }
 0x8bd   :  { %4766 = vmatprep.subr.bf16.mxu0 %v4765_v7 }
 0x8c0   :  { %4768 = vmatpush1.bf16.msra.mxu0 %v4767_v18 }
 0x8c1   :  { %4770 = vmatprep.subr.bf16.mxu0 %v4769_v47 }
 0x8c4   :  { %4772 = vmatpush1.bf16.msra.mxu0 %v4771_v61  ;;  %v4797_v61 = vpack.c.bf16 %v4062_v58, %v4060_v27  ;;  %v4223_v58 = vld [vmem:[#allocation13] sm:$0xff] }
 0x8c5   :  { %4774 = vmatprep.subr.bf16.mxu0 %v4773_v2  ;;  %v4059_v2 = vld [vmem:[%s7142_s20 + $0x1c0] sm:$0xff] }
 0x8c6   :  { %v4799_v20 = vpack.c.bf16 %v4061_v29, %v4059_v2  ;;  %v4241_v2 = vld [vmem:[#allocation13 + $0x90] sm:$0xff]  ;;  %v4242_v29 = vld [vmem:[#allocation13 + $0x98] sm:$0xff] }
 0x8c8   :  { %4776 = vmatpush1.bf16.msra.mxu0 %v4775_v28  ;;  %v4063_v28 = vld [vmem:[%s7142_s20 + $0x1e0] sm:$0xff] }
 0x8c9   :  { %4778 = vmatprep.subr.bf16.mxu0 %v4777_v0  ;;  %v4065_v0 = vld [vmem:[%s7142_s20 + $0x1f0] sm:$0xff] }
 0x8ca   :  { %v4803_v56 = vpack.c.bf16 %v4065_v0, %v4063_v28  ;;  %v4226_v28 = vld [vmem:[#allocation13 + $0x18] sm:$0xff]  ;;  %v4243_v0 = vld [vmem:[#allocation13 + $0xa0] sm:$0xff] }
 0x8cc   :  { %4780 = vmatpush1.bf16.msra.mxu0 %v4779_v34  ;;  %v3525_v34 = vpop.permute.xlu1 %3524 }
 0x8cd   :  { %4782 = vmatprep.subr.bf16.mxu0 %v4781_v33  ;;  %v4849_v33 = vadd.f32 %v3891_v50, %v3520_v62  ;;  %v4227_v50 = vld [vmem:[#allocation13 + $0x20] sm:$0xff] }
 0x8d0   :  { %4784 = vmatpush1.bf16.msra.mxu0 %v4783_v24  ;;  %v3220_v8 = vpop.permute.xlu1 %3219 }
 0x8d1   :  { %4786 = vmatprep.subr.bf16.mxu0 %v4785_v60  ;;  %v3895_v60 = vpop.permute.xlu0 %3894  ;;  %v3225_v55 = vadd.f32 %v3220_v8, %v6833_v9  ;;  %v5175_v9 = vld [vmem:[%s7146_s24 + $0x38] sm:$0xff] }
 0x8d2   :  { %v4853_v13 = vadd.f32 %v3895_v60, %v3525_v34  ;;  %v4228_v34 = vld [vmem:[#allocation13 + $0x28] sm:$0xff]  ;;  %v4247_v60 = vld [vmem:[#allocation13 + $0xc0] sm:$0xff] }
 0x8d3   :  { %v4819_v17 = vpack.c.bf16 %v4228_v34, %v4227_v50 }
 0x8d4   :  { %4788 = vmatpush1.bf16.msra.mxu0 %v4787_v45  ;;  %v3982_v45 = vadd.f32 %v5172_v54, %v3222_v6  ;;  %v4246_v6 = vld [vmem:[#allocation13 + $0xb8] sm:$0xff]  ;;  %v4231_v54 = vld [vmem:[#allocation13 + $0x40] sm:$0xff] }
 0x8d5   :  { %4790 = vmatprep.subr.bf16.mxu0 %v4789_v46  ;;  %v3224_v46 = vadd.f32 %v3220_v8, %v6830_v1  ;;  %v4248_v8 = vld [vmem:[#allocation13 + $0xc8] sm:$0xff] }
 0x8d8   :  { %4792 = vmatpush1.bf16.msra.mxu0 %v4791_v31 }
 0x8d9   :  { %4794 = vmatprep.subr.bf16.mxu0 %v4793_v36 }
 0x8dc   :  { %4796 = vmatpush1.bf16.msra.mxu0 %v4795_v38 }
 0x8dd   :  { %4798 = vmatprep.subr.bf16.mxu0 %v4797_v61  ;;  %v4224_v61 = vld [vmem:[#allocation13 + $0x8] sm:$0xff] }
 0x8e0   :  { %4800 = vmatpush1.bf16.msra.mxu0 %v4799_v20  ;;  %v4148_v20 = vld [vmem:[%s7143_s21] sm:$0x3] }
 0x97b   :  { %v3850_v44 = vpop.f32.mrb[36].mxu1 }
 0x97c   :  { %v3873_v40 = vadd.f32 %v3867_v41, %v3850_v44  ;;  %v3852_v52 = vpop.f32.mrb[37].mxu1 }
 0x97d   :  { %v3874_v48 = vadd.f32 %v3867_v41, %v3852_v52  ;;  %v5174_v41 = vld [vmem:[%s7146_s24 + $0x30] sm:$0xff] }
 0x97e   :  { %v3881_v51 = vmul.f32 0.2, %v3873_v40  ;;  %vm3877_vm11 = vcmp.ge.f32.partialorder %v3873_v40, 0.0  ;;  %v3984_v1 = vadd.f32 %v5174_v41, %v3224_v46  ;;  %v4249_v46 = vld [vmem:[#allocation13 + $0xd0] sm:$0xff] }
 0x97f   :  { %v3856_v19 = vpop.f32.mrb[38].mxu1  ;;  %v3882_v3 = vmul.f32 0.2, %v3874_v48  ;;  %vm3878_vm12 = vcmp.ge.f32.partialorder %v3874_v48, 0.0  ;;  %v4253_v41 = vld [vmem:[#allocation13 + $0xf0] sm:$0xff] }
 0x980   :  { %v3875_v10 = vadd.f32 %v3871_v49, %v3856_v19  ;;  %v3858_v59 = vpop.f32.mrb[39].mxu1  ;;  %v3885_v11 = vsel %vm3877_vm11, %v3873_v40, %v3881_v51  ;;  %v3985_v40 = vadd.f32 %v5175_v9, %v3225_v55  ;;  %v4233_v55 = vld [vmem:[#allocation13 + $0x50] sm:$0xff] }
 0x981   :  { %v3876_v4 = vadd.f32 %v3871_v49, %v3858_v59  ;;  %v3886_v42 = vsel %vm3878_vm12, %v3874_v48, %v3882_v3  ;;  %v5176_v59 = vld [vmem:[%s7176_s4] sm:$0xff] }
 0x982   :  { %vm3879_vm13 = vcmp.ge.f32.partialorder %v3875_v10, 0.0  ;;  %v3883_v5 = vmul.f32 0.2, %v3875_v10 }
 0x983   :  { %vm3880_vm14 = vcmp.ge.f32.partialorder %v3876_v4, 0.0  ;;  %v3884_v7 = vmul.f32 0.2, %v3876_v4 }
 0x984   :  { %v3887_v14 = vsel %vm3879_vm13, %v3875_v10, %v3883_v5 }
 0x985   :  { %v4739_v12 = vpack.c.bf16 %v3887_v14, %v3885_v11  ;;  %v3888_v18 = vsel %vm3880_vm14, %v3876_v4, %v3884_v7  ;;  %v5177_v4 = vld [vmem:[%s7176_s4 + $0x10] sm:$0xff]  ;;  %v4239_v11 = vld [vmem:[#allocation13 + $0x80] sm:$0xff]  ;;  %v4240_v14 = vld [vmem:[#allocation13 + $0x88] sm:$0xff] }
 0x986   :  { %v4737_v47 = vpack.c.bf16 %v3888_v18, %v3886_v42  ;;  %v5179_v18 = vld [vmem:[%s7176_s4 + $0x18] sm:$0xff]  ;;  %v4809_v27 = vpack.c.bf16 %v4240_v14, %v4239_v11 }
 0x988   :  { %4738 = vmatprep.subr.bf16.mxu1 %v4737_v47 }
 0x989   :  { %4740 = vmatpush1.bf16.msra.mxu1 %v4739_v12  ;;  %v5178_v12 = vld [vmem:[%s7176_s4 + $0x8] sm:$0xff] }
 0x98c   :  { %4531 = vmatmul.mubr.msk.f32.vlgmr.msra.gmra.mrb[32].mxu1 %vm1260_vm5, %v3898_v21 }
 0x98d   :  { %3975 = vmatprep.mubr.f32.mxu1 %v5375_v15 }
 0x990   :  { %4532 = vmatmul.mubr.msk.f32.gmra.mrb[34].mxu1 %vm1260_vm5, %v3900_v22 }
 0x991   :  { %4216 = vmatprep.mubr.f32.mxu1 %v5375_v15  ;;  %v4064_v15 = vld [vmem:[%s7142_s20 + $0x1e8] sm:$0xff]  ;;  %s5334_s20 = scalar_lea.vmem %s4337_s1, 32 }
 0x992   :  { %v4801_v16 = vpack.c.bf16 %v4066_v30, %v4064_v15  ;;  %v4811_v15 = vpack.c.bf16 %v4224_v61, %v4223_v58  ;;  %v4813_v30 = vpack.c.bf16 %v4242_v29, %v4241_v2  ;;  %p5335_p0 = scmp.ne.s32.totalorder %s4337_s1, %s5334_s20  ;;  %p5340_p2 = scmp.lt.s32.totalorder %s5334_s20, %s5334_s20 }
 0x994   :  { %4802 = vmatprep.subr.bf16.mxu0 %v4801_v16  ;;  %v4225_v16 = vld [vmem:[#allocation13 + $0x10] sm:$0xff]  ;;  %p5341_p3 = por %p5340_p2, %p5339_p1 }
 0x995   :  { %4804 = vmatpush1.bf16.msra.mxu0 %v4803_v56  ;;  %v4244_v56 = vld [vmem:[#allocation13 + $0xa8] sm:$0xff]  ;;  %v4815_v62 = vpack.c.bf16 %v4226_v28, %v4225_v16 }
 0x996   :  { %v4817_v26 = vpack.c.bf16 %v4244_v56, %v4243_v0  ;;  %p5342_p4 = pnand %p5341_p3, %p5335_p0 }
 0xa5f   :  { %v3971_v23 = vpop.f32.mrb[32].mxu1 }
 0xa60   :  { %v4850_v25 = vadd.f32 %v4849_v33, %v3971_v23  ;;  %v3973_v24 = vpop.f32.mrb[33].mxu1 }
 0xa61   :  { %v4852_v53 = vadd.f32 %v4849_v33, %v3973_v24  ;;  %v4245_v33 = vld [vmem:[#allocation13 + $0xb0] sm:$0xff]  ;;  %v4230_v24 = vld [vmem:[#allocation13 + $0x38] sm:$0xff] }
 0xa62   :  { %v3990_v57 = vmul.f32 0.1, %v4850_v25  ;;  %v4821_v23 = vpack.c.bf16 %v4246_v6, %v4245_v33  ;;  %v4229_v25 = vld [vmem:[#allocation13 + $0x30] sm:$0xff] }
 0xa63   :  { %v3991_v39 = vmul.f32 0.1, %v4852_v53  ;;  %v3977_v43 = vpop.f32.mrb[34].mxu1  ;;  %v4823_v53 = vpack.c.bf16 %v4230_v24, %v4229_v25 }
 0xa64   :  { %v3994_v31 = vadd.f32 %v3990_v57, %v3982_v45  ;;  %v4854_v36 = vadd.f32 %v4853_v13, %v3977_v43  ;;  %v3979_v37 = vpop.f32.mrb[35].mxu1  ;;  %v4232_v45 = vld [vmem:[#allocation13 + $0x48] sm:$0xff]  ;;  %v4250_v57 = vld [vmem:[#allocation13 + $0xd8] sm:$0xff]  ;;  %v4251_v43 = vld [vmem:[#allocation13 + $0xe0] sm:$0xff] }
 0xa65   :  { %v3995_v35 = vadd.f32 %v3991_v39, %v3983_v63  ;;  %v4856_v38 = vadd.f32 %v4853_v13, %v3979_v37  ;;  %v4825_v13 = vpack.c.bf16 %v4248_v8, %v4247_v60  ;;  %v4827_v32 = vpack.c.bf16 %v4232_v45, %v4231_v54  ;;  %v4234_v39 = vld [vmem:[#allocation13 + $0x58] sm:$0xff] }
 0xa66   :  { %4533 = vst [vmem:[%s7146_s24 + $0x40] sm:$0xff] %v3994_v31  ;;  %v3992_v44 = vmul.f32 0.1, %v4854_v36  ;;  %v4829_v63 = vpack.c.bf16 %v4250_v57, %v4249_v46  ;;  %v4831_v36 = vpack.c.bf16 %v4234_v39, %v4233_v55 }
 0xa67   :  { %4534 = vst [vmem:[%s7146_s24 + $0x48] sm:$0xff] %v3995_v35  ;;  %v3993_v52 = vmul.f32 0.1, %v4856_v38  ;;  %4131 = vmatprep.mubr.f32.mxu0 %v3995_v35  ;;  %v4235_v35 = vld [vmem:[#allocation13 + $0x60] sm:$0xff]  ;;  %v4236_v38 = vld [vmem:[#allocation13 + $0x68] sm:$0xff] }
 0xa68   :  { %v3996_v48 = vadd.f32 %v3992_v44, %v3984_v1  ;;  %4132 = vmatmul.mubr.f32.vlgmr.msra.gmra.mrb[22].mxu0 %v3994_v31  ;;  %v4252_v31 = vld [vmem:[#allocation13 + $0xe8] sm:$0xff]  ;;  %v4254_v1 = vld [vmem:[#allocation13 + $0xf8] sm:$0xff]  ;;  %v4835_v44 = vpack.c.bf16 %v4236_v38, %v4235_v35 }
 0xa69   :  { %v3997_v49 = vadd.f32 %v3993_v52, %v3985_v40  ;;  %v4833_v37 = vpack.c.bf16 %v4252_v31, %v4251_v43  ;;  %v4837_v9 = vpack.c.bf16 %v4254_v1, %v4253_v41  ;;  %v4237_v40 = vld [vmem:[#allocation13 + $0x70] sm:$0xff]  ;;  %v4238_v52 = vld [vmem:[#allocation13 + $0x78] sm:$0xff] }
 0xa6a   :  { %4535 = vst [vmem:[%s7146_s24 + $0x50] sm:$0xff] %v3996_v48 }
 0xa6b   :  { %4536 = vst [vmem:[%s7146_s24 + $0x58] sm:$0xff] %v3997_v49  ;;  %4137 = vmatprep.mubr.f32.mxu0 %v3997_v49 }
 0xa6c   :  { %4138 = vmatmul.mubr.f32.gmra.mrb[24].mxu0 %v3996_v48  ;;  %v4839_v48 = vpack.c.bf16 %v4238_v52, %v4237_v40 }
 0xb3b   :  { %v4133_v19 = vpop.f32.mrb[22].mxu0 }
 0xb3c   :  { %v4135_v51 = vpop.f32.mrb[23].mxu0  ;;  %v4144_v3 = vmul.f32 %v5176_v59, %v4133_v19 }
 0xb3d   :  { %v4145_v42 = vmul.f32 %v5178_v12, %v4135_v51 }
 0xb3f   :  { %v4139_v10 = vpop.f32.mrb[24].mxu0 }
 0xb40   :  { %v4146_v5 = vmul.f32 %v5177_v4, %v4139_v10  ;;  %v4141_v7 = vpop.f32.mrb[25].mxu0  ;;  %v4255_v10 = vld [vmem:[%s7145_s23] sm:$0x3] }
 0xb41   :  { %v4147_v47 = vmul.f32 %v5179_v18, %v4141_v7 }
 0xb42   :  { %v4807_v21 = vpack.c.bf16 %v4146_v5, %v4144_v3 }
 0xb43   :  { %v4805_v22 = vpack.c.bf16 %v4147_v47, %v4145_v42 }
 0xb45   :  { %4806 = vmatprep.subr.bf16.mxu1 %v4805_v22 }
 0xb46   :  { %4808 = vmatpush1.bf16.msra.mxu1 %v4807_v21 }
 0xb47   :  { %4810 = vmatprep.subr.bf16.mxu1 %v4809_v27 }
 0xb49   :  { %4537 = vmatmul.mubr.msk.f32.vlgmr.msra.gmra.mrb[40].mxu1 %vm1260_vm5, %v4148_v20  ;;  %vm4326_vm5 = vcmask 254976  }
 0xb4a   :  { %4812 = vmatpush3.bf16.msra.mxu1 %v4811_v15 }
 0xb4b   :  { %4814 = vmatprep.subr.bf16.mxu1 %v4813_v30 }
 0xb4e   :  { %4816 = vmatpush3.bf16.msra.mxu1 %v4815_v62 }
 0xb4f   :  { %4818 = vmatprep.subr.bf16.mxu1 %v4817_v26 }
 0xb52   :  { %4820 = vmatpush3.bf16.msra.mxu1 %v4819_v17 }
 0xb53   :  { %4822 = vmatprep.subr.bf16.mxu1 %v4821_v23 }
 0xb56   :  { %4824 = vmatpush3.bf16.msra.mxu1 %v4823_v53 }
 0xb57   :  { %4826 = vmatprep.subr.bf16.mxu1 %v4825_v13 }
 0xb5a   :  { %4828 = vmatpush3.bf16.msra.mxu1 %v4827_v32 }
 0xb5b   :  { %4830 = vmatprep.subr.bf16.mxu1 %v4829_v63 }
 0xb5e   :  { %4832 = vmatpush3.bf16.msra.mxu1 %v4831_v36 }
 0xb5f   :  { %4834 = vmatprep.subr.bf16.mxu1 %v4833_v37 }
 0xb62   :  { %4836 = vmatpush3.bf16.msra.mxu1 %v4835_v44 }
 0xb63   :  { %4838 = vmatprep.subr.bf16.mxu1 %v4837_v9 }
 0xb66   :  { %4840 = vmatpush3.bf16.msra.mxu1 %v4839_v48 }
 0xc1c   :  { %v4218_v49 = vpop.f32.mrb[40].mxu1 }
 0xc1d   :  { %v4220_v19 = vpop.f32.mrb[41].mxu1 }
 0xc1e   :  { %4320 = vmatprep.mubr.f32.mxu1 %v4220_v19 }
 0xc1f   :  { %4321 = vmatmul.mubr.f32.vlgmr.msra.gmra.mrb[42].mxu1 %v4218_v49 }
 0xcf2   :  { %v4573_v51 = vpop.f32.mrb[42].mxu1 }
 0xcf3   :  { %v4574_v59 = vpop.f32.mrb[43].mxu1 }
 0xcf4   :  { %v4575_v3 = vadd.f32 %v4574_v59, %v4573_v51 }
 0xcf6   :  { %v4323_v4 = vadd.f32 %v4575_v3, %v4255_v10 }
 0xcf8   :  { %4327 = vst.msk [vmem:[#allocation14] sm:$0x3] %vm4326_vm5, %v4323_v4 }
 0xcf9   :  { %5345 = shalt.err (!%p5342_p4)
}
 0xcfa   :  { %s7179_s17 = sld [smem:[#allocation30_spill]] }
 0xd00   :  { %s5346_s12 = scalar_lea.hbm %s7179_s17, 32 }
 0xd01   :  { %p5347_p5 = scmp.ne.s32.totalorder %s7179_s17, %s5346_s12  ;;  %p5350_p6 = scmp.lt.u32.totalorder %s5346_s12, %s7179_s17 }
 0xd03   :  { %p5352_p7 = pnand %p5350_p6, %p5347_p5 }
 0xd05   :  { %5355 = shalt.err (!%p5352_p7)
}
 0xd06   :  { %4339 = dma.vmem_to_hbm [thread:$0]  %s4337_s1, 32, %s7179_s17, [#allocation4]  }
 0xd07   :  { %5364 = dma.done.wait [#allocation4], 32  }
 0xd08   :  { %5365 = vsyncadd [#allocation4], 4294967264 }
 0xd09   :  { %4345 = vsyncpa [#allocation3], 1 }
 0xd0a   :  { %4346 = vsyncpa [#allocation6], 1 }
 0xd0b   :  { %4347 = vsyncpa [#allocation9], 1 }
 0xd0c   :  { %4348 = vsyncpa [#allocation12], 1 }
 0xd0d   :  { %4349 = vsyncpa [#allocation4], 1 }

</bundles_post_ra>
